<compile_context>
chip_gen: v7x
topology: tpu7x:2x2x1
jax: 0.10.0
libtpu: 0.0.40
codegen_flags: <defaults>
</compile_context>

<pallas_src>
from functools import partial

import jax
import jax.numpy as jnp
from jax.experimental import pallas as pl
from jax.experimental.pallas import tpu as pltpu

EPS = 1e-5

# MXU operand dtype. bf16 gives ~2-6x MXU throughput (918/996 TF/s on v6e/v7x) and halves
# operand VMEM + the HBM bytes of the bf16 mid activation; accumulation stays f32.
MXU_DTYPE = jnp.bfloat16


# ----------------------------- Pallas kernels ------------------------------

def _conv3d_kernel(scale_ref, shift_ref, x_ref, w_ref, y_ref, sum_ref, ssq_ref, pad_ref,
                   *, Hp, Wp, Cin, Cout, apply_bn_relu):
    """One (n, d) output depth-slice of Conv3d(3x3x3, pad=1), im2col fused in VMEM.

    x_ref is the FULL-depth (D, Hp, Wp, Cin) block for batch n (resident in VMEM across the
    whole d loop — read from HBM once per n).  The three depth taps (d-1, d, d+1; clamped,
    masked to zero when outside [0, D)) are stacked channel-wise into one zero-halo bf16
    scratch, then 9 MXU matmuls with K=3*Cin produce the raw conv output.  Optionally the
    previous layer's BatchNorm+ReLU is applied to the taps at load time.  Per-channel
    sum / sum^2 are accumulated across the D ("arbitrary") grid axis into per-batch stats.
    """
    d = pl.program_id(1)
    D = pl.num_programs(1)

    @pl.when(d == 0)
    def _init():
        # zero-halo scratch: borders stay 0 == the conv's zero H/W padding
        pad_ref[...] = jnp.zeros_like(pad_ref)
        sum_ref[...] = jnp.zeros_like(sum_ref)
        ssq_ref[...] = jnp.zeros_like(ssq_ref)

    # Stack the three depth-tap planes channel-wise into the interior of the halo scratch.
    # Out-of-range depth taps are masked to zero AFTER the fused BN+ReLU, which is exactly
    # what zero-padding the post-activation tensor means.
    for kd in range(3):
        dd_raw = d + kd - 1
        dd = jnp.clip(dd_raw, 0, D - 1)
        in_range = jnp.logical_and(dd_raw >= 0, dd_raw < D).astype(jnp.float32)
        plane = x_ref[pl.ds(dd, 1)].reshape(Hp, Wp, Cin).astype(jnp.float32)
        if apply_bn_relu:
            # fused BatchNorm+ReLU of the *previous* conv, applied at load time
            plane = jnp.maximum(plane * scale_ref[...] + shift_ref[...], 0.0)
        pad_ref[1:Hp + 1, 1:Wp + 1, kd * Cin:(kd + 1) * Cin] = \
            (plane * in_range).astype(pad_ref.dtype)

    # fused im2col with merged depth taps: 9 MXU matmuls (Hp*Wp, 3*Cin) @ (3*Cin, Cout),
    # f32 accumulation.  (A single K=27*Cin matmul is possible via an in-VMEM concat; the
    # 9-matmul form already gives K>=128 at real UNet channel counts.)
    acc = jnp.zeros((Hp * Wp, Cout), jnp.float32)
    t = 0
    for kh in range(3):
        for kw in range(3):
            slab = pad_ref[kh:kh + Hp, kw:kw + Wp, :].reshape(Hp * Wp, 3 * Cin)
            acc = acc + jnp.dot(slab, w_ref[t], preferred_element_type=jnp.float32)
            t += 1

    # raw conv output (this conv's own BN is applied later / in its consumer);
    # conv bias is intentionally dropped — it is cancelled by train-mode BatchNorm.
    y_ref[...] = acc.reshape(Hp, Wp, Cout).astype(y_ref.dtype)

    # per-channel batch statistics (from the f32 accumulator), accumulated over the
    # "arbitrary" depth axis; one partial result per batch index so the batch axis can stay
    # "parallel" (megacore / v7x dual-TC).
    sum_ref[...] += jnp.sum(acc, axis=0).reshape(1, 1, Cout)
    ssq_ref[...] += jnp.sum(acc * acc, axis=0).reshape(1, 1, Cout)


def _bn_relu_kernel(y_ref, scale_ref, shift_ref, o_ref):
    o_ref[...] = jnp.maximum(y_ref[...] * scale_ref[...] + shift_ref[...], 0.0)


# ------------------------------ JAX wrappers --------------------------------

def _prep_weight(w_oidhw):
    """PyTorch (O, I, kd, kh, kw) -> (9 hw-taps, 3*I, O) in the MXU dtype.

    The halo scratch stacks depth taps channel-wise (channel = kd*Cin + c), so the K axis of
    each hw-tap matrix is ordered (kd, i)."""
    o, i = w_oidhw.shape[0], w_oidhw.shape[1]
    return jnp.transpose(w_oidhw, (3, 4, 2, 1, 0)).reshape(9, 3 * i, o).astype(MXU_DTYPE)


def _fused_conv3d(x_ndhwc, w_tap, in_scale, in_shift, *, apply_input_bn_relu, out_dtype):
    """Conv3d(3x3x3, pad=1) with fused-in-VMEM im2col (+optional fused input BN+ReLU).

    Returns raw conv output (N, D, Hp, Wp, Cout) and per-batch partial BN stats (N, 1, Cout).
    """
    N, D, Hp, Wp, Cin = x_ndhwc.shape
    Cout = w_tap.shape[-1]

    kernel = partial(_conv3d_kernel, Hp=Hp, Wp=Wp, Cin=Cin, Cout=Cout,
                     apply_bn_relu=apply_input_bn_relu)

    x_item = jax.dtypes.canonicalize_dtype(x_ndhwc.dtype).itemsize
    y_item = jax.dtypes.canonicalize_dtype(out_dtype).itemsize
    w_item = jax.dtypes.canonicalize_dtype(w_tap.dtype).itemsize
    cost = pl.CostEstimate(
        flops=2 * N * D * Hp * Wp * (27 * Cin) * Cout,
        transcendentals=0,
        bytes_accessed=(N * D * Hp * Wp * Cin * x_item
                        + N * D * Hp * Wp * Cout * y_item
                        + 9 * 3 * Cin * Cout * w_item
                        + 2 * N * Cout * 4))

    # NOTE: for large real UNet planes / big channel counts, Hp would also be tiled, the
    # full-depth resident input replaced by a rolling 3-deep buffer, and vmem_limit_bytes
    # set (v7x has only 64 MiB physical VMEM, v5e's scoped default is 16 MiB).  At these
    # shapes the defaults are fine.
    y, s, q = pl.pallas_call(
        kernel,
        out_shape=(jax.ShapeDtypeStruct((N, D, Hp, Wp, Cout), out_dtype),
                   jax.ShapeDtypeStruct((N, 1, Cout), jnp.float32),
                   jax.ShapeDtypeStruct((N, 1, Cout), jnp.float32)),
        grid=(N, D),
        in_specs=[pl.BlockSpec((1, 1, Cin), lambda n, d: (0, 0, 0)),      # input BN scale
                  pl.BlockSpec((1, 1, Cin), lambda n, d: (0, 0, 0)),      # input BN shift
                  # full-depth block, block index independent of d => resident across the
                  # depth loop; each input plane is DMA'd from HBM exactly once per n.
                  pl.BlockSpec((None, D, Hp, Wp, Cin), lambda n, d: (n, 0, 0, 0, 0)),
                  pl.BlockSpec((9, 3 * Cin, Cout), lambda n, d: (0, 0, 0))],  # weights
        out_specs=(pl.BlockSpec((None, None, Hp, Wp, Cout), lambda n, d: (n, d, 0, 0, 0)),
                   pl.BlockSpec((1, 1, Cout), lambda n, d: (n, 0, 0)),
                   pl.BlockSpec((1, 1, Cout), lambda n, d: (n, 0, 0))),
        scratch_shapes=[pltpu.VMEM((Hp + 2, Wp + 2, 3 * Cin), MXU_DTYPE)],
        compiler_params=pltpu.CompilerParams(
            dimension_semantics=("parallel", "arbitrary")),
        cost_estimate=cost,
    )(in_scale, in_shift, x_ndhwc, w_tap)
    return y, s, q


def _bn_scale_shift(sum_part, ssq_part, gamma, beta, count):
    """Fold per-batch partial stats into BN train-mode scale/shift (tiny, per-channel)."""
    s = jnp.sum(sum_part, axis=(0, 1))
    q = jnp.sum(ssq_part, axis=(0, 1))
    mean = s / count
    var = jnp.maximum(q / count - mean * mean, 0.0)   # biased variance (train-mode BN)
    scale = gamma / jnp.sqrt(var + EPS)
    shift = beta - mean * scale
    return scale.astype(jnp.float32), shift.astype(jnp.float32)


def _bn_relu(y_flat, scale_row, shift_row, vmem_budget_bytes=8 << 20):
    """Final BN+ReLU: one mem-bound pass over a lane-dense (rows, Wp*outc) view.

    Row tile is derived from a VMEM byte budget (in + out, double-buffered ~= 4 live tiles)
    instead of a fixed 1024, so huge L = Wp*outc at real shapes cannot blow past v7x's VMEM.
    """
    R, L = y_flat.shape
    tr = max(8, min(1024, vmem_budget_bytes // (4 * 4 * L)))
    tr = min(tr, R)
    if tr < R:
        tr = max(8, (tr // 8) * 8)   # keep sublane alignment when actually tiling
    return pl.pallas_call(
        _bn_relu_kernel,
        out_shape=jax.ShapeDtypeStruct((R, L), jnp.float32),
        grid=(pl.cdiv(R, tr),),
        in_specs=[pl.BlockSpec((tr, L), lambda i: (i, 0)),
                  pl.BlockSpec((1, L), lambda i: (0, 0)),
                  pl.BlockSpec((1, L), lambda i: (0, 0))],
        out_specs=pl.BlockSpec((tr, L), lambda i: (i, 0)),
        compiler_params=pltpu.CompilerParams(dimension_semantics=("parallel",)),
    )(y_flat, scale_row, shift_row)


@jax.jit
def down_forward(x_ncdhw, params):
    """Down.forward: MaxPool3d((1,2,2)) -> DoubleConv(inc, outc). Input/output NCDHW."""
    x = jnp.transpose(x_ncdhw, (0, 2, 3, 4, 1)).astype(jnp.float32)   # NCDHW -> NDHWC
    N, D, H, W, C = x.shape
    Hp, Wp = H // 2, W // 2
    count = N * D * Hp * Wp

    # MaxPool3d((1,2,2)): plain reshape+max — one fused XLA pass over the small input.
    # TODO(synk): fold the (1,2,2) pool into conv1's plane load so the unpooled input is
    # read from HBM exactly once and the pooled tensor never round-trips HBM.
    xp = x.reshape(N, D, Hp, 2, Wp, 2, C).max(axis=(3, 5))

    cmid = params["w1"].shape[0]
    outc = params["w2"].shape[0]

    # conv1 (raw output in MXU dtype + partial BN stats from the f32 accumulator).
    # Conv biases b1/b2 are unused on purpose: a per-channel constant shifts the batch mean
    # identically, so train-mode BatchNorm cancels it exactly.
    one = jnp.ones((1, 1, C), jnp.float32)
    zero = jnp.zeros((1, 1, C), jnp.float32)
    y1, s1, q1 = _fused_conv3d(xp, _prep_weight(params["w1"]), one, zero,
                               apply_input_bn_relu=False, out_dtype=MXU_DTYPE)
    scale1, shift1 = _bn_scale_shift(s1, q1, params["g1"], params["be1"], count)

    # conv2: conv1's BatchNorm+ReLU is fused into conv2's input read (applied in f32).
    y2, s2, q2 = _fused_conv3d(y1, _prep_weight(params["w2"]),
                               scale1.reshape(1, 1, cmid), shift1.reshape(1, 1, cmid),
                               apply_input_bn_relu=True, out_dtype=jnp.float32)
    scale2, shift2 = _bn_scale_shift(s2, q2, params["g2"], params["be2"], count)

    # final BatchNorm+ReLU over a lane-dense flattened view (Wp*outc lanes).
    y2f = y2.reshape(N * D * Hp, Wp * outc)
    sc = jnp.tile(scale2, Wp).reshape(1, Wp * outc)
    sh = jnp.tile(shift2, Wp).reshape(1, Wp * outc)
    out = _bn_relu(y2f, sc, sh).reshape(N, D, Hp, Wp, outc)
    # TODO(synk): fuse this NDHWC->NCDHW transpose into _bn_relu's out_spec / return NDHWC
    # if the consumer accepts it (saves one output-sized HBM pass).
    return jnp.transpose(out, (0, 4, 1, 2, 3))                        # NDHWC -> NCDHW


# --------------------------- pure-JAX reference ------------------------------

def _ref_down(x_ncdhw, params):
    def conv_bn_relu(x, w, b, g, be):
        y = jax.lax.conv_general_dilated(
            x, w, (1, 1, 1), ((1, 1), (1, 1), (1, 1)),
            dimension_numbers=("NCDHW", "OIDHW", "NCDHW"),
            precision=jax.lax.Precision.HIGHEST) + b.reshape(1, -1, 1, 1, 1)
        mean = y.mean(axis=(0, 2, 3, 4), keepdims=True)
        var = y.var(axis=(0, 2, 3, 4), keepdims=True)
        yn = (y - mean) / jnp.sqrt(var + EPS)
        return jnp.maximum(yn * g.reshape(1, -1, 1, 1, 1) + be.reshape(1, -1, 1, 1, 1), 0.0)

    N, C, D, H, W = x_ncdhw.shape
    x = x_ncdhw.reshape(N, C, D, H // 2, 2, W // 2, 2).max(axis=(4, 6))
    x = conv_bn_relu(x, params["w1"], params["b1"], params["g1"], params["be1"])
    x = conv_bn_relu(x, params["w2"], params["b2"], params["g2"], params["be2"])
    return x


# ---------------------------------- main -------------------------------------

if __name__ == "__main__":
    N, INC, OUTC = 2, 4, 8
    D, H, W = 4, 16, 16
    MIDC = OUTC  # DoubleConv default: midc = outc

    key = jax.random.PRNGKey(0)
    k1, k2, k3, k4, kx = jax.random.split(key, 5)

    params = {
        # Conv3d(inc, midc, 3x3x3) — PyTorch weight layout (out, in, kd, kh, kw)
        "w1": (jax.random.normal(k1, (MIDC, INC, 3, 3, 3), jnp.float32) * 0.1),
        "b1": (jax.random.normal(k2, (MIDC,), jnp.float32) * 0.1),
        "g1": jnp.ones((MIDC,), jnp.float32),    # BatchNorm3d default weight
        "be1": jnp.zeros((MIDC,), jnp.float32),  # BatchNorm3d default bias
        # Conv3d(midc, outc, 3x3x3)
        "w2": (jax.random.normal(k3, (OUTC, MIDC, 3, 3, 3), jnp.float32) * 0.1),
        "b2": (jax.random.normal(k4, (OUTC,), jnp.float32) * 0.1),
        "g2": jnp.ones((OUTC,), jnp.float32),
        "be2": jnp.zeros((OUTC,), jnp.float32),
    }

    x = jax.random.normal(kx, (N, INC, D, H, W), jnp.float32)   # NCDHW input

    out = down_forward(x, params)
    out = jax.block_until_ready(out)
    assert out.shape == (N, OUTC, D, H // 2, W // 2), out.shape

    ref = jax.block_until_ready(_ref_down(x, params))
    err = float(jnp.max(jnp.abs(out - ref)))
    # bf16 MXU operands + bf16 mid activation -> relaxed tolerance (f32 path would hold 2e-3)
    tol = 2e-3 if MXU_DTYPE == jnp.float32 else 5e-2
    assert err < tol, f"max abs error vs reference too large: {err}"

    print("KERNEL_OK")
</pallas_src>

<mosaic_0001>
module attributes {stable_mosaic.version = 11 : i64} {
  func.func @_conv3d_kernel(%arg0: i32, %arg1: i32, %arg2: memref<1x1x4xf32, #tpu.memory_space<vmem>>, %arg3: memref<1x1x4xf32, #tpu.memory_space<vmem>>, %arg4: memref<1x4x8x8x4xf32, #tpu.memory_space<vmem>>, %arg5: memref<9x12x8xbf16, #tpu.memory_space<vmem>>, %arg6: memref<1x1x8x8x8xbf16, #tpu.memory_space<vmem>>, %arg7: memref<1x1x8xf32, #tpu.memory_space<vmem>>, %arg8: memref<1x1x8xf32, #tpu.memory_space<vmem>>, %arg9: memref<10x10x12xbf16, #tpu.memory_space<vmem>>) attributes {dimension_semantics = [#tpu.dimension_semantics<parallel>, #tpu.dimension_semantics<arbitrary>], iteration_bounds = array<i64: 2, 4>, scalar_prefetch = 0 : i64, scratch_operands = 1 : i64, tpu.core_type = #tpu.core_type<tc>, window_params = [{pipeline_mode = #tpu.pipeline_mode<synchronous>, transform_indices = @transform_0, window_bounds = array<i64: 1, 1, 4>}, {pipeline_mode = #tpu.pipeline_mode<synchronous>, transform_indices = @transform_1, window_bounds = array<i64: 1, 1, 4>}, {transform_indices = @transform_2, window_bounds = array<i64: 1, 4, 8, 8, 4>}, {pipeline_mode = #tpu.pipeline_mode<synchronous>, transform_indices = @transform_3, window_bounds = array<i64: 9, 12, 8>}, {transform_indices = @transform_4, window_bounds = array<i64: 1, 1, 8, 8, 8>}, {transform_indices = @transform_5, window_bounds = array<i64: 1, 1, 8>}, {transform_indices = @transform_6, window_bounds = array<i64: 1, 1, 8>}]} {
    %c0_i32 = arith.constant 0 : i32
    %0 = arith.cmpi eq, %arg1, %c0_i32 : i32
    %1 = arith.extui %0 : i1 to i32
    %c0_i32_0 = arith.constant 0 : i32
    %2 = arith.cmpi ne, %1, %c0_i32_0 : i32
    scf.if %2 {
      %cst_109 = arith.constant 0.000000e+00 : bf16
      %125 = vector.broadcast %cst_109 : bf16 to vector<10x10x12xbf16>
      %c0_110 = arith.constant 0 : index
      %c0_111 = arith.constant 0 : index
      %c0_112 = arith.constant 0 : index
      %126 = vector.load %arg9[%c0_110, %c0_111, %c0_112] : memref<10x10x12xbf16, #tpu.memory_space<vmem>>, vector<10x10x12xbf16>
      tpu.vector_store %arg9[%c0_110, %c0_111, %c0_112], %125 {strides = array<i32>} : memref<10x10x12xbf16, #tpu.memory_space<vmem>>, vector<10x10x12xbf16>,
      %cst_113 = arith.constant 0.000000e+00 : f32
      %127 = vector.broadcast %cst_113 : f32 to vector<1x1x8xf32>
      %c0_114 = arith.constant 0 : index
      %c0_115 = arith.constant 0 : index
      %c0_116 = arith.constant 0 : index
      %128 = vector.load %arg7[%c0_114, %c0_115, %c0_116] : memref<1x1x8xf32, #tpu.memory_space<vmem>>, vector<1x1x8xf32>
      tpu.vector_store %arg7[%c0_114, %c0_115, %c0_116], %127 {strides = array<i32>} : memref<1x1x8xf32, #tpu.memory_space<vmem>>, vector<1x1x8xf32>,
      %cst_117 = arith.constant 0.000000e+00 : f32
      %129 = vector.broadcast %cst_117 : f32 to vector<1x1x8xf32>
      %c0_118 = arith.constant 0 : index
      %c0_119 = arith.constant 0 : index
      %c0_120 = arith.constant 0 : index
      %130 = vector.load %arg8[%c0_118, %c0_119, %c0_120] : memref<1x1x8xf32, #tpu.memory_space<vmem>>, vector<1x1x8xf32>
      tpu.vector_store %arg8[%c0_118, %c0_119, %c0_120], %129 {strides = array<i32>} : memref<1x1x8xf32, #tpu.memory_space<vmem>>, vector<1x1x8xf32>,
    } else {
    }
    %c0_i32_1 = arith.constant 0 : i32
    %3 = arith.addi %arg1, %c0_i32_1 : i32
    %c1_i32 = arith.constant 1 : i32
    %4 = arith.subi %3, %c1_i32 : i32
    %c0_i32_2 = arith.constant 0 : i32
    %c3_i32 = arith.constant 3 : i32
    %5 = arith.maxsi %c0_i32_2, %4 : i32
    %6 = arith.minsi %c3_i32, %5 : i32
    %c0_i32_3 = arith.constant 0 : i32
    %7 = arith.cmpi sge, %4, %c0_i32_3 : i32
    %c4_i32 = arith.constant 4 : i32
    %8 = arith.cmpi slt, %4, %c4_i32 : i32
    %9 = arith.andi %7, %8 : i1
    %10 = arith.extui %9 : i1 to i32
    %11 = arith.sitofp %10 : i32 to f32
    %c0 = arith.constant 0 : index
    %12 = arith.index_cast %6 : i32 to index
    %c0_4 = arith.constant 0 : index
    %c0_5 = arith.constant 0 : index
    %c0_6 = arith.constant 0 : index
    %13 = vector.load %arg4[%c0, %12, %c0_4, %c0_5, %c0_6] : memref<1x4x8x8x4xf32, #tpu.memory_space<vmem>>, vector<1x1x8x8x4xf32>
    %14 = vector.shape_cast %13 : vector<1x1x8x8x4xf32> to vector<1x8x8x4xf32>
    %15 = vector.shape_cast %14 : vector<1x8x8x4xf32> to vector<8x8x4xf32>
    %16 = vector.broadcast %11 : f32 to vector<8x8x4xf32>
    %17 = arith.mulf %15, %16 : vector<8x8x4xf32>
    %18 = arith.truncf %17 : vector<8x8x4xf32> to vector<8x8x4xbf16>
    %c1 = arith.constant 1 : index
    %c1_7 = arith.constant 1 : index
    %c0_8 = arith.constant 0 : index
    %19 = vector.load %arg9[%c1, %c1_7, %c0_8] : memref<10x10x12xbf16, #tpu.memory_space<vmem>>, vector<8x8x4xbf16>
    tpu.vector_store %arg9[%c1, %c1_7, %c0_8], %18 {strides = array<i32>} : memref<10x10x12xbf16, #tpu.memory_space<vmem>>, vector<8x8x4xbf16>,
    %c1_i32_9 = arith.constant 1 : i32
    %20 = arith.addi %arg1, %c1_i32_9 : i32
    %c1_i32_10 = arith.constant 1 : i32
    %21 = arith.subi %20, %c1_i32_10 : i32
    %c0_i32_11 = arith.constant 0 : i32
    %c3_i32_12 = arith.constant 3 : i32
    %22 = arith.maxsi %c0_i32_11, %21 : i32
    %23 = arith.minsi %c3_i32_12, %22 : i32
    %c0_i32_13 = arith.constant 0 : i32
    %24 = arith.cmpi sge, %21, %c0_i32_13 : i32
    %c4_i32_14 = arith.constant 4 : i32
    %25 = arith.cmpi slt, %21, %c4_i32_14 : i32
    %26 = arith.andi %24, %25 : i1
    %27 = arith.extui %26 : i1 to i32
    %28 = arith.sitofp %27 : i32 to f32
    %c0_15 = arith.constant 0 : index
    %29 = arith.index_cast %23 : i32 to index
    %c0_16 = arith.constant 0 : index
    %c0_17 = arith.constant 0 : index
    %c0_18 = arith.constant 0 : index
    %30 = vector.load %arg4[%c0_15, %29, %c0_16, %c0_17, %c0_18] : memref<1x4x8x8x4xf32, #tpu.memory_space<vmem>>, vector<1x1x8x8x4xf32>
    %31 = vector.shape_cast %30 : vector<1x1x8x8x4xf32> to vector<1x8x8x4xf32>
    %32 = vector.shape_cast %31 : vector<1x8x8x4xf32> to vector<8x8x4xf32>
    %33 = vector.broadcast %28 : f32 to vector<8x8x4xf32>
    %34 = arith.mulf %32, %33 : vector<8x8x4xf32>
    %35 = arith.truncf %34 : vector<8x8x4xf32> to vector<8x8x4xbf16>
    %c1_19 = arith.constant 1 : index
    %c1_20 = arith.constant 1 : index
    %c4 = arith.constant 4 : index
    %36 = vector.load %arg9[%c1_19, %c1_20, %c4] : memref<10x10x12xbf16, #tpu.memory_space<vmem>>, vector<8x8x4xbf16>
    tpu.vector_store %arg9[%c1_19, %c1_20, %c4], %35 {strides = array<i32>} : memref<10x10x12xbf16, #tpu.memory_space<vmem>>, vector<8x8x4xbf16>,
    %c2_i32 = arith.constant 2 : i32
    %37 = arith.addi %arg1, %c2_i32 : i32
    %c1_i32_21 = arith.constant 1 : i32
    %38 = arith.subi %37, %c1_i32_21 : i32
    %c0_i32_22 = arith.constant 0 : i32
    %c3_i32_23 = arith.constant 3 : i32
    %39 = arith.maxsi %c0_i32_22, %38 : i32
    %40 = arith.minsi %c3_i32_23, %39 : i32
    %c0_i32_24 = arith.constant 0 : i32
    %41 = arith.cmpi sge, %38, %c0_i32_24 : i32
    %c4_i32_25 = arith.constant 4 : i32
    %42 = arith.cmpi slt, %38, %c4_i32_25 : i32
    %43 = arith.andi %41, %42 : i1
    %44 = arith.extui %43 : i1 to i32
    %45 = arith.sitofp %44 : i32 to f32
    %c0_26 = arith.constant 0 : index
    %46 = arith.index_cast %40 : i32 to index
    %c0_27 = arith.constant 0 : index
    %c0_28 = arith.constant 0 : index
    %c0_29 = arith.constant 0 : index
    %47 = vector.load %arg4[%c0_26, %46, %c0_27, %c0_28, %c0_29] : memref<1x4x8x8x4xf32, #tpu.memory_space<vmem>>, vector<1x1x8x8x4xf32>
    %48 = vector.shape_cast %47 : vector<1x1x8x8x4xf32> to vector<1x8x8x4xf32>
    %49 = vector.shape_cast %48 : vector<1x8x8x4xf32> to vector<8x8x4xf32>
    %50 = vector.broadcast %45 : f32 to vector<8x8x4xf32>
    %51 = arith.mulf %49, %50 : vector<8x8x4xf32>
    %52 = arith.truncf %51 : vector<8x8x4xf32> to vector<8x8x4xbf16>
    %c1_30 = arith.constant 1 : index
    %c1_31 = arith.constant 1 : index
    %c8 = arith.constant 8 : index
    %53 = vector.load %arg9[%c1_30, %c1_31, %c8] : memref<10x10x12xbf16, #tpu.memory_space<vmem>>, vector<8x8x4xbf16>
    tpu.vector_store %arg9[%c1_30, %c1_31, %c8], %52 {strides = array<i32>} : memref<10x10x12xbf16, #tpu.memory_space<vmem>>, vector<8x8x4xbf16>,
    %cst = arith.constant 0.000000e+00 : f32
    %54 = vector.broadcast %cst : f32 to vector<64x8xf32>
    %c0_32 = arith.constant 0 : index
    %c0_33 = arith.constant 0 : index
    %c0_34 = arith.constant 0 : index
    %55 = vector.load %arg9[%c0_32, %c0_33, %c0_34] : memref<10x10x12xbf16, #tpu.memory_space<vmem>>, vector<8x8x12xbf16>
    %56 = vector.shape_cast %55 : vector<8x8x12xbf16> to vector<64x12xbf16>
    %c0_35 = arith.constant 0 : index
    %c0_36 = arith.constant 0 : index
    %c0_37 = arith.constant 0 : index
    %57 = vector.load %arg5[%c0_35, %c0_36, %c0_37] : memref<9x12x8xbf16, #tpu.memory_space<vmem>>, vector<1x12x8xbf16>
    %58 = vector.shape_cast %57 : vector<1x12x8xbf16> to vector<12x8xbf16>
    %cst_38 = arith.constant dense<0.000000e+00> : vector<64x8xf32>
    %59 = tpu.matmul %56, %58, %cst_38 {dimension_numbers = #tpu.dot_dimension_numbers<[1], [0], [0], [1], [0, 0, 1, 1], [], []>} : vector<64x12xbf16>, vector<12x8xbf16>, vector<64x8xf32> -> vector<64x8xf32>
    %60 = arith.addf %54, %59 : vector<64x8xf32>
    %c0_39 = arith.constant 0 : index
    %c1_40 = arith.constant 1 : index
    %c0_41 = arith.constant 0 : index
    %61 = vector.load %arg9[%c0_39, %c1_40, %c0_41] : memref<10x10x12xbf16, #tpu.memory_space<vmem>>, vector<8x8x12xbf16>
    %62 = vector.shape_cast %61 : vector<8x8x12xbf16> to vector<64x12xbf16>
    %c1_42 = arith.constant 1 : index
    %c0_43 = arith.constant 0 : index
    %c0_44 = arith.constant 0 : index
    %63 = vector.load %arg5[%c1_42, %c0_43, %c0_44] : memref<9x12x8xbf16, #tpu.memory_space<vmem>>, vector<1x12x8xbf16>
    %64 = vector.shape_cast %63 : vector<1x12x8xbf16> to vector<12x8xbf16>
    %cst_45 = arith.constant dense<0.000000e+00> : vector<64x8xf32>
    %65 = tpu.matmul %62, %64, %cst_45 {dimension_numbers = #tpu.dot_dimension_numbers<[1], [0], [0], [1], [0, 0, 1, 1], [], []>} : vector<64x12xbf16>, vector<12x8xbf16>, vector<64x8xf32> -> vector<64x8xf32>
    %66 = arith.addf %60, %65 : vector<64x8xf32>
    %c0_46 = arith.constant 0 : index
    %c2 = arith.constant 2 : index
    %c0_47 = arith.constant 0 : index
    %67 = vector.load %arg9[%c0_46, %c2, %c0_47] : memref<10x10x12xbf16, #tpu.memory_space<vmem>>, vector<8x8x12xbf16>
    %68 = vector.shape_cast %67 : vector<8x8x12xbf16> to vector<64x12xbf16>
    %c2_48 = arith.constant 2 : index
    %c0_49 = arith.constant 0 : index
    %c0_50 = arith.constant 0 : index
    %69 = vector.load %arg5[%c2_48, %c0_49, %c0_50] : memref<9x12x8xbf16, #tpu.memory_space<vmem>>, vector<1x12x8xbf16>
    %70 = vector.shape_cast %69 : vector<1x12x8xbf16> to vector<12x8xbf16>
    %cst_51 = arith.constant dense<0.000000e+00> : vector<64x8xf32>
    %71 = tpu.matmul %68, %70, %cst_51 {dimension_numbers = #tpu.dot_dimension_numbers<[1], [0], [0], [1], [0, 0, 1, 1], [], []>} : vector<64x12xbf16>, vector<12x8xbf16>, vector<64x8xf32> -> vector<64x8xf32>
    %72 = arith.addf %66, %71 : vector<64x8xf32>
    %c1_52 = arith.constant 1 : index
    %c0_53 = arith.constant 0 : index
    %c0_54 = arith.constant 0 : index
    %73 = vector.load %arg9[%c1_52, %c0_53, %c0_54] : memref<10x10x12xbf16, #tpu.memory_space<vmem>>, vector<8x8x12xbf16>
    %74 = vector.shape_cast %73 : vector<8x8x12xbf16> to vector<64x12xbf16>
    %c3 = arith.constant 3 : index
    %c0_55 = arith.constant 0 : index
    %c0_56 = arith.constant 0 : index
    %75 = vector.load %arg5[%c3, %c0_55, %c0_56] : memref<9x12x8xbf16, #tpu.memory_space<vmem>>, vector<1x12x8xbf16>
    %76 = vector.shape_cast %75 : vector<1x12x8xbf16> to vector<12x8xbf16>
    %cst_57 = arith.constant dense<0.000000e+00> : vector<64x8xf32>
    %77 = tpu.matmul %74, %76, %cst_57 {dimension_numbers = #tpu.dot_dimension_numbers<[1], [0], [0], [1], [0, 0, 1, 1], [], []>} : vector<64x12xbf16>, vector<12x8xbf16>, vector<64x8xf32> -> vector<64x8xf32>
    %78 = arith.addf %72, %77 : vector<64x8xf32>
    %c1_58 = arith.constant 1 : index
    %c1_59 = arith.constant 1 : index
    %c0_60 = arith.constant 0 : index
    %79 = vector.load %arg9[%c1_58, %c1_59, %c0_60] : memref<10x10x12xbf16, #tpu.memory_space<vmem>>, vector<8x8x12xbf16>
    %80 = vector.shape_cast %79 : vector<8x8x12xbf16> to vector<64x12xbf16>
    %c4_61 = arith.constant 4 : index
    %c0_62 = arith.constant 0 : index
    %c0_63 = arith.constant 0 : index
    %81 = vector.load %arg5[%c4_61, %c0_62, %c0_63] : memref<9x12x8xbf16, #tpu.memory_space<vmem>>, vector<1x12x8xbf16>
    %82 = vector.shape_cast %81 : vector<1x12x8xbf16> to vector<12x8xbf16>
    %cst_64 = arith.constant dense<0.000000e+00> : vector<64x8xf32>
    %83 = tpu.matmul %80, %82, %cst_64 {dimension_numbers = #tpu.dot_dimension_numbers<[1], [0], [0], [1], [0, 0, 1, 1], [], []>} : vector<64x12xbf16>, vector<12x8xbf16>, vector<64x8xf32> -> vector<64x8xf32>
    %84 = arith.addf %78, %83 : vector<64x8xf32>
    %c1_65 = arith.constant 1 : index
    %c2_66 = arith.constant 2 : index
    %c0_67 = arith.constant 0 : index
    %85 = vector.load %arg9[%c1_65, %c2_66, %c0_67] : memref<10x10x12xbf16, #tpu.memory_space<vmem>>, vector<8x8x12xbf16>
    %86 = vector.shape_cast %85 : vector<8x8x12xbf16> to vector<64x12xbf16>
    %c5 = arith.constant 5 : index
    %c0_68 = arith.constant 0 : index
    %c0_69 = arith.constant 0 : index
    %87 = vector.load %arg5[%c5, %c0_68, %c0_69] : memref<9x12x8xbf16, #tpu.memory_space<vmem>>, vector<1x12x8xbf16>
    %88 = vector.shape_cast %87 : vector<1x12x8xbf16> to vector<12x8xbf16>
    %cst_70 = arith.constant dense<0.000000e+00> : vector<64x8xf32>
    %89 = tpu.matmul %86, %88, %cst_70 {dimension_numbers = #tpu.dot_dimension_numbers<[1], [0], [0], [1], [0, 0, 1, 1], [], []>} : vector<64x12xbf16>, vector<12x8xbf16>, vector<64x8xf32> -> vector<64x8xf32>
    %90 = arith.addf %84, %89 : vector<64x8xf32>
    %c2_71 = arith.constant 2 : index
    %c0_72 = arith.constant 0 : index
    %c0_73 = arith.constant 0 : index
    %91 = vector.load %arg9[%c2_71, %c0_72, %c0_73] : memref<10x10x12xbf16, #tpu.memory_space<vmem>>, vector<8x8x12xbf16>
    %92 = vector.shape_cast %91 : vector<8x8x12xbf16> to vector<64x12xbf16>
    %c6 = arith.constant 6 : index
    %c0_74 = arith.constant 0 : index
    %c0_75 = arith.constant 0 : index
    %93 = vector.load %arg5[%c6, %c0_74, %c0_75] : memref<9x12x8xbf16, #tpu.memory_space<vmem>>, vector<1x12x8xbf16>
    %94 = vector.shape_cast %93 : vector<1x12x8xbf16> to vector<12x8xbf16>
    %cst_76 = arith.constant dense<0.000000e+00> : vector<64x8xf32>
    %95 = tpu.matmul %92, %94, %cst_76 {dimension_numbers = #tpu.dot_dimension_numbers<[1], [0], [0], [1], [0, 0, 1, 1], [], []>} : vector<64x12xbf16>, vector<12x8xbf16>, vector<64x8xf32> -> vector<64x8xf32>
    %96 = arith.addf %90, %95 : vector<64x8xf32>
    %c2_77 = arith.constant 2 : index
    %c1_78 = arith.constant 1 : index
    %c0_79 = arith.constant 0 : index
    %97 = vector.load %arg9[%c2_77, %c1_78, %c0_79] : memref<10x10x12xbf16, #tpu.memory_space<vmem>>, vector<8x8x12xbf16>
    %98 = vector.shape_cast %97 : vector<8x8x12xbf16> to vector<64x12xbf16>
    %c7 = arith.constant 7 : index
    %c0_80 = arith.constant 0 : index
    %c0_81 = arith.constant 0 : index
    %99 = vector.load %arg5[%c7, %c0_80, %c0_81] : memref<9x12x8xbf16, #tpu.memory_space<vmem>>, vector<1x12x8xbf16>
    %100 = vector.shape_cast %99 : vector<1x12x8xbf16> to vector<12x8xbf16>
    %cst_82 = arith.constant dense<0.000000e+00> : vector<64x8xf32>
    %101 = tpu.matmul %98, %100, %cst_82 {dimension_numbers = #tpu.dot_dimension_numbers<[1], [0], [0], [1], [0, 0, 1, 1], [], []>} : vector<64x12xbf16>, vector<12x8xbf16>, vector<64x8xf32> -> vector<64x8xf32>
    %102 = arith.addf %96, %101 : vector<64x8xf32>
    %c2_83 = arith.constant 2 : index
    %c2_84 = arith.constant 2 : index
    %c0_85 = arith.constant 0 : index
    %103 = vector.load %arg9[%c2_83, %c2_84, %c0_85] : memref<10x10x12xbf16, #tpu.memory_space<vmem>>, vector<8x8x12xbf16>
    %104 = vector.shape_cast %103 : vector<8x8x12xbf16> to vector<64x12xbf16>
    %c8_86 = arith.constant 8 : index
    %c0_87 = arith.constant 0 : index
    %c0_88 = arith.constant 0 : index
    %105 = vector.load %arg5[%c8_86, %c0_87, %c0_88] : memref<9x12x8xbf16, #tpu.memory_space<vmem>>, vector<1x12x8xbf16>
    %106 = vector.shape_cast %105 : vector<1x12x8xbf16> to vector<12x8xbf16>
    %cst_89 = arith.constant dense<0.000000e+00> : vector<64x8xf32>
    %107 = tpu.matmul %104, %106, %cst_89 {dimension_numbers = #tpu.dot_dimension_numbers<[1], [0], [0], [1], [0, 0, 1, 1], [], []>} : vector<64x12xbf16>, vector<12x8xbf16>, vector<64x8xf32> -> vector<64x8xf32>
    %108 = arith.addf %102, %107 : vector<64x8xf32>
    %109 = vector.shape_cast %108 : vector<64x8xf32> to vector<8x8x8xf32>
    %110 = arith.truncf %109 : vector<8x8x8xf32> to vector<8x8x8xbf16>
    %c0_90 = arith.constant 0 : index
    %c0_91 = arith.constant 0 : index
    %c0_92 = arith.constant 0 : index
    %c0_93 = arith.constant 0 : index
    %c0_94 = arith.constant 0 : index
    %111 = vector.load %arg6[%c0_90, %c0_91, %c0_92, %c0_93, %c0_94] : memref<1x1x8x8x8xbf16, #tpu.memory_space<vmem>>, vector<1x1x8x8x8xbf16>
    %112 = vector.shape_cast %111 : vector<1x1x8x8x8xbf16> to vector<8x8x8xbf16>
    %113 = vector.shape_cast %110 : vector<8x8x8xbf16> to vector<1x1x8x8x8xbf16>
    tpu.vector_store %arg6[%c0_90, %c0_91, %c0_92, %c0_93, %c0_94], %113 {strides = array<i32>} : memref<1x1x8x8x8xbf16, #tpu.memory_space<vmem>>, vector<1x1x8x8x8xbf16>,
    %c0_95 = arith.constant 0 : index
    %c0_96 = arith.constant 0 : index
    %c0_97 = arith.constant 0 : index
    %114 = vector.load %arg7[%c0_95, %c0_96, %c0_97] : memref<1x1x8xf32, #tpu.memory_space<vmem>>, vector<1x1x8xf32>
    %cst_98 = arith.constant dense<0.000000e+00> : vector<8xf32>
    %115 = vector.multi_reduction <add>, %108, %cst_98 [0] : vector<64x8xf32> to vector<8xf32>
    %116 = vector.shape_cast %115 : vector<8xf32> to vector<1x1x8xf32>
    %117 = arith.addf %114, %116 : vector<1x1x8xf32>
    %c0_99 = arith.constant 0 : index
    %c0_100 = arith.constant 0 : index
    %c0_101 = arith.constant 0 : index
    %118 = vector.load %arg7[%c0_99, %c0_100, %c0_101] : memref<1x1x8xf32, #tpu.memory_space<vmem>>, vector<1x1x8xf32>
    tpu.vector_store %arg7[%c0_99, %c0_100, %c0_101], %117 {strides = array<i32>} : memref<1x1x8xf32, #tpu.memory_space<vmem>>, vector<1x1x8xf32>,
    %c0_102 = arith.constant 0 : index
    %c0_103 = arith.constant 0 : index
    %c0_104 = arith.constant 0 : index
    %119 = vector.load %arg8[%c0_102, %c0_103, %c0_104] : memref<1x1x8xf32, #tpu.memory_space<vmem>>, vector<1x1x8xf32>
    %120 = arith.mulf %108, %108 : vector<64x8xf32>
    %cst_105 = arith.constant dense<0.000000e+00> : vector<8xf32>
    %121 = vector.multi_reduction <add>, %120, %cst_105 [0] : vector<64x8xf32> to vector<8xf32>
    %122 = vector.shape_cast %121 : vector<8xf32> to vector<1x1x8xf32>
    %123 = arith.addf %119, %122 : vector<1x1x8xf32>
    %c0_106 = arith.constant 0 : index
    %c0_107 = arith.constant 0 : index
    %c0_108 = arith.constant 0 : index
    %124 = vector.load %arg8[%c0_106, %c0_107, %c0_108] : memref<1x1x8xf32, #tpu.memory_space<vmem>>, vector<1x1x8xf32>
    tpu.vector_store %arg8[%c0_106, %c0_107, %c0_108], %123 {strides = array<i32>} : memref<1x1x8xf32, #tpu.memory_space<vmem>>, vector<1x1x8xf32>,
    return
  }
  func.func @transform_0(%arg0: i32, %arg1: i32) -> (i32, i32, i32) {
    %c0_i32 = arith.constant 0 : i32
    %c0_i32_0 = arith.constant 0 : i32
    %c0_i32_1 = arith.constant 0 : i32
    %c0_i32_2 = arith.constant 0 : i32
    return %c0_i32, %c0_i32_0, %c0_i32_1 : i32, i32, i32
  }
  func.func @transform_1(%arg0: i32, %arg1: i32) -> (i32, i32, i32) {
    %c0_i32 = arith.constant 0 : i32
    %c0_i32_0 = arith.constant 0 : i32
    %c0_i32_1 = arith.constant 0 : i32
    %c0_i32_2 = arith.constant 0 : i32
    return %c0_i32, %c0_i32_0, %c0_i32_1 : i32, i32, i32
  }
  func.func @transform_2(%arg0: i32, %arg1: i32) -> (i32, i32, i32, i32, i32) {
    %c0_i32 = arith.constant 0 : i32
    %c0_i32_0 = arith.constant 0 : i32
    %c0_i32_1 = arith.constant 0 : i32
    %c0_i32_2 = arith.constant 0 : i32
    %c0_i32_3 = arith.constant 0 : i32
    return %arg0, %c0_i32, %c0_i32_0, %c0_i32_1, %c0_i32_2 : i32, i32, i32, i32, i32
  }
  func.func @transform_3(%arg0: i32, %arg1: i32) -> (i32, i32, i32) {
    %c0_i32 = arith.constant 0 : i32
    %c0_i32_0 = arith.constant 0 : i32
    %c0_i32_1 = arith.constant 0 : i32
    %c0_i32_2 = arith.constant 0 : i32
    return %c0_i32, %c0_i32_0, %c0_i32_1 : i32, i32, i32
  }
  func.func @transform_4(%arg0: i32, %arg1: i32) -> (i32, i32, i32, i32, i32) {
    %c0_i32 = arith.constant 0 : i32
    %c0_i32_0 = arith.constant 0 : i32
    %c0_i32_1 = arith.constant 0 : i32
    %c0_i32_2 = arith.constant 0 : i32
    return %arg0, %arg1, %c0_i32, %c0_i32_0, %c0_i32_1 : i32, i32, i32, i32, i32
  }
  func.func @transform_5(%arg0: i32, %arg1: i32) -> (i32, i32, i32) {
    %c0_i32 = arith.constant 0 : i32
    %c0_i32_0 = arith.constant 0 : i32
    %c0_i32_1 = arith.constant 0 : i32
    return %arg0, %c0_i32, %c0_i32_0 : i32, i32, i32
  }
  func.func @transform_6(%arg0: i32, %arg1: i32) -> (i32, i32, i32) {
    %c0_i32 = arith.constant 0 : i32
    %c0_i32_0 = arith.constant 0 : i32
    %c0_i32_1 = arith.constant 0 : i32
    return %arg0, %c0_i32, %c0_i32_0 : i32, i32, i32
  }
}

module attributes {stable_mosaic.version = 11 : i64} {
  func.func @_conv3d_kernel(%arg0: i32, %arg1: i32, %arg2: memref<1x1x8xf32, #tpu.memory_space<vmem>>, %arg3: memref<1x1x8xf32, #tpu.memory_space<vmem>>, %arg4: memref<1x4x8x8x8xbf16, #tpu.memory_space<vmem>>, %arg5: memref<9x24x8xbf16, #tpu.memory_space<vmem>>, %arg6: memref<1x1x8x8x8xf32, #tpu.memory_space<vmem>>, %arg7: memref<1x1x8xf32, #tpu.memory_space<vmem>>, %arg8: memref<1x1x8xf32, #tpu.memory_space<vmem>>, %arg9: memref<10x10x24xbf16, #tpu.memory_space<vmem>>) attributes {dimension_semantics = [#tpu.dimension_semantics<parallel>, #tpu.dimension_semantics<arbitrary>], iteration_bounds = array<i64: 2, 4>, scalar_prefetch = 0 : i64, scratch_operands = 1 : i64, tpu.core_type = #tpu.core_type<tc>, window_params = [{pipeline_mode = #tpu.pipeline_mode<synchronous>, transform_indices = @transform_0, window_bounds = array<i64: 1, 1, 8>}, {pipeline_mode = #tpu.pipeline_mode<synchronous>, transform_indices = @transform_1, window_bounds = array<i64: 1, 1, 8>}, {transform_indices = @transform_2, window_bounds = array<i64: 1, 4, 8, 8, 8>}, {pipeline_mode = #tpu.pipeline_mode<synchronous>, transform_indices = @transform_3, window_bounds = array<i64: 9, 24, 8>}, {transform_indices = @transform_4, window_bounds = array<i64: 1, 1, 8, 8, 8>}, {transform_indices = @transform_5, window_bounds = array<i64: 1, 1, 8>}, {transform_indices = @transform_6, window_bounds = array<i64: 1, 1, 8>}]} {
    %c0_i32 = arith.constant 0 : i32
    %0 = arith.cmpi eq, %arg1, %c0_i32 : i32
    %1 = arith.extui %0 : i1 to i32
    %c0_i32_0 = arith.constant 0 : i32
    %2 = arith.cmpi ne, %1, %c0_i32_0 : i32
    scf.if %2 {
      %cst_129 = arith.constant 0.000000e+00 : bf16
      %151 = vector.broadcast %cst_129 : bf16 to vector<10x10x24xbf16>
      %c0_130 = arith.constant 0 : index
      %c0_131 = arith.constant 0 : index
      %c0_132 = arith.constant 0 : index
      %152 = vector.load %arg9[%c0_130, %c0_131, %c0_132] : memref<10x10x24xbf16, #tpu.memory_space<vmem>>, vector<10x10x24xbf16>
      tpu.vector_store %arg9[%c0_130, %c0_131, %c0_132], %151 {strides = array<i32>} : memref<10x10x24xbf16, #tpu.memory_space<vmem>>, vector<10x10x24xbf16>,
      %cst_133 = arith.constant 0.000000e+00 : f32
      %153 = vector.broadcast %cst_133 : f32 to vector<1x1x8xf32>
      %c0_134 = arith.constant 0 : index
      %c0_135 = arith.constant 0 : index
      %c0_136 = arith.constant 0 : index
      %154 = vector.load %arg7[%c0_134, %c0_135, %c0_136] : memref<1x1x8xf32, #tpu.memory_space<vmem>>, vector<1x1x8xf32>
      tpu.vector_store %arg7[%c0_134, %c0_135, %c0_136], %153 {strides = array<i32>} : memref<1x1x8xf32, #tpu.memory_space<vmem>>, vector<1x1x8xf32>,
      %cst_137 = arith.constant 0.000000e+00 : f32
      %155 = vector.broadcast %cst_137 : f32 to vector<1x1x8xf32>
      %c0_138 = arith.constant 0 : index
      %c0_139 = arith.constant 0 : index
      %c0_140 = arith.constant 0 : index
      %156 = vector.load %arg8[%c0_138, %c0_139, %c0_140] : memref<1x1x8xf32, #tpu.memory_space<vmem>>, vector<1x1x8xf32>
      tpu.vector_store %arg8[%c0_138, %c0_139, %c0_140], %155 {strides = array<i32>} : memref<1x1x8xf32, #tpu.memory_space<vmem>>, vector<1x1x8xf32>,
    } else {
    }
    %c0_i32_1 = arith.constant 0 : i32
    %3 = arith.addi %arg1, %c0_i32_1 : i32
    %c1_i32 = arith.constant 1 : i32
    %4 = arith.subi %3, %c1_i32 : i32
    %c0_i32_2 = arith.constant 0 : i32
    %c3_i32 = arith.constant 3 : i32
    %5 = arith.maxsi %c0_i32_2, %4 : i32
    %6 = arith.minsi %c3_i32, %5 : i32
    %c0_i32_3 = arith.constant 0 : i32
    %7 = arith.cmpi sge, %4, %c0_i32_3 : i32
    %c4_i32 = arith.constant 4 : i32
    %8 = arith.cmpi slt, %4, %c4_i32 : i32
    %9 = arith.andi %7, %8 : i1
    %10 = arith.extui %9 : i1 to i32
    %11 = arith.sitofp %10 : i32 to f32
    %c0 = arith.constant 0 : index
    %12 = arith.index_cast %6 : i32 to index
    %c0_4 = arith.constant 0 : index
    %c0_5 = arith.constant 0 : index
    %c0_6 = arith.constant 0 : index
    %13 = vector.load %arg4[%c0, %12, %c0_4, %c0_5, %c0_6] : memref<1x4x8x8x8xbf16, #tpu.memory_space<vmem>>, vector<1x1x8x8x8xbf16>
    %14 = vector.shape_cast %13 : vector<1x1x8x8x8xbf16> to vector<1x8x8x8xbf16>
    %15 = vector.shape_cast %14 : vector<1x8x8x8xbf16> to vector<8x8x8xbf16>
    %16 = arith.extf %15 : vector<8x8x8xbf16> to vector<8x8x8xf32>
    %c0_7 = arith.constant 0 : index
    %c0_8 = arith.constant 0 : index
    %c0_9 = arith.constant 0 : index
    %17 = vector.load %arg2[%c0_7, %c0_8, %c0_9] : memref<1x1x8xf32, #tpu.memory_space<vmem>>, vector<1x1x8xf32>
    %18 = vector.broadcast %17 : vector<1x1x8xf32> to vector<8x8x8xf32>
    %19 = arith.mulf %16, %18 : vector<8x8x8xf32>
    %c0_10 = arith.constant 0 : index
    %c0_11 = arith.constant 0 : index
    %c0_12 = arith.constant 0 : index
    %20 = vector.load %arg3[%c0_10, %c0_11, %c0_12] : memref<1x1x8xf32, #tpu.memory_space<vmem>>, vector<1x1x8xf32>
    %21 = vector.broadcast %20 : vector<1x1x8xf32> to vector<8x8x8xf32>
    %22 = arith.addf %19, %21 : vector<8x8x8xf32>
    %cst = arith.constant 0.000000e+00 : f32
    %23 = vector.broadcast %cst : f32 to vector<8x8x8xf32>
    %24 = arith.maximumf %22, %23 : vector<8x8x8xf32>
    %25 = vector.broadcast %11 : f32 to vector<8x8x8xf32>
    %26 = arith.mulf %24, %25 : vector<8x8x8xf32>
    %27 = arith.truncf %26 : vector<8x8x8xf32> to vector<8x8x8xbf16>
    %c1 = arith.constant 1 : index
    %c1_13 = arith.constant 1 : index
    %c0_14 = arith.constant 0 : index
    %28 = vector.load %arg9[%c1, %c1_13, %c0_14] : memref<10x10x24xbf16, #tpu.memory_space<vmem>>, vector<8x8x8xbf16>
    tpu.vector_store %arg9[%c1, %c1_13, %c0_14], %27 {strides = array<i32>} : memref<10x10x24xbf16, #tpu.memory_space<vmem>>, vector<8x8x8xbf16>,
    %c1_i32_15 = arith.constant 1 : i32
    %29 = arith.addi %arg1, %c1_i32_15 : i32
    %c1_i32_16 = arith.constant 1 : i32
    %30 = arith.subi %29, %c1_i32_16 : i32
    %c0_i32_17 = arith.constant 0 : i32
    %c3_i32_18 = arith.constant 3 : i32
    %31 = arith.maxsi %c0_i32_17, %30 : i32
    %32 = arith.minsi %c3_i32_18, %31 : i32
    %c0_i32_19 = arith.constant 0 : i32
    %33 = arith.cmpi sge, %30, %c0_i32_19 : i32
    %c4_i32_20 = arith.constant 4 : i32
    %34 = arith.cmpi slt, %30, %c4_i32_20 : i32
    %35 = arith.andi %33, %34 : i1
    %36 = arith.extui %35 : i1 to i32
    %37 = arith.sitofp %36 : i32 to f32
    %c0_21 = arith.constant 0 : index
    %38 = arith.index_cast %32 : i32 to index
    %c0_22 = arith.constant 0 : index
    %c0_23 = arith.constant 0 : index
    %c0_24 = arith.constant 0 : index
    %39 = vector.load %arg4[%c0_21, %38, %c0_22, %c0_23, %c0_24] : memref<1x4x8x8x8xbf16, #tpu.memory_space<vmem>>, vector<1x1x8x8x8xbf16>
    %40 = vector.shape_cast %39 : vector<1x1x8x8x8xbf16> to vector<1x8x8x8xbf16>
    %41 = vector.shape_cast %40 : vector<1x8x8x8xbf16> to vector<8x8x8xbf16>
    %42 = arith.extf %41 : vector<8x8x8xbf16> to vector<8x8x8xf32>
    %c0_25 = arith.constant 0 : index
    %c0_26 = arith.constant 0 : index
    %c0_27 = arith.constant 0 : index
    %43 = vector.load %arg2[%c0_25, %c0_26, %c0_27] : memref<1x1x8xf32, #tpu.memory_space<vmem>>, vector<1x1x8xf32>
    %44 = vector.broadcast %43 : vector<1x1x8xf32> to vector<8x8x8xf32>
    %45 = arith.mulf %42, %44 : vector<8x8x8xf32>
    %c0_28 = arith.constant 0 : index
    %c0_29 = arith.constant 0 : index
    %c0_30 = arith.constant 0 : index
    %46 = vector.load %arg3[%c0_28, %c0_29, %c0_30] : memref<1x1x8xf32, #tpu.memory_space<vmem>>, vector<1x1x8xf32>
    %47 = vector.broadcast %46 : vector<1x1x8xf32> to vector<8x8x8xf32>
    %48 = arith.addf %45, %47 : vector<8x8x8xf32>
    %cst_31 = arith.constant 0.000000e+00 : f32
    %49 = vector.broadcast %cst_31 : f32 to vector<8x8x8xf32>
    %50 = arith.maximumf %48, %49 : vector<8x8x8xf32>
    %51 = vector.broadcast %37 : f32 to vector<8x8x8xf32>
    %52 = arith.mulf %50, %51 : vector<8x8x8xf32>
    %53 = arith.truncf %52 : vector<8x8x8xf32> to vector<8x8x8xbf16>
    %c1_32 = arith.constant 1 : index
    %c1_33 = arith.constant 1 : index
    %c8 = arith.constant 8 : index
    %54 = vector.load %arg9[%c1_32, %c1_33, %c8] : memref<10x10x24xbf16, #tpu.memory_space<vmem>>, vector<8x8x8xbf16>
    tpu.vector_store %arg9[%c1_32, %c1_33, %c8], %53 {strides = array<i32>} : memref<10x10x24xbf16, #tpu.memory_space<vmem>>, vector<8x8x8xbf16>,
    %c2_i32 = arith.constant 2 : i32
    %55 = arith.addi %arg1, %c2_i32 : i32
    %c1_i32_34 = arith.constant 1 : i32
    %56 = arith.subi %55, %c1_i32_34 : i32
    %c0_i32_35 = arith.constant 0 : i32
    %c3_i32_36 = arith.constant 3 : i32
    %57 = arith.maxsi %c0_i32_35, %56 : i32
    %58 = arith.minsi %c3_i32_36, %57 : i32
    %c0_i32_37 = arith.constant 0 : i32
    %59 = arith.cmpi sge, %56, %c0_i32_37 : i32
    %c4_i32_38 = arith.constant 4 : i32
    %60 = arith.cmpi slt, %56, %c4_i32_38 : i32
    %61 = arith.andi %59, %60 : i1
    %62 = arith.extui %61 : i1 to i32
    %63 = arith.sitofp %62 : i32 to f32
    %c0_39 = arith.constant 0 : index
    %64 = arith.index_cast %58 : i32 to index
    %c0_40 = arith.constant 0 : index
    %c0_41 = arith.constant 0 : index
    %c0_42 = arith.constant 0 : index
    %65 = vector.load %arg4[%c0_39, %64, %c0_40, %c0_41, %c0_42] : memref<1x4x8x8x8xbf16, #tpu.memory_space<vmem>>, vector<1x1x8x8x8xbf16>
    %66 = vector.shape_cast %65 : vector<1x1x8x8x8xbf16> to vector<1x8x8x8xbf16>
    %67 = vector.shape_cast %66 : vector<1x8x8x8xbf16> to vector<8x8x8xbf16>
    %68 = arith.extf %67 : vector<8x8x8xbf16> to vector<8x8x8xf32>
    %c0_43 = arith.constant 0 : index
    %c0_44 = arith.constant 0 : index
    %c0_45 = arith.constant 0 : index
    %69 = vector.load %arg2[%c0_43, %c0_44, %c0_45] : memref<1x1x8xf32, #tpu.memory_space<vmem>>, vector<1x1x8xf32>
    %70 = vector.broadcast %69 : vector<1x1x8xf32> to vector<8x8x8xf32>
    %71 = arith.mulf %68, %70 : vector<8x8x8xf32>
    %c0_46 = arith.constant 0 : index
    %c0_47 = arith.constant 0 : index
    %c0_48 = arith.constant 0 : index
    %72 = vector.load %arg3[%c0_46, %c0_47, %c0_48] : memref<1x1x8xf32, #tpu.memory_space<vmem>>, vector<1x1x8xf32>
    %73 = vector.broadcast %72 : vector<1x1x8xf32> to vector<8x8x8xf32>
    %74 = arith.addf %71, %73 : vector<8x8x8xf32>
    %cst_49 = arith.constant 0.000000e+00 : f32
    %75 = vector.broadcast %cst_49 : f32 to vector<8x8x8xf32>
    %76 = arith.maximumf %74, %75 : vector<8x8x8xf32>
    %77 = vector.broadcast %63 : f32 to vector<8x8x8xf32>
    %78 = arith.mulf %76, %77 : vector<8x8x8xf32>
    %79 = arith.truncf %78 : vector<8x8x8xf32> to vector<8x8x8xbf16>
    %c1_50 = arith.constant 1 : index
    %c1_51 = arith.constant 1 : index
    %c16 = arith.constant 16 : index
    %80 = vector.load %arg9[%c1_50, %c1_51, %c16] : memref<10x10x24xbf16, #tpu.memory_space<vmem>>, vector<8x8x8xbf16>
    tpu.vector_store %arg9[%c1_50, %c1_51, %c16], %79 {strides = array<i32>} : memref<10x10x24xbf16, #tpu.memory_space<vmem>>, vector<8x8x8xbf16>,
    %cst_52 = arith.constant 0.000000e+00 : f32
    %81 = vector.broadcast %cst_52 : f32 to vector<64x8xf32>
    %c0_53 = arith.constant 0 : index
    %c0_54 = arith.constant 0 : index
    %c0_55 = arith.constant 0 : index
    %82 = vector.load %arg9[%c0_53, %c0_54, %c0_55] : memref<10x10x24xbf16, #tpu.memory_space<vmem>>, vector<8x8x24xbf16>
    %83 = vector.shape_cast %82 : vector<8x8x24xbf16> to vector<64x24xbf16>
    %c0_56 = arith.constant 0 : index
    %c0_57 = arith.constant 0 : index
    %c0_58 = arith.constant 0 : index
    %84 = vector.load %arg5[%c0_56, %c0_57, %c0_58] : memref<9x24x8xbf16, #tpu.memory_space<vmem>>, vector<1x24x8xbf16>
    %85 = vector.shape_cast %84 : vector<1x24x8xbf16> to vector<24x8xbf16>
    %cst_59 = arith.constant dense<0.000000e+00> : vector<64x8xf32>
    %86 = tpu.matmul %83, %85, %cst_59 {dimension_numbers = #tpu.dot_dimension_numbers<[1], [0], [0], [1], [0, 0, 1, 1], [], []>} : vector<64x24xbf16>, vector<24x8xbf16>, vector<64x8xf32> -> vector<64x8xf32>
    %87 = arith.addf %81, %86 : vector<64x8xf32>
    %c0_60 = arith.constant 0 : index
    %c1_61 = arith.constant 1 : index
    %c0_62 = arith.constant 0 : index
    %88 = vector.load %arg9[%c0_60, %c1_61, %c0_62] : memref<10x10x24xbf16, #tpu.memory_space<vmem>>, vector<8x8x24xbf16>
    %89 = vector.shape_cast %88 : vector<8x8x24xbf16> to vector<64x24xbf16>
    %c1_63 = arith.constant 1 : index
    %c0_64 = arith.constant 0 : index
    %c0_65 = arith.constant 0 : index
    %90 = vector.load %arg5[%c1_63, %c0_64, %c0_65] : memref<9x24x8xbf16, #tpu.memory_space<vmem>>, vector<1x24x8xbf16>
    %91 = vector.shape_cast %90 : vector<1x24x8xbf16> to vector<24x8xbf16>
    %cst_66 = arith.constant dense<0.000000e+00> : vector<64x8xf32>
    %92 = tpu.matmul %89, %91, %cst_66 {dimension_numbers = #tpu.dot_dimension_numbers<[1], [0], [0], [1], [0, 0, 1, 1], [], []>} : vector<64x24xbf16>, vector<24x8xbf16>, vector<64x8xf32> -> vector<64x8xf32>
    %93 = arith.addf %87, %92 : vector<64x8xf32>
    %c0_67 = arith.constant 0 : index
    %c2 = arith.constant 2 : index
    %c0_68 = arith.constant 0 : index
    %94 = vector.load %arg9[%c0_67, %c2, %c0_68] : memref<10x10x24xbf16, #tpu.memory_space<vmem>>, vector<8x8x24xbf16>
    %95 = vector.shape_cast %94 : vector<8x8x24xbf16> to vector<64x24xbf16>
    %c2_69 = arith.constant 2 : index
    %c0_70 = arith.constant 0 : index
    %c0_71 = arith.constant 0 : index
    %96 = vector.load %arg5[%c2_69, %c0_70, %c0_71] : memref<9x24x8xbf16, #tpu.memory_space<vmem>>, vector<1x24x8xbf16>
    %97 = vector.shape_cast %96 : vector<1x24x8xbf16> to vector<24x8xbf16>
    %cst_72 = arith.constant dense<0.000000e+00> : vector<64x8xf32>
    %98 = tpu.matmul %95, %97, %cst_72 {dimension_numbers = #tpu.dot_dimension_numbers<[1], [0], [0], [1], [0, 0, 1, 1], [], []>} : vector<64x24xbf16>, vector<24x8xbf16>, vector<64x8xf32> -> vector<64x8xf32>
    %99 = arith.addf %93, %98 : vector<64x8xf32>
    %c1_73 = arith.constant 1 : index
    %c0_74 = arith.constant 0 : index
    %c0_75 = arith.constant 0 : index
    %100 = vector.load %arg9[%c1_73, %c0_74, %c0_75] : memref<10x10x24xbf16, #tpu.memory_space<vmem>>, vector<8x8x24xbf16>
    %101 = vector.shape_cast %100 : vector<8x8x24xbf16> to vector<64x24xbf16>
    %c3 = arith.constant 3 : index
    %c0_76 = arith.constant 0 : index
    %c0_77 = arith.constant 0 : index
    %102 = vector.load %arg5[%c3, %c0_76, %c0_77] : memref<9x24x8xbf16, #tpu.memory_space<vmem>>, vector<1x24x8xbf16>
    %103 = vector.shape_cast %102 : vector<1x24x8xbf16> to vector<24x8xbf16>
    %cst_78 = arith.constant dense<0.000000e+00> : vector<64x8xf32>
    %104 = tpu.matmul %101, %103, %cst_78 {dimension_numbers = #tpu.dot_dimension_numbers<[1], [0], [0], [1], [0, 0, 1, 1], [], []>} : vector<64x24xbf16>, vector<24x8xbf16>, vector<64x8xf32> -> vector<64x8xf32>
    %105 = arith.addf %99, %104 : vector<64x8xf32>
    %c1_79 = arith.constant 1 : index
    %c1_80 = arith.constant 1 : index
    %c0_81 = arith.constant 0 : index
    %106 = vector.load %arg9[%c1_79, %c1_80, %c0_81] : memref<10x10x24xbf16, #tpu.memory_space<vmem>>, vector<8x8x24xbf16>
    %107 = vector.shape_cast %106 : vector<8x8x24xbf16> to vector<64x24xbf16>
    %c4 = arith.constant 4 : index
    %c0_82 = arith.constant 0 : index
    %c0_83 = arith.constant 0 : index
    %108 = vector.load %arg5[%c4, %c0_82, %c0_83] : memref<9x24x8xbf16, #tpu.memory_space<vmem>>, vector<1x24x8xbf16>
    %109 = vector.shape_cast %108 : vector<1x24x8xbf16> to vector<24x8xbf16>
    %cst_84 = arith.constant dense<0.000000e+00> : vector<64x8xf32>
    %110 = tpu.matmul %107, %109, %cst_84 {dimension_numbers = #tpu.dot_dimension_numbers<[1], [0], [0], [1], [0, 0, 1, 1], [], []>} : vector<64x24xbf16>, vector<24x8xbf16>, vector<64x8xf32> -> vector<64x8xf32>
    %111 = arith.addf %105, %110 : vector<64x8xf32>
    %c1_85 = arith.constant 1 : index
    %c2_86 = arith.constant 2 : index
    %c0_87 = arith.constant 0 : index
    %112 = vector.load %arg9[%c1_85, %c2_86, %c0_87] : memref<10x10x24xbf16, #tpu.memory_space<vmem>>, vector<8x8x24xbf16>
    %113 = vector.shape_cast %112 : vector<8x8x24xbf16> to vector<64x24xbf16>
    %c5 = arith.constant 5 : index
    %c0_88 = arith.constant 0 : index
    %c0_89 = arith.constant 0 : index
    %114 = vector.load %arg5[%c5, %c0_88, %c0_89] : memref<9x24x8xbf16, #tpu.memory_space<vmem>>, vector<1x24x8xbf16>
    %115 = vector.shape_cast %114 : vector<1x24x8xbf16> to vector<24x8xbf16>
    %cst_90 = arith.constant dense<0.000000e+00> : vector<64x8xf32>
    %116 = tpu.matmul %113, %115, %cst_90 {dimension_numbers = #tpu.dot_dimension_numbers<[1], [0], [0], [1], [0, 0, 1, 1], [], []>} : vector<64x24xbf16>, vector<24x8xbf16>, vector<64x8xf32> -> vector<64x8xf32>
    %117 = arith.addf %111, %116 : vector<64x8xf32>
    %c2_91 = arith.constant 2 : index
    %c0_92 = arith.constant 0 : index
    %c0_93 = arith.constant 0 : index
    %118 = vector.load %arg9[%c2_91, %c0_92, %c0_93] : memref<10x10x24xbf16, #tpu.memory_space<vmem>>, vector<8x8x24xbf16>
    %119 = vector.shape_cast %118 : vector<8x8x24xbf16> to vector<64x24xbf16>
    %c6 = arith.constant 6 : index
    %c0_94 = arith.constant 0 : index
    %c0_95 = arith.constant 0 : index
    %120 = vector.load %arg5[%c6, %c0_94, %c0_95] : memref<9x24x8xbf16, #tpu.memory_space<vmem>>, vector<1x24x8xbf16>
    %121 = vector.shape_cast %120 : vector<1x24x8xbf16> to vector<24x8xbf16>
    %cst_96 = arith.constant dense<0.000000e+00> : vector<64x8xf32>
    %122 = tpu.matmul %119, %121, %cst_96 {dimension_numbers = #tpu.dot_dimension_numbers<[1], [0], [0], [1], [0, 0, 1, 1], [], []>} : vector<64x24xbf16>, vector<24x8xbf16>, vector<64x8xf32> -> vector<64x8xf32>
    %123 = arith.addf %117, %122 : vector<64x8xf32>
    %c2_97 = arith.constant 2 : index
    %c1_98 = arith.constant 1 : index
    %c0_99 = arith.constant 0 : index
    %124 = vector.load %arg9[%c2_97, %c1_98, %c0_99] : memref<10x10x24xbf16, #tpu.memory_space<vmem>>, vector<8x8x24xbf16>
    %125 = vector.shape_cast %124 : vector<8x8x24xbf16> to vector<64x24xbf16>
    %c7 = arith.constant 7 : index
    %c0_100 = arith.constant 0 : index
    %c0_101 = arith.constant 0 : index
    %126 = vector.load %arg5[%c7, %c0_100, %c0_101] : memref<9x24x8xbf16, #tpu.memory_space<vmem>>, vector<1x24x8xbf16>
    %127 = vector.shape_cast %126 : vector<1x24x8xbf16> to vector<24x8xbf16>
    %cst_102 = arith.constant dense<0.000000e+00> : vector<64x8xf32>
    %128 = tpu.matmul %125, %127, %cst_102 {dimension_numbers = #tpu.dot_dimension_numbers<[1], [0], [0], [1], [0, 0, 1, 1], [], []>} : vector<64x24xbf16>, vector<24x8xbf16>, vector<64x8xf32> -> vector<64x8xf32>
    %129 = arith.addf %123, %128 : vector<64x8xf32>
    %c2_103 = arith.constant 2 : index
    %c2_104 = arith.constant 2 : index
    %c0_105 = arith.constant 0 : index
    %130 = vector.load %arg9[%c2_103, %c2_104, %c0_105] : memref<10x10x24xbf16, #tpu.memory_space<vmem>>, vector<8x8x24xbf16>
    %131 = vector.shape_cast %130 : vector<8x8x24xbf16> to vector<64x24xbf16>
    %c8_106 = arith.constant 8 : index
    %c0_107 = arith.constant 0 : index
    %c0_108 = arith.constant 0 : index
    %132 = vector.load %arg5[%c8_106, %c0_107, %c0_108] : memref<9x24x8xbf16, #tpu.memory_space<vmem>>, vector<1x24x8xbf16>
    %133 = vector.shape_cast %132 : vector<1x24x8xbf16> to vector<24x8xbf16>
    %cst_109 = arith.constant dense<0.000000e+00> : vector<64x8xf32>
    %134 = tpu.matmul %131, %133, %cst_109 {dimension_numbers = #tpu.dot_dimension_numbers<[1], [0], [0], [1], [0, 0, 1, 1], [], []>} : vector<64x24xbf16>, vector<24x8xbf16>, vector<64x8xf32> -> vector<64x8xf32>
    %135 = arith.addf %129, %134 : vector<64x8xf32>
    %136 = vector.shape_cast %135 : vector<64x8xf32> to vector<8x8x8xf32>
    %c0_110 = arith.constant 0 : index
    %c0_111 = arith.constant 0 : index
    %c0_112 = arith.constant 0 : index
    %c0_113 = arith.constant 0 : index
    %c0_114 = arith.constant 0 : index
    %137 = vector.load %arg6[%c0_110, %c0_111, %c0_112, %c0_113, %c0_114] : memref<1x1x8x8x8xf32, #tpu.memory_space<vmem>>, vector<1x1x8x8x8xf32>
    %138 = vector.shape_cast %137 : vector<1x1x8x8x8xf32> to vector<8x8x8xf32>
    %139 = vector.shape_cast %136 : vector<8x8x8xf32> to vector<1x1x8x8x8xf32>
    tpu.vector_store %arg6[%c0_110, %c0_111, %c0_112, %c0_113, %c0_114], %139 {strides = array<i32>} : memref<1x1x8x8x8xf32, #tpu.memory_space<vmem>>, vector<1x1x8x8x8xf32>,
    %c0_115 = arith.constant 0 : index
    %c0_116 = arith.constant 0 : index
    %c0_117 = arith.constant 0 : index
    %140 = vector.load %arg7[%c0_115, %c0_116, %c0_117] : memref<1x1x8xf32, #tpu.memory_space<vmem>>, vector<1x1x8xf32>
    %cst_118 = arith.constant dense<0.000000e+00> : vector<8xf32>
    %141 = vector.multi_reduction <add>, %135, %cst_118 [0] : vector<64x8xf32> to vector<8xf32>
    %142 = vector.shape_cast %141 : vector<8xf32> to vector<1x1x8xf32>
    %143 = arith.addf %140, %142 : vector<1x1x8xf32>
    %c0_119 = arith.constant 0 : index
    %c0_120 = arith.constant 0 : index
    %c0_121 = arith.constant 0 : index
    %144 = vector.load %arg7[%c0_119, %c0_120, %c0_121] : memref<1x1x8xf32, #tpu.memory_space<vmem>>, vector<1x1x8xf32>
    tpu.vector_store %arg7[%c0_119, %c0_120, %c0_121], %143 {strides = array<i32>} : memref<1x1x8xf32, #tpu.memory_space<vmem>>, vector<1x1x8xf32>,
    %c0_122 = arith.constant 0 : index
    %c0_123 = arith.constant 0 : index
    %c0_124 = arith.constant 0 : index
    %145 = vector.load %arg8[%c0_122, %c0_123, %c0_124] : memref<1x1x8xf32, #tpu.memory_space<vmem>>, vector<1x1x8xf32>
    %146 = arith.mulf %135, %135 : vector<64x8xf32>
    %cst_125 = arith.constant dense<0.000000e+00> : vector<8xf32>
    %147 = vector.multi_reduction <add>, %146, %cst_125 [0] : vector<64x8xf32> to vector<8xf32>
    %148 = vector.shape_cast %147 : vector<8xf32> to vector<1x1x8xf32>
    %149 = arith.addf %145, %148 : vector<1x1x8xf32>
    %c0_126 = arith.constant 0 : index
    %c0_127 = arith.constant 0 : index
    %c0_128 = arith.constant 0 : index
    %150 = vector.load %arg8[%c0_126, %c0_127, %c0_128] : memref<1x1x8xf32, #tpu.memory_space<vmem>>, vector<1x1x8xf32>
    tpu.vector_store %arg8[%c0_126, %c0_127, %c0_128], %149 {strides = array<i32>} : memref<1x1x8xf32, #tpu.memory_space<vmem>>, vector<1x1x8xf32>,
    return
  }
  func.func @transform_0(%arg0: i32, %arg1: i32) -> (i32, i32, i32) {
    %c0_i32 = arith.constant 0 : i32
    %c0_i32_0 = arith.constant 0 : i32
    %c0_i32_1 = arith.constant 0 : i32
    %c0_i32_2 = arith.constant 0 : i32
    return %c0_i32, %c0_i32_0, %c0_i32_1 : i32, i32, i32
  }
  func.func @transform_1(%arg0: i32, %arg1: i32) -> (i32, i32, i32) {
    %c0_i32 = arith.constant 0 : i32
    %c0_i32_0 = arith.constant 0 : i32
    %c0_i32_1 = arith.constant 0 : i32
    %c0_i32_2 = arith.constant 0 : i32
    return %c0_i32, %c0_i32_0, %c0_i32_1 : i32, i32, i32
  }
  func.func @transform_2(%arg0: i32, %arg1: i32) -> (i32, i32, i32, i32, i32) {
    %c0_i32 = arith.constant 0 : i32
    %c0_i32_0 = arith.constant 0 : i32
    %c0_i32_1 = arith.constant 0 : i32
    %c0_i32_2 = arith.constant 0 : i32
    %c0_i32_3 = arith.constant 0 : i32
    return %arg0, %c0_i32, %c0_i32_0, %c0_i32_1, %c0_i32_2 : i32, i32, i32, i32, i32
  }
  func.func @transform_3(%arg0: i32, %arg1: i32) -> (i32, i32, i32) {
    %c0_i32 = arith.constant 0 : i32
    %c0_i32_0 = arith.constant 0 : i32
    %c0_i32_1 = arith.constant 0 : i32
    %c0_i32_2 = arith.constant 0 : i32
    return %c0_i32, %c0_i32_0, %c0_i32_1 : i32, i32, i32
  }
  func.func @transform_4(%arg0: i32, %arg1: i32) -> (i32, i32, i32, i32, i32) {
    %c0_i32 = arith.constant 0 : i32
    %c0_i32_0 = arith.constant 0 : i32
    %c0_i32_1 = arith.constant 0 : i32
    %c0_i32_2 = arith.constant 0 : i32
    return %arg0, %arg1, %c0_i32, %c0_i32_0, %c0_i32_1 : i32, i32, i32, i32, i32
  }
  func.func @transform_5(%arg0: i32, %arg1: i32) -> (i32, i32, i32) {
    %c0_i32 = arith.constant 0 : i32
    %c0_i32_0 = arith.constant 0 : i32
    %c0_i32_1 = arith.constant 0 : i32
    return %arg0, %c0_i32, %c0_i32_0 : i32, i32, i32
  }
  func.func @transform_6(%arg0: i32, %arg1: i32) -> (i32, i32, i32) {
    %c0_i32 = arith.constant 0 : i32
    %c0_i32_0 = arith.constant 0 : i32
    %c0_i32_1 = arith.constant 0 : i32
    return %arg0, %c0_i32, %c0_i32_0 : i32, i32, i32
  }
}

module attributes {stable_mosaic.version = 11 : i64} {
  func.func @_bn_relu_kernel(%arg0: i32, %arg1: memref<64x64xf32, #tpu.memory_space<vmem>>, %arg2: memref<1x64xf32, #tpu.memory_space<vmem>>, %arg3: memref<1x64xf32, #tpu.memory_space<vmem>>, %arg4: memref<64x64xf32, #tpu.memory_space<vmem>>) attributes {dimension_semantics = [#tpu.dimension_semantics<parallel>], iteration_bounds = array<i64: 1>, scalar_prefetch = 0 : i64, scratch_operands = 0 : i64, tpu.core_type = #tpu.core_type<tc>, window_params = [{transform_indices = @transform_0, window_bounds = array<i64: 64, 64>}, {pipeline_mode = #tpu.pipeline_mode<synchronous>, transform_indices = @transform_1, window_bounds = array<i64: 1, 64>}, {pipeline_mode = #tpu.pipeline_mode<synchronous>, transform_indices = @transform_2, window_bounds = array<i64: 1, 64>}, {transform_indices = @transform_3, window_bounds = array<i64: 64, 64>}]} {
    %c0 = arith.constant 0 : index
    %c0_0 = arith.constant 0 : index
    %0 = vector.load %arg1[%c0, %c0_0] : memref<64x64xf32, #tpu.memory_space<vmem>>, vector<64x64xf32>
    %c0_1 = arith.constant 0 : index
    %c0_2 = arith.constant 0 : index
    %1 = vector.load %arg2[%c0_1, %c0_2] : memref<1x64xf32, #tpu.memory_space<vmem>>, vector<1x64xf32>
    %2 = vector.broadcast %1 : vector<1x64xf32> to vector<64x64xf32>
    %3 = arith.mulf %0, %2 : vector<64x64xf32>
    %c0_3 = arith.constant 0 : index
    %c0_4 = arith.constant 0 : index
    %4 = vector.load %arg3[%c0_3, %c0_4] : memref<1x64xf32, #tpu.memory_space<vmem>>, vector<1x64xf32>
    %5 = vector.broadcast %4 : vector<1x64xf32> to vector<64x64xf32>
    %6 = arith.addf %3, %5 : vector<64x64xf32>
    %cst = arith.constant 0.000000e+00 : f32
    %7 = vector.broadcast %cst : f32 to vector<64x64xf32>
    %8 = arith.maximumf %6, %7 : vector<64x64xf32>
    %c0_5 = arith.constant 0 : index
    %c0_6 = arith.constant 0 : index
    %9 = vector.load %arg4[%c0_5, %c0_6] : memref<64x64xf32, #tpu.memory_space<vmem>>, vector<64x64xf32>
    tpu.vector_store %arg4[%c0_5, %c0_6], %8 {strides = array<i32>} : memref<64x64xf32, #tpu.memory_space<vmem>>, vector<64x64xf32>,
    return
  }
  func.func @transform_0(%arg0: i32) -> (i32, i32) {
    %c0_i32 = arith.constant 0 : i32
    %c0_i32_0 = arith.constant 0 : i32
    return %arg0, %c0_i32 : i32, i32
  }
  func.func @transform_1(%arg0: i32) -> (i32, i32) {
    %c0_i32 = arith.constant 0 : i32
    %c0_i32_0 = arith.constant 0 : i32
    %c0_i32_1 = arith.constant 0 : i32
    return %c0_i32, %c0_i32_0 : i32, i32
  }
  func.func @transform_2(%arg0: i32) -> (i32, i32) {
    %c0_i32 = arith.constant 0 : i32
    %c0_i32_0 = arith.constant 0 : i32
    %c0_i32_1 = arith.constant 0 : i32
    return %c0_i32, %c0_i32_0 : i32, i32
  }
  func.func @transform_3(%arg0: i32) -> (i32, i32) {
    %c0_i32 = arith.constant 0 : i32
    %c0_i32_0 = arith.constant 0 : i32
    return %arg0, %c0_i32 : i32, i32
  }
}

</mosaic_0001>

<bundles_post_ra>
// kernel: tile.13
= control target key start
LH: loop header
LB: loop body
LE: loop exit
PB: predicated region body
PF: predicated region fallthrough
CT: control target
= control target key end

     0   :  { %s22_s0 = inlined_call_operand.vmem [shape: f32[8], index: 0, kind: input, shape index: {}]   ;;  %s23_s1 = inlined_call_operand.vmem [shape: f32[8,8], index: 1, kind: output, shape index: {}]  }
   0x1   :  { %v4_v0 = vld [vmem:[%s22_s0] ss:$0 sm:$0xff] }
   0x2   :  { %5 = vst [vmem:[%s23_s1] sm:$0xff] %v4_v0 }

// kernel: tile.14
= control target key start
LH: loop header
LB: loop body
LE: loop exit
PB: predicated region body
PF: predicated region fallthrough
CT: control target
= control target key end

     0   :  { %s67_s10 = smov 56   ;;  %s68_s11 = smov 40   ;;  %vm3_vm0 = vcmask 64512   ;;  %vm9_vm1 = vcmask 523712   ;;  %vm15_vm2 = vcmask 458112   ;;  %vm21_vm3 = vcmask 392512   ;;  %s111_s0 = inlined_call_operand.vmem [shape: f32[8,8], index: 0, kind: input, shape index: {}]   ;;  %s112_s1 = inlined_call_operand.vmem [shape: f32[1,64], index: 1, kind: output, shape index: {}]  }
   0x1   :  { %v53_v0 = vld [vmem:[%s111_s0 + $0x7] sm:$0x1]   ;;  %v55_v1 = vld [vmem:[%s111_s0 + $0x5] sm:$0x1]   ;;  %v54_v2 = vld [vmem:[%s111_s0 + $0x6] sm:$0x1]  }
   0x2   :  { %7 = vrot.lane.b32.xlu0 %v53_v0, %s67_s10  ;;  %19 = vrot.lane.b32.xlu1 %v55_v1, %s68_s11  ;;  %v56_v3 = vld [vmem:[%s111_s0 + $0x4] sm:$0x1]   ;;  %v2_v4 = vld [vmem:[%s111_s0] sm:$0x1]   ;;  %s69_s18 = smov 48   ;;  %s70_s19 = smov 32  }
   0x3   :  { %4 = vst.msk [vmem:[#allocation0] sm:$0x1] %vm3_vm0, %v2_v4   ;;  %v57_v5 = vld [vmem:[%s111_s0 + $0x3] sm:$0x1]   ;;  %v58_v6 = vld [vmem:[%s111_s0 + $0x2] sm:$0x1]  }
   0x4   :  { %s71_s24 = smov 24   ;;  %s72_s25 = smov 16   ;;  %v59_v7 = vld [vmem:[%s111_s0 + $0x1] sm:$0x1]   ;;  %vm27_vm4 = vcmask 326912   ;;  %vm33_vm5 = vcmask 261312  }
   0x5   :  { %s73_s0 = smov 8   ;;  %vm39_vm6 = vcmask 195712   ;;  %vm45_vm7 = vcmask 130112  }
   0x6   :  { %13 = vrot.lane.b32.xlu0 %v54_v2, %s69_s18  ;;  %25 = vrot.lane.b32.xlu1 %v56_v3, %s70_s19 }
   0xa   :  { %31 = vrot.lane.b32.xlu0 %v57_v5, %s71_s24  ;;  %37 = vrot.lane.b32.xlu1 %v58_v6, %s72_s25 }
   0xe   :  { %43 = vrot.lane.b32.xlu0 %v59_v7, %s73_s0 }
  0x74   :  { %v8_v8 = vpop.permute.xlu0 %7   ;;  %v20_v9 = vpop.permute.xlu1 %19  }
  0x75   :  { %10 = vst.msk [vmem:[#allocation0] sm:$0x1] %vm9_vm1, %v8_v8  }
  0x78   :  { %v14_v10 = vpop.permute.xlu0 %13   ;;  %v26_v11 = vpop.permute.xlu1 %25  }
  0x79   :  { %16 = vst.msk [vmem:[#allocation0] sm:$0x1] %vm15_vm2, %v14_v10  }
  0x7a   :  { %22 = vst.msk [vmem:[#allocation0] sm:$0x1] %vm21_vm3, %v20_v9  }
  0x7b   :  { %28 = vst.msk [vmem:[#allocation0] sm:$0x1] %vm27_vm4, %v26_v11  }
  0x7c   :  { %v32_v12 = vpop.permute.xlu0 %31   ;;  %v38_v13 = vpop.permute.xlu1 %37  }
  0x7d   :  { %34 = vst.msk [vmem:[#allocation0] sm:$0x1] %vm33_vm5, %v32_v12  }
  0x7e   :  { %40 = vst.msk [vmem:[#allocation0] sm:$0x1] %vm39_vm6, %v38_v13  }
  0x80   :  { %v44_v14 = vpop.permute.xlu0 %43  }
  0x81   :  { %46 = vst.msk [vmem:[#allocation0] sm:$0x1] %vm45_vm7, %v44_v14  }
  0x88   :  { %v50_v15 = vld [vmem:[#allocation0] sm:$0x1] }
  0x89   :  { %52 = vst [vmem:[%s112_s1] sm:$0x1] %v50_v15 }

// kernel: down_forward.5
= control target key start
LH: loop header
LB: loop body
LE: loop exit
PB: predicated region body
PF: predicated region fallthrough
CT: control target
= control target key end

     0   :  { %vm60_vm0 = vcmask 523264   ;;  %s157_s0 = inlined_call_operand.vmem [shape: f32[64,64], index: 0, kind: input, shape index: {}]   ;;  %s158_s1 = inlined_call_operand.vmem [shape: f32[1,64], index: 1, kind: input, shape index: {}]   ;;  %s159_s2 = inlined_call_operand.vmem [shape: f32[1,64], index: 2, kind: input, shape index: {}]   ;;  %s160_s3 = inlined_call_operand.vmem [shape: f32[64,64], index: 3, kind: output, shape index: {}]  }
   0x1   :  { %v14_v0 = vld [vmem:[%s157_s0] sm:$0xff]  ;;  %v15_v4 = vld [vmem:[%s157_s0 + $0x8] sm:$0xff]  ;;  %v16_v5 = vld [vmem:[%s157_s0 + $0x10] sm:$0xff] }
   0x2   :  { %v73_v1 = vld [vmem:[%s158_s1] ss:$0 sm:$0xff]  ;;  %v17_v6 = vld [vmem:[%s157_s0 + $0x18] sm:$0xff]  ;;  %v19_v11 = vld [vmem:[%s157_s0 + $0x28] sm:$0xff] }
   0x3   :  { %v74_v2 = vld [vmem:[%s159_s2] ss:$0 sm:$0xff]  ;;  %v29_v3 = vmul.f32 %v73_v1, %v14_v0  ;;  %v30_v7 = vmul.f32 %v73_v1, %v15_v4  ;;  %v31_v8 = vmul.f32 %v73_v1, %v16_v5  ;;  %v32_v9 = vmul.f32 %v73_v1, %v17_v6  ;;  %v20_v12 = vld [vmem:[%s157_s0 + $0x30] sm:$0xff]  ;;  %v21_v17 = vld [vmem:[%s157_s0 + $0x38] sm:$0xff] }
   0x4   :  { %v18_v10 = vld [vmem:[%s157_s0 + $0x20] sm:$0xff]  ;;  %v34_v15 = vmul.f32 %v73_v1, %v19_v11  ;;  %v35_v16 = vmul.f32 %v73_v1, %v20_v12  ;;  %v36_v21 = vmul.f32 %v73_v1, %v21_v17 }
   0x5   :  { %v44_v13 = vadd.f32 %v74_v2, %v29_v3  ;;  %v33_v14 = vmul.f32 %v73_v1, %v18_v10  ;;  %v45_v18 = vadd.f32 %v74_v2, %v30_v7  ;;  %v46_v19 = vadd.f32 %v74_v2, %v31_v8 }
   0x6   :  { %v47_v20 = vadd.f32 %v74_v2, %v32_v9  ;;  %v49_v24 = vadd.f32 %v74_v2, %v34_v15  ;;  %v50_v25 = vadd.f32 %v74_v2, %v35_v16  ;;  %v51_v29 = vadd.f32 %v74_v2, %v36_v21 }
   0x7   :  { %v52_v22 = vmax.f32 %v44_v13, 0.0  ;;  %v48_v23 = vadd.f32 %v74_v2, %v33_v14  ;;  %v53_v26 = vmax.f32 %v45_v18, 0.0  ;;  %v54_v27 = vmax.f32 %v46_v19, 0.0 }
   0x8   :  { %v55_v28 = vmax.f32 %v47_v20, 0.0  ;;  %v57_v31 = vmax.f32 %v49_v24, 0.0  ;;  %v58_v32 = vmax.f32 %v50_v25, 0.0  ;;  %v59_v33 = vmax.f32 %v51_v29, 0.0 }
   0x9   :  { %61 = vst.msk [vmem:[%s160_s3] sm:$0xff] %vm60_vm0, %v52_v22  ;;  %v56_v30 = vmax.f32 %v48_v23, 0.0  ;;  %62 = vst.msk [vmem:[%s160_s3 + $0x8] sm:$0xff] %vm60_vm0, %v53_v26 }
   0xa   :  { %63 = vst.msk [vmem:[%s160_s3 + $0x10] sm:$0xff] %vm60_vm0, %v54_v27  ;;  %64 = vst.msk [vmem:[%s160_s3 + $0x18] sm:$0xff] %vm60_vm0, %v55_v28 }
   0xb   :  { %65 = vst.msk [vmem:[%s160_s3 + $0x20] sm:$0xff] %vm60_vm0, %v56_v30  ;;  %66 = vst.msk [vmem:[%s160_s3 + $0x28] sm:$0xff] %vm60_vm0, %v57_v31 }
   0xc   :  { %67 = vst.msk [vmem:[%s160_s3 + $0x30] sm:$0xff] %vm60_vm0, %v58_v32  ;;  %68 = vst.msk [vmem:[%s160_s3 + $0x38] sm:$0xff] %vm60_vm0, %v59_v33 }

// kernel: down_forward.3
= control target key start
LH: loop header
LB: loop body
LE: loop exit
PB: predicated region body
PF: predicated region fallthrough
CT: control target
= control target key end

     0   :  { %s3308_s21 = smov 0   ;;  %s3310_s0 = smov 0   ;;  %s4178_s0 = inlined_call_operand.vmem [shape: f32[1,1,4], index: 0, kind: input, shape index: {}]   ;;  %s4179_s1 = inlined_call_operand.vmem [shape: f32[1,1,4], index: 1, kind: input, shape index: {}]   ;;  %s4180_s2 = inlined_call_operand.vmem [shape: f32[2,4,8,8,4], index: 2, kind: input, shape index: {}]   ;;  %s4181_s3 = inlined_call_operand.vmem [shape: bf16[9,12,8], index: 3, kind: input, shape index: {}]   ;;  %s4182_s4 = inlined_call_operand.vmem [shape: bf16[2,4,8,8,8], index: 4, kind: output, shape index: {0}]   ;;  %s4183_s5 = inlined_call_operand.vmem [shape: f32[2,1,8], index: 5, kind: output, shape index: {1}]   ;;  %s4184_s6 = inlined_call_operand.vmem [shape: f32[2,1,8], index: 6, kind: output, shape index: {2}]  }
   0x1   :  { %s3312_s1 = smov 0   ;;  %s3314_s22 = smov 0  }
   0x2   :  { %s3316_s23 = smov 0  }
   0x3 LB: > { %s26_s24 = sadd.s32 1, %s3259_s1  ;;  %s29_s25 = sadd.s32 1, %s3263_s22  ;;  %s3267_s23 = sphi %s3316_s23, %s17_s23   ;;  %s3263_s22 = sphi %s3314_s22, %s4206_s22   ;;  %s3259_s1 = sphi %s3312_s1, %s4205_s1   ;;  %s3255_s0 = sphi %s3310_s0, %s4204_s0   ;;  %s3251_s21 = sphi %s3308_s21, %s4203_s21  }
   0x4   : > { %p27_p0 = scmp.ge.s32.totalorder %s26_s24, 4  ;;  %p2746_p1 = scmp.ge.s32.totalorder %s3267_s23, 1 }
   0x5   : > { %p231_p2 = scmp.lt.s32.totalorder %s3267_s23, 9 }
   0x6   : > { %s4208_s24 = smov (%p27_p0, %s26_s24), 0  ;;  %s4210_s25 = smov (!%p27_p0, %s29_s25), %s3263_s22 }
   0x7   : > { %p232_p3 = pnand %p2746_p1, %p231_p2  ;;  %p31_p4 = scmp.ge.s32.totalorder %s4210_s25, 2 }
   0x8   : > { %p271_p5 = scmp.lt.s32.totalorder (!%p232_p3), %s3255_s0, 1  ;;  %p278_p6 = scmp.lt.s32.totalorder (!%p232_p3), %s3251_s21, 3 }
   0x9   : > { %s4212_s25 = smov (%p31_p4, %s4210_s25), 0  ;;  %235 = sbr.rel (%p232_p3) target bundleno = 538 (0x21a), region = 36 }
   0xa   : > { %p2752_p7 = scmp.ne.s32.totalorder (!%p232_p3), %s3251_s21, 0 }
  0x10   : > { %s4214_s0 = smov (!%p271_p5, %s3255_s0), 1  ;;  %295 = sbr.rel (%p2752_p7) target bundleno = 30 (0x1e), region = 40 }
  0x11   : > { %s279_s26 = scalar_select %p278_p6, %s3251_s21, 3 }
  0x12   : > { %s2921_s27 = sshll.u32 %s4214_s0, 8  ;;  %s2750_s28 = sshll.u32 %s4214_s0, 5  ;;  %vm296_vm0 = vcmask (!%p2752_p7), 93184   ;;  %vm298_vm1 = vcmask (!%p2752_p7), 90112   ;;  %vm318_vm2 = vcmask (!%p2752_p7), 57344   ;;  %v3269_v0 = vmov (!%p2752_p7), 0  }
  0x13   : > { %s3347_s7 = scalar_lea.vmem %s4180_s2, %s2921_s27  ;;  %s2749_s8 = sshll.u32 %s279_s26, 3  ;;  %297 = vst.msk [vmem:[#allocation2] sm:$0xf] (!%p2752_p7), %vm296_vm0, %v3269_v0  ;;  %300 = vst.msk [vmem:[#allocation2 + $0x8] sm:$0xf] (!%p2752_p7), %vm296_vm0, %v3269_v0  ;;  %v3270_v1 = vmov (!%p2752_p7), 0.0  }
  0x14   : > { %s282_s9 = sadd.s32 %s2750_s28, %s2749_s8  ;;  %s3352_s12 = scalar_lea.vmem %s4183_s5, %s4214_s0  ;;  %302 = vst.msk [vmem:[#allocation2 + $0x10] sm:$0xf] (!%p2752_p7), %vm296_vm0, %v3269_v0  ;;  %304 = vst.msk [vmem:[#allocation2 + $0x18] sm:$0xf] (!%p2752_p7), %vm296_vm0, %v3269_v0 }
  0x15   : > { %s2751_s13 = sshll.u32 %s282_s9, 2  ;;  %s3357_s16 = scalar_lea.vmem %s4184_s6, %s4214_s0  ;;  %306 = vst.msk [vmem:[#allocation2 + $0x20] sm:$0xf] (!%p2752_p7), %vm296_vm0, %v3269_v0  ;;  %308 = vst.msk [vmem:[#allocation2 + $0x28] sm:$0xf] (!%p2752_p7), %vm296_vm0, %v3269_v0 }
  0x16   : > { %s3362_s19 = scalar_lea.vmem %s4182_s4, %s2751_s13  ;;  %310 = vst.msk [vmem:[#allocation2 + $0x30] sm:$0xf] (!%p2752_p7), %vm296_vm0, %v3269_v0  ;;  %312 = vst.msk [vmem:[#allocation2 + $0x38] sm:$0xf] (!%p2752_p7), %vm296_vm0, %v3269_v0 }
  0x17   : > { %314 = vst.msk [vmem:[#allocation2 + $0x40] sm:$0xf] %vm296_vm0, %v3269_v0  ;;  %316 = vst.msk [vmem:[#allocation2 + $0x48] sm:$0xf] %vm296_vm0, %v3269_v0 }
  0x18   : > { %299 = vst.msk [vmem:[#allocation2 + $0x4] sm:$0x1] %vm298_vm1, %v3269_v0  ;;  %301 = vst.msk [vmem:[#allocation2 + $0xc] sm:$0x1] %vm298_vm1, %v3269_v0 }
  0x19   : > { %303 = vst.msk [vmem:[#allocation2 + $0x14] sm:$0x1] %vm298_vm1, %v3269_v0  ;;  %305 = vst.msk [vmem:[#allocation2 + $0x1c] sm:$0x1] %vm298_vm1, %v3269_v0 }
  0x1a   : > { %307 = vst.msk [vmem:[#allocation2 + $0x24] sm:$0x1] %vm298_vm1, %v3269_v0  ;;  %309 = vst.msk [vmem:[#allocation2 + $0x2c] sm:$0x1] %vm298_vm1, %v3269_v0 }
  0x1b   : > { %311 = vst.msk [vmem:[#allocation2 + $0x34] sm:$0x1] %vm298_vm1, %v3269_v0  ;;  %313 = vst.msk [vmem:[#allocation2 + $0x3c] sm:$0x1] %vm298_vm1, %v3269_v0 }
  0x1c   : > { %315 = vst.msk [vmem:[#allocation2 + $0x44] sm:$0x1] %vm298_vm1, %v3269_v0  ;;  %317 = vst.msk [vmem:[#allocation2 + $0x4c] sm:$0x1] %vm298_vm1, %v3269_v0 }
  0x1d   : > { %319 = vst.msk [vmem:[%s3352_s12] sm:$0x1] %vm318_vm2, %v3270_v1  ;;  %320 = vst.msk [vmem:[%s3357_s16] sm:$0x1] %vm318_vm2, %v3270_v1 }
  0x1e PF: > { %p518_p8 = scmp.gt.s32.totalorder %s3251_s21, 0  ;;  %p522_p9 = scmp.ge.s32.totalorder %s3251_s21, 0  ;;  %vm464_vm3 = vcmask 27648   ;;  %vm465_vm4 = vsmask.f32 7938  ;;  %vm470_vm5 = vcmask 24576  }
  0x1f   : > { %p523_p10 = scmp.lt.s32.totalorder %s3251_s21, 4  ;;  %s743_s0 = sadd.s32 1, %s3251_s21  ;;  %vm471_vm6 = vsmask.f32 256  ;;  %vm3515_vm7 = vmand %vm464_vm3, %vm465_vm4  ;;  %vm1135_vm9 = vcmask 1045504   ;;  %vm691_vm10 = vcmask 60448  }
  0x20   : > { %s519_s20 = scalar_select %p518_p8, %s3251_s21, 0  ;;  %vm3521_vm8 = vmand %vm470_vm5, %vm471_vm6  ;;  %vm696_vm12 = vcmask 57376   ;;  %vm917_vm14 = vcmask 93248   ;;  %vm922_vm0 = vcmask 90176   ;;  %vm987_vm1 = vsmask.f32 3328 }
  0x21   : > { %p524_p11 = pnand %p523_p10, %p522_p9  ;;  %p744_p12 = scmp.gt.s32.totalorder %s743_s0, 0  ;;  %vm3643_vm11 = vmand %vm691_vm10, %vm465_vm4  ;;  %vm988_vm2 = vsmask.f32 7440  ;;  %vm1334_vm5 = vcmask 1046532   ;;  %vm2543_vm10 = vcmask 64512  }
  0x22   : > { %s4216_s20 = smov (!%p278_p6, %s519_s20), 3  ;;  %p2783_p13 = scmp.lt.s32.totalorder %s743_s0, 3  ;;  %vm3656_vm13 = vmand %vm696_vm12, %vm471_vm6 }
  0x23   : > { %s2773_s26 = scalar_select %p524_p11, 0, 1  ;;  %vm3673_vm15 = vmand %vm917_vm14, %vm465_vm4  ;;  %vm1333_vm4 = vcmask 1042432  }
  0x24   : > { %s2774_s27 = sshll.u32 %s4216_s20, 6  ;;  %p748_p0 = scmp.ge.s32.totalorder %s743_s0, 0  ;;  %vm3724_vm3 = vmand %vm922_vm0, %vm471_vm6 }
  0x25   : > { %s527_s28 = scvt.s32.f32 %s2773_s26  ;;  %s3387_s29 = scalar_lea.vmem %s3347_s7, %s2774_s27  ;;  %vm3753_vm6 = vmor %vm987_vm1, %vm988_vm2 }
  0x26   : > { %v532_v2 = vld [vmem:[%s3387_s29 + $0x10] sm:$0xff]  ;;  %v530_v3 = vld [vmem:[%s3387_s29] sm:$0xff]  ;;  %v533_v4 = vld [vmem:[%s3387_s29 + $0x18] sm:$0xff]  ;;  %s745_s30 = scalar_select %p744_p12, %s743_s0, 0 }
  0x27   : > { %v3392_v5 = vstv %s527_s28  ;;  %v531_v6 = vld [vmem:[%s3387_s29 + $0x8] sm:$0xff]  ;;  %p749_p1 = scmp.lt.s32.totalorder %s743_s0, 4  ;;  %v534_v16 = vld [vmem:[%s3387_s29 + $0x20] sm:$0xff]  ;;  %s3407_s9 = sadd.s32 4294967295, %s3251_s21  ;;  %v536_v25 = vld [vmem:[%s3387_s29 + $0x30] sm:$0xff] }
  0x28   : > { %v541_v7 = vmul.f32 %v3392_v5, %v532_v2  ;;  %v539_v8 = vmul.f32 %v3392_v5, %v530_v3  ;;  %v542_v9 = vmul.f32 %v3392_v5, %v533_v4  ;;  %v540_v10 = vmul.f32 %v3392_v5, %v531_v6  ;;  %v535_v11 = vld [vmem:[%s3387_s29 + $0x28] sm:$0xff]  ;;  %s4218_s30 = smov (!%p2783_p13, %s745_s30), 3  ;;  %p322_p3 = scmp.gt.s32.totalorder %s3407_s9, 0 }
  0x29   : > { %p3402_p2 = pnand %p749_p1, %p748_p0  ;;  %v544_v17 = vmul.f32 %v3392_v5, %v535_v11  ;;  %s2789_s10 = sshll.u32 %s4218_s30, 6  ;;  %v543_v24 = vmul.f32 %v3392_v5, %v534_v16  ;;  %v545_v36 = vmul.f32 %v3392_v5, %v536_v25 }
  0x2a   : > { %v2936_v12 = vpack.c.bf16 %v541_v7, %v541_v7  ;;  %v2934_v13 = vpack.c.bf16 %v539_v8, %v539_v8  ;;  %v2937_v14 = vpack.c.bf16 %v542_v9, %v542_v9  ;;  %v2935_v15 = vpack.c.bf16 %v540_v10, %v540_v10  ;;  %s3415_s21 = scalar_lea.vmem %s3347_s7, %s2789_s10  ;;  %p2753_p4 = scmp.lt.s32.totalorder %s3407_s9, 3 }
  0x2b   : > { %s2788_s11 = scalar_select %p3402_p2, 0, 1  ;;  %v2939_v34 = vpack.c.bf16 %v544_v17, %v544_v17  ;;  %v756_v35 = vld [vmem:[%s3415_s21] sm:$0xff]  ;;  %v2938_v37 = vpack.c.bf16 %v543_v24, %v543_v24  ;;  %v758_v41 = vld [vmem:[%s3415_s21 + $0x10] sm:$0xff]  ;;  %v757_v43 = vld [vmem:[%s3415_s21 + $0x8] sm:$0xff]  ;;  %v2940_v45 = vpack.c.bf16 %v545_v36, %v545_v36 }
  0x2c   : > { %v596_v18 = vshrl.u32 %v2936_v12, 16  ;;  %v599_v19 = vshll.u32 %v2936_v12, 16  ;;  %v580_v20 = vshrl.u32 %v2934_v13, 16  ;;  %v583_v21 = vshll.u32 %v2934_v13, 16  ;;  %s323_s14 = scalar_select %p322_p3, %s3407_s9, 0  ;;  %v759_v48 = vld [vmem:[%s3415_s21 + $0x18] sm:$0xff] }
  0x2d   : > { %v604_v22 = vshrl.u32 %v2937_v14, 16  ;;  %v588_v23 = vshrl.u32 %v2935_v15, 16  ;;  %v607_v28 = vshll.u32 %v2937_v14, 16  ;;  %v591_v29 = vshll.u32 %v2935_v15, 16  ;;  %s753_s13 = scvt.s32.f32 %s2788_s11  ;;  %p326_p5 = scmp.ge.s32.totalorder %s3407_s9, 0  ;;  %v761_v3 = vld [vmem:[%s3415_s21 + $0x28] sm:$0xff] }
  0x2e   : > { %v3418_v26 = vrot.slane %v596_v18, 7  ;;  %v582_v27 = vrot.slane %v580_v20, 7  ;;  %p327_p6 = scmp.lt.s32.totalorder %s3407_s9, 4  ;;  %s3271_s15 = smov 4   ;;  %v620_v44 = vshrl.u32 %v2939_v34, 16  ;;  %v612_v46 = vshrl.u32 %v2938_v37, 16 }
  0x2f   : > { %v606_v30 = vrot.slane %v604_v22, 7  ;;  %v590_v31 = vrot.slane %v588_v23, 7  ;;  %v3431_v40 = vstv %s753_s13  ;;  %s4220_s14 = smov (!%p2753_p4, %s323_s14), 3  ;;  %v623_v53 = vshll.u32 %v2939_v34, 16  ;;  %v760_v18 = vld [vmem:[%s3415_s21 + $0x20] sm:$0xff] }
  0x30   : > { %v601_v32 = vor.u32 %v599_v19, %v3418_v26  ;;  %v585_v33 = vor.u32 %v583_v21, %v582_v27  ;;  %v765_v42 = vmul.f32 %v3431_v40, %v756_v35  ;;  %p3444_p7 = pnand %p327_p6, %p326_p5  ;;  %v767_v47 = vmul.f32 %v3431_v40, %v758_v41  ;;  %s2759_s18 = sshll.u32 %s4220_s14, 6 }
  0x31   : > { %v609_v38 = vor.u32 %v607_v28, %v606_v30  ;;  %v593_v39 = vor.u32 %v591_v29, %v590_v31  ;;  %v594_v49 = vrot.slane %v590_v31, 4  ;;  %v586_v50 = vrot.slane %v582_v27, 4  ;;  %s3465_s0 = scalar_lea.vmem %s3347_s7, %s2759_s18  ;;  %s3272_s7 = smov 8  }
  0x32   : > { %651 = vrot.lane.b32.xlu1 %v601_v32, %s3271_s15  ;;  %643 = vrot.lane.b32.xlu0 %v585_v33, %s3271_s15  ;;  %v2944_v51 = vpack.c.bf16 %v765_v42, %v765_v42  ;;  %v766_v52 = vmul.f32 %v3431_v40, %v757_v43  ;;  %v628_v54 = vshrl.u32 %v2940_v45, 16  ;;  %v768_v55 = vmul.f32 %v3431_v40, %v759_v48  ;;  %s2758_s20 = scalar_select %p3444_p7, 0, 1  ;;  %v336_v11 = vld [vmem:[%s3465_s0 + $0x10] sm:$0xff]  ;;  %v334_v12 = vld [vmem:[%s3465_s0] sm:$0xff] }
  0x33   : > { %v602_v56 = vrot.slane %v3418_v26, 4  ;;  %v3458_v57 = vrot.slane %v620_v44, 7  ;;  %v615_v58 = vshll.u32 %v2938_v37, 16  ;;  %v2946_v59 = vpack.c.bf16 %v767_v47, %v767_v47  ;;  %v337_v14 = vld [vmem:[%s3465_s0 + $0x18] sm:$0xff]  ;;  %v335_v28 = vld [vmem:[%s3465_s0 + $0x8] sm:$0xff] }
  0x34   : > { %v610_v60 = vrot.slane %v606_v30, 4  ;;  %v3462_v61 = vrot.slane %v612_v46, 7  ;;  %v806_v62 = vshrl.u32 %v2944_v51, 16  ;;  %v2945_v63 = vpack.c.bf16 %v766_v52, %v766_v52  ;;  %s331_s26 = scvt.s32.f32 %s2758_s20  ;;  %v339_v29 = vld [vmem:[%s3465_s0 + $0x28] sm:$0xff]  ;;  %v482_v47 = vld [vmem:[#allocation2 + $0x18] sm:$0xf] }
  0x35   : > { %v3467_v0 = vrot.slane %v628_v54, 7  ;;  %v631_v1 = vshll.u32 %v2940_v45, 16  ;;  %v2947_v2 = vpack.c.bf16 %v768_v55, %v768_v55  ;;  %v625_v4 = vor.u32 %v623_v53, %v3458_v57 }
  0x36   : > { %655 = vrot.lane.b32.xlu1 %v609_v38, %s3271_s15  ;;  %647 = vrot.lane.b32.xlu0 %v593_v39, %s3271_s15  ;;  %v822_v6 = vshrl.u32 %v2946_v59, 16  ;;  %v617_v7 = vor.u32 %v615_v58, %v3462_v61  ;;  %v3474_v8 = vrot.slane %v806_v62, 7  ;;  %v809_v9 = vshll.u32 %v2944_v51, 16  ;;  %v467_v58 = vld [vmem:[#allocation2 + $0x8] sm:$0xf] }
  0x37   : > { %v814_v10 = vshrl.u32 %v2945_v63, 16  ;;  %v770_v13 = vmul.f32 %v3431_v40, %v761_v3  ;;  %v633_v15 = vor.u32 %v631_v1, %v3467_v0  ;;  %v618_v16 = vrot.slane %v3462_v61, 4 }
  0x38   : > { %v830_v17 = vshrl.u32 %v2947_v2, 16  ;;  %v3483_v19 = vstv %s331_s26  ;;  %v3485_v20 = vrot.slane %v822_v6, 7  ;;  %v825_v21 = vshll.u32 %v2946_v59, 16  ;;  %v473_v59 = vld [vmem:[#allocation2 + $0xc] sm:$0x1] }
  0x39   : > { %v345_v22 = vmul.f32 %v3483_v19, %v336_v11  ;;  %v343_v23 = vmul.f32 %v3483_v19, %v334_v12  ;;  %v811_v24 = vor.u32 %v809_v9, %v3474_v8  ;;  %v3492_v25 = vrot.slane %v814_v10, 7  ;;  %v491_v10 = vld [vmem:[#allocation2 + $0x24] sm:$0x1]  ;;  %v762_v12 = vld [vmem:[%s3415_s21 + $0x30] sm:$0xff] }
  0x3a   : > { %649 = vrot.lane.b32.xlu1 %v594_v49, %s3271_s15  ;;  %645 = vrot.lane.b32.xlu0 %v586_v50, %s3271_s15  ;;  %v817_v26 = vshll.u32 %v2945_v63, 16  ;;  %v346_v27 = vmul.f32 %v3483_v19, %v337_v14  ;;  %v634_v30 = vrot.slane %v3467_v0, 4  ;;  %v626_v31 = vrot.slane %v3458_v57, 4 }
  0x3b   : > { %v3499_v32 = vpack.c.bf16 %v770_v13, %v770_v13  ;;  %v769_v33 = vmul.f32 %v3431_v40, %v760_v18  ;;  %v3502_v34 = vrot.slane %v830_v17, 7  ;;  %v833_v35 = vshll.u32 %v2947_v2, 16  ;;  %v485_v2 = vld [vmem:[#allocation2 + $0x1c] sm:$0x1]  ;;  %v338_v18 = vld [vmem:[%s3465_s0 + $0x20] sm:$0xff] }
  0x3c   : > { %v2926_v36 = vpack.c.bf16 %v345_v22, %v345_v22  ;;  %v2924_v37 = vpack.c.bf16 %v343_v23, %v343_v23  ;;  %v827_v38 = vor.u32 %v825_v21, %v3485_v20  ;;  %v2927_v39 = vpack.c.bf16 %v346_v27, %v346_v27  ;;  %v476_v23 = vld [vmem:[#allocation2 + $0x10] sm:$0xf] }
  0x3d   : > { %v344_v41 = vmul.f32 %v3483_v19, %v335_v28  ;;  %v348_v42 = vmul.f32 %v3483_v19, %v339_v29  ;;  %v819_v43 = vor.u32 %v817_v26, %v3492_v25  ;;  %v835_v52 = vor.u32 %v833_v35, %v3502_v34  ;;  %v340_v28 = vld [vmem:[%s3465_s0 + $0x30] sm:$0xff]  ;;  %v537_v29 = vld [vmem:[%s3387_s29 + $0x38] sm:$0xff] }
  0x3e   : > { %657 = vrot.lane.b32.xlu1 %v610_v60, %s3271_s15  ;;  %653 = vrot.lane.b32.xlu0 %v602_v56, %s3271_s15  ;;  %v400_v44 = vshrl.u32 %v2926_v36, 16  ;;  %v403_v45 = vshll.u32 %v2926_v36, 16  ;;  %v384_v46 = vshrl.u32 %v2924_v37, 16  ;;  %v387_v48 = vshll.u32 %v2924_v37, 16 }
  0x3f   : > { %v408_v49 = vshrl.u32 %v2927_v39, 16  ;;  %v411_v50 = vshll.u32 %v2927_v39, 16  ;;  %v2925_v51 = vpack.c.bf16 %v344_v41, %v344_v41  ;;  %v3511_v53 = vpack.c.bf16 %v769_v33, %v769_v33 }
  0x40   : > { %v402_v54 = vrot.slane %v400_v44, 7  ;;  %v386_v56 = vrot.slane %v384_v46, 7  ;;  %v2929_v3 = vpack.c.bf16 %v348_v42, %v348_v42  ;;  %v347_v42 = vmul.f32 %v3483_v19, %v338_v18  ;;  %v503_v46 = vld [vmem:[#allocation2 + $0x34] sm:$0x1]  ;;  %v509_v18 = vld [vmem:[#allocation2 + $0x3c] sm:$0x1] }
  0x41   : > { %v410_v60 = vrot.slane %v408_v49, 7  ;;  %v392_v62 = vshrl.u32 %v2925_v51, 16  ;;  %v395_v63 = vshll.u32 %v2925_v51, 16  ;;  %v341_v51 = vld [vmem:[%s3465_s0 + $0x38] sm:$0xff] }
  0x42   : > { %663 = vrot.lane.b32.xlu1 %v625_v4, %s3271_s15  ;;  %659 = vrot.lane.b32.xlu0 %v617_v7, %s3271_s15  ;;  %v405_v4 = vor.u32 %v403_v45, %v402_v54  ;;  %v389_v6 = vor.u32 %v387_v48, %v386_v56  ;;  %v488_v7 = vld [vmem:[#allocation2 + $0x20] sm:$0xf]  ;;  %v390_v9 = vrot.slane %v386_v56, 4  ;;  %v406_v11 = vrot.slane %v402_v54, 4 }
  0x43   : > { %v413_v13 = vor.u32 %v411_v50, %v410_v60  ;;  %v394_v14 = vrot.slane %v392_v62, 7  ;;  %v424_v17 = vshrl.u32 %v2929_v3, 16  ;;  %v427_v41 = vshll.u32 %v2929_v3, 16 }
  0x44   : > { %v483_v21 = vsel %vm3515_vm7, %v405_v4, %v482_v47  ;;  %v468_v22 = vsel %vm3515_vm7, %v389_v6, %v467_v58  ;;  %v474_v26 = vsel %vm3521_vm8, %v390_v9, %v473_v59  ;;  %v486_v27 = vsel %vm3521_vm8, %v406_v11, %v485_v2  ;;  %v494_v4 = vld [vmem:[#allocation2 + $0x28] sm:$0xf] }
  0x45   : > { %484 = vst [vmem:[#allocation2 + $0x18] sm:$0xf] %v483_v21  ;;  %469 = vst [vmem:[#allocation2 + $0x8] sm:$0xf] %v468_v22  ;;  %v489_v33 = vsel %vm3515_vm7, %v413_v13, %v488_v7  ;;  %v397_v35 = vor.u32 %v395_v63, %v394_v14  ;;  %v398_v36 = vrot.slane %v394_v14, 4  ;;  %v426_v39 = vrot.slane %v424_v17, 7 }
  0x46   : > { %869 = vrot.lane.b32.xlu1 %v811_v24, %s3272_s7  ;;  %667 = vrot.lane.b32.xlu0 %v633_v15, %s3271_s15  ;;  %v414_v15 = vrot.slane %v410_v60, 4  ;;  %v479_v24 = vld [vmem:[#allocation2 + $0x14] sm:$0x1]  ;;  %475 = vst [vmem:[#allocation2 + $0xc] sm:$0x1] %v474_v26  ;;  %v349_v45 = vmul.f32 %v3483_v19, %v340_v28  ;;  %v546_v47 = vmul.f32 %v3392_v5, %v537_v29  ;;  %v812_v54 = vrot.slane %v3474_v8, 4 }
  0x47   : > { %487 = vst [vmem:[#allocation2 + $0x1c] sm:$0x1] %v486_v27  ;;  %490 = vst [vmem:[#allocation2 + $0x20] sm:$0xf] %v489_v33  ;;  %v477_v44 = vsel %vm3515_vm7, %v397_v35, %v476_v23  ;;  %v480_v61 = vsel %vm3521_vm8, %v398_v36, %v479_v24  ;;  %v429_v48 = vor.u32 %v427_v41, %v426_v39  ;;  %v430_v50 = vrot.slane %v426_v39, 4  ;;  %v763_v7 = vld [vmem:[%s3415_s21 + $0x38] sm:$0xff] }
  0x48   : > { %v492_v37 = vsel %vm3521_vm8, %v414_v15, %v491_v10  ;;  %478 = vst [vmem:[#allocation2 + $0x10] sm:$0xf] %v477_v44  ;;  %481 = vst [vmem:[#allocation2 + $0x14] sm:$0x1] %v480_v61  ;;  %v2928_v49 = vpack.c.bf16 %v347_v42, %v347_v42  ;;  %v838_v56 = vshrl.u32 %v3511_v53, 16  ;;  %v2930_v58 = vpack.c.bf16 %v349_v45, %v349_v45 }
  0x49   : > { %493 = vst [vmem:[#allocation2 + $0x24] sm:$0x1] %v492_v37  ;;  %v504_v8 = vsel %vm3521_vm8, %v430_v50, %v503_v46  ;;  %v849_v62 = vshll.u32 %v3499_v32, 16  ;;  %v350_v57 = vmul.f32 %v3483_v19, %v341_v51  ;;  %v828_v63 = vrot.slane %v3485_v20, 4  ;;  %v506_v20 = vld [vmem:[#allocation2 + $0x38] sm:$0xf] }
  0x4a   : > { %877 = vrot.lane.b32.xlu1 %v827_v38, %s3272_s7  ;;  %873 = vrot.lane.b32.xlu0 %v819_v43, %s3272_s7  ;;  %v771_v38 = vmul.f32 %v3431_v40, %v762_v12  ;;  %v846_v43 = vshrl.u32 %v3499_v32, 16  ;;  %v416_v60 = vshrl.u32 %v2928_v49, 16  ;;  %v432_v0 = vshrl.u32 %v2930_v58, 16  ;;  %505 = vst [vmem:[#allocation2 + $0x34] sm:$0x1] %v504_v8 }
  0x4b   : > { %v840_v2 = vrot.slane %v838_v56, 7  ;;  %v841_v3 = vshll.u32 %v3511_v53, 16  ;;  %v836_v6 = vrot.slane %v3502_v34, 4  ;;  %v3584_v11 = vpack.c.bf16 %v546_v47, %v546_v47  ;;  %v497_v12 = vld [vmem:[#allocation2 + $0x2c] sm:$0x1] }
  0x4c   : > { %v3566_v5 = vpack.c.bf16 %v771_v38, %v771_v38  ;;  %v418_v9 = vrot.slane %v416_v60, 7  ;;  %v434_v10 = vrot.slane %v432_v0, 7  ;;  %v3207_v53 = vld [vmem:[%s4181_s3 + $0x8] sm:$0x3f]   ;;  %v2931_v13 = vpack.c.bf16 %v350_v57, %v350_v57  ;;  %v3208_v21 = vld [vmem:[%s4181_s3 + $0x20] sm:$0x3f]  }
  0x4d   : > { %v843_v22 = vor.u32 %v841_v3, %v840_v2  ;;  %v772_v24 = vmul.f32 %v3431_v40, %v763_v7  ;;  %3153 = vmatprep.subr.msk.bf16.mxu1 %vm1135_vm9, %v3207_v53  ;;  %3157 = vmatprep.subr.msk.bf16.mxu0 %vm1135_vm9, %v3208_v21  ;;  %v1137_v33 = vsel %vm1135_vm9, %v3207_v53, 0  ;;  %v3608_v35 = vsel %vm1135_vm9, %v3208_v21, 0  ;;  %v515_v44 = vld [vmem:[#allocation2 + $0x44] sm:$0x1]  ;;  %v512_v61 = vld [vmem:[#allocation2 + $0x40] sm:$0xf] }
  0x4e   : > { %661 = vrot.lane.b32.xlu1 %v618_v16, %s3271_s15  ;;  %881 = vrot.lane.b32.xlu0 %v835_v52, %s3272_s7  ;;  %v500_v16 = vld [vmem:[#allocation2 + $0x30] sm:$0xf]  ;;  %v820_v52 = vrot.slane %v3492_v25, 4  ;;  %v3572_v25 = vrot.slane %v846_v43, 7  ;;  %v854_v32 = vshrl.u32 %v3566_v5, 16  ;;  %v422_v17 = vrot.slane %v418_v9, 4 }
  0x4f   : > { %v501_v59 = vsel %vm3515_vm7, %v429_v48, %v500_v16  ;;  %v438_v34 = vrot.slane %v434_v10, 4  ;;  %v857_v23 = vshll.u32 %v3566_v5, 16  ;;  %2998 = vmatpush3.bf16.msra.mxu1 %v1137_v33  ;;  %3038 = vmatpush3.bf16.msra.mxu0 %v3608_v35  ;;  %v440_v36 = vshrl.u32 %v2931_v13, 16  ;;  %v3617_v46 = vld [vmem:[%s4181_s3] sm:$0x3f]  }
  0x50   : > { %502 = vst [vmem:[#allocation2 + $0x30] sm:$0xf] %v501_v59  ;;  %v851_v19 = vor.u32 %v849_v62, %v3572_v25  ;;  %v856_v26 = vrot.slane %v854_v32, 7  ;;  %v498_v29 = vsel %vm3521_vm8, %v422_v17, %v497_v12  ;;  %v443_v37 = vshll.u32 %v2931_v13, 16  ;;  %v3622_v47 = vld [vmem:[%s4181_s3 + $0x28] sm:$0x3f]   ;;  %3154 = vmatprep.subr.msk.bf16.mxu1 %vm1135_vm9, %v3617_v46 }
  0x51   : > { %499 = vst [vmem:[#allocation2 + $0x2c] sm:$0x1] %v498_v29  ;;  %v510_v40 = vsel %vm3521_vm8, %v438_v34, %v509_v18  ;;  %v636_v38 = vshrl.u32 %v3584_v11, 16  ;;  %v844_v39 = vrot.slane %v840_v2, 4  ;;  %v2951_v42 = vpack.c.bf16 %v772_v24, %v772_v24  ;;  %3159 = vmatprep.subr.msk.bf16.mxu0 %vm1135_vm9, %v3622_v47  ;;  %v693_v62 = vld [vmem:[#allocation2 + $0x8] sm:$0xf] }
  0x52   : > { %669 = vrot.lane.b32.xlu1 %v634_v30, %s3271_s15  ;;  %665 = vrot.lane.b32.xlu0 %v626_v31, %s3271_s15  ;;  %v419_v30 = vshll.u32 %v2928_v49, 16  ;;  %v435_v31 = vshll.u32 %v2930_v58, 16  ;;  %511 = vst [vmem:[#allocation2 + $0x3c] sm:$0x1] %v510_v40  ;;  %v859_v41 = vor.u32 %v857_v23, %v856_v26  ;;  %v442_v43 = vrot.slane %v440_v36, 7 }
  0x53   : > { %v852_v48 = vrot.slane %v3572_v25, 4  ;;  %v638_v49 = vrot.slane %v636_v38, 7  ;;  %v639_v50 = vshll.u32 %v3584_v11, 16  ;;  %v860_v51 = vrot.slane %v856_v26, 4  ;;  %v707_v25 = vld [vmem:[#allocation2 + $0x18] sm:$0xf] }
  0x54   : > { %v421_v14 = vor.u32 %v419_v30, %v418_v9  ;;  %v437_v15 = vor.u32 %v435_v31, %v434_v10  ;;  %v446_v16 = vrot.slane %v442_v43, 4  ;;  %v445_v45 = vor.u32 %v443_v37, %v442_v43  ;;  %v701_v2 = vld [vmem:[#allocation2 + $0x10] sm:$0xf]  ;;  %v704_v9 = vld [vmem:[#allocation2 + $0x14] sm:$0x1] }
  0x55   : > { %v642_v58 = vrot.slane %v638_v49, 4  ;;  %v641_v5 = vor.u32 %v639_v50, %v638_v49  ;;  %v865_v1 = vshll.u32 %v2951_v42, 16  ;;  %v698_v10 = vld [vmem:[#allocation2 + $0xc] sm:$0x1]  ;;  %v716_v53 = vld [vmem:[#allocation2 + $0x24] sm:$0x1] }
  0x56   : > { %875 = vrot.lane.b32.xlu1 %v820_v52, %s3272_s7  ;;  %871 = vrot.lane.b32.xlu0 %v812_v54, %s3272_s7  ;;  %v495_v27 = vsel %vm3515_vm7, %v421_v14, %v494_v4  ;;  %v507_v28 = vsel %vm3515_vm7, %v437_v15, %v506_v20  ;;  %v862_v52 = vshrl.u32 %v2951_v42, 16  ;;  %v516_v54 = vsel %vm3521_vm8, %v446_v16, %v515_v44  ;;  %v710_v13 = vld [vmem:[#allocation2 + $0x1c] sm:$0x1]  ;;  %v3677_v29 = vld [vmem:[#allocation2] sm:$0xf]  ;;  %vm3813_vm8 = vmor %vm1333_vm4, %vm1334_vm5 }
  0x57   : > { %496 = vst [vmem:[#allocation2 + $0x28] sm:$0xf] %v495_v27  ;;  %508 = vst [vmem:[#allocation2 + $0x38] sm:$0xf] %v507_v28  ;;  %v513_v56 = vsel %vm3515_vm7, %v445_v45, %v512_v61  ;;  %v725_v18 = vld [vmem:[#allocation2 + $0x30] sm:$0xf] }
  0x58   : > { %517 = vst [vmem:[#allocation2 + $0x44] sm:$0x1] %v516_v54  ;;  %514 = vst [vmem:[#allocation2 + $0x40] sm:$0xf] %v513_v56  ;;  %v864_v59 = vrot.slane %v862_v52, 7  ;;  %v991_v40 = vshrl.u32 %v3677_v29, 16 }
  0x59   : > { %v994_v33 = vshll.u32 %v3677_v29, 16  ;;  %vm1122_vm7 = vcmask 97280  }
  0x5a   : > { %883 = vrot.lane.b32.xlu1 %v836_v6, %s3272_s7  ;;  %879 = vrot.lane.b32.xlu0 %v828_v63, %s3272_s7  ;;  %v868_v55 = vrot.slane %v864_v59, 4  ;;  %v867_v60 = vor.u32 %v865_v1, %v864_v59  ;;  %v713_v63 = vld [vmem:[#allocation2 + $0x20] sm:$0xf]  ;;  %v993_v42 = vrot.slane %v991_v40, 4 }
  0x5b   : > { %v996_v43 = vrot.slane %v994_v33, 5 }
  0x5d   : > { %v997_v52 = vor.u32 %v996_v43, %v993_v42 }
  0x5e   : > { %889 = vrot.lane.b32.xlu1 %v851_v19, %s3272_s7  ;;  %885 = vrot.lane.b32.xlu0 %v843_v22, %s3272_s7  ;;  %v719_v21 = vld [vmem:[#allocation2 + $0x28] sm:$0xf]  ;;  %v731_v28 = vld [vmem:[#allocation2 + $0x38] sm:$0xf] }
  0x62   : > { %887 = vrot.lane.b32.xlu1 %v844_v39, %s3272_s7  ;;  %893 = vrot.lane.b32.xlu0 %v859_v41, %s3272_s7 }
  0x66   : > { %895 = vrot.lane.b32.xlu1 %v860_v51, %s3272_s7  ;;  %891 = vrot.lane.b32.xlu0 %v852_v48, %s3272_s7  ;;  %v3685_v48 = vld [vmem:[#allocation2 + $0x4] sm:$0x1]  ;;  %v722_v51 = vld [vmem:[#allocation2 + $0x2c] sm:$0x1] }
  0x67   : > { %v1000_v54 = vshll.u32 %v3685_v48, 16 }
  0x6a   : > { %673 = vrot.lane.b32.xlu1 %v642_v58, %s3271_s15  ;;  %671 = vrot.lane.b32.xlu0 %v641_v5, %s3271_s15 }
  0x6e   : > { %899 = vrot.lane.b32.xlu1 %v868_v55, %s3272_s7  ;;  %897 = vrot.lane.b32.xlu0 %v867_v60, %s3272_s7  ;;  %v728_v55 = vld [vmem:[#allocation2 + $0x34] sm:$0x1] }
  0xa4   : > { %v652_v0 = vpop.permute.xlu1 %651  ;;  %v644_v57 = vpop.permute.xlu0 %643 }
  0xa5   : > { %v708_v30 = vsel %vm3643_vm11, %v652_v0, %v707_v25  ;;  %v694_v31 = vsel %vm3643_vm11, %v644_v57, %v693_v62  ;;  %v734_v62 = vld [vmem:[#allocation2 + $0x3c] sm:$0x1] }
  0xa6   : > { %709 = vst [vmem:[#allocation2 + $0x18] sm:$0xf] %v708_v30  ;;  %695 = vst [vmem:[#allocation2 + $0x8] sm:$0xf] %v694_v31 }
  0xa8   : > { %v656_v3 = vpop.permute.xlu1 %655  ;;  %v648_v4 = vpop.permute.xlu0 %647 }
  0xa9   : > { %v714_v6 = vsel %vm3643_vm11, %v656_v3, %v713_v63  ;;  %v702_v32 = vsel %vm3643_vm11, %v648_v4, %v701_v2  ;;  %v3700_v63 = vrot.slane %v997_v52, 4  ;;  %v3702_v2 = vrot.slane %v1000_v54, 5 }
  0xaa   : > { %715 = vst [vmem:[#allocation2 + $0x20] sm:$0xf] %v714_v6  ;;  %703 = vst [vmem:[#allocation2 + $0x10] sm:$0xf] %v702_v32 }
  0xac   : > { %v650_v19 = vpop.permute.xlu1 %649  ;;  %v646_v11 = vpop.permute.xlu0 %645 }
  0xad   : > { %v705_v20 = vsel %vm3656_vm13, %v650_v19, %v704_v9  ;;  %v699_v12 = vsel %vm3656_vm13, %v646_v11, %v698_v10  ;;  %v919_v37 = vld [vmem:[#allocation2 + $0x8] sm:$0xf]  ;;  %v933_v61 = vld [vmem:[#allocation2 + $0x18] sm:$0xf]  ;;  %v3708_v9 = vsel %vm1135_vm9, %v3617_v46, 0  ;;  %v3712_v10 = vsel %vm1135_vm9, %v3622_v47, 0 }
  0xae   : > { %706 = vst [vmem:[#allocation2 + $0x14] sm:$0x1] %v705_v20  ;;  %700 = vst [vmem:[#allocation2 + $0xc] sm:$0x1] %v699_v12 }
  0xb0   : > { %v658_v14 = vpop.permute.xlu1 %657  ;;  %v654_v15 = vpop.permute.xlu0 %653 }
  0xb1   : > { %v717_v17 = vsel %vm3656_vm13, %v658_v14, %v716_v53  ;;  %v711_v34 = vsel %vm3656_vm13, %v654_v15, %v710_v13  ;;  %v927_v45 = vld [vmem:[#allocation2 + $0x10] sm:$0xf]  ;;  %v939_v5 = vld [vmem:[#allocation2 + $0x20] sm:$0xf] }
  0xb2   : > { %718 = vst [vmem:[#allocation2 + $0x24] sm:$0x1] %v717_v17  ;;  %712 = vst [vmem:[#allocation2 + $0x1c] sm:$0x1] %v711_v34 }
  0xb4   : > { %v664_v22 = vpop.permute.xlu1 %663  ;;  %v660_v23 = vpop.permute.xlu0 %659 }
  0xb5   : > { %v726_v24 = vsel %vm3643_vm11, %v664_v22, %v725_v18  ;;  %v720_v26 = vsel %vm3643_vm11, %v660_v23, %v719_v21  ;;  %v930_v47 = vld [vmem:[#allocation2 + $0x14] sm:$0x1] }
  0xb6   : > { %727 = vst [vmem:[#allocation2 + $0x30] sm:$0xf] %v726_v24  ;;  %721 = vst [vmem:[#allocation2 + $0x28] sm:$0xf] %v720_v26 }
  0xb8   : > { %v870_v36 = vpop.permute.xlu1 %869  ;;  %v668_v38 = vpop.permute.xlu0 %667 }
  0xb9   : > { %v920_v39 = vsel %vm3673_vm15, %v870_v36, %v919_v37  ;;  %v732_v41 = vsel %vm3643_vm11, %v668_v38, %v731_v28  ;;  %v924_v28 = vld [vmem:[#allocation2 + $0xc] sm:$0x1]  ;;  %v942_v42 = vld [vmem:[#allocation2 + $0x24] sm:$0x1] }
  0xba   : > { %921 = vst [vmem:[#allocation2 + $0x8] sm:$0xf] %v920_v39  ;;  %733 = vst [vmem:[#allocation2 + $0x38] sm:$0xf] %v732_v41 }
  0xbc   : > { %v878_v44 = vpop.permute.xlu1 %877  ;;  %v874_v16 = vpop.permute.xlu0 %873 }
  0xbd   : > { %v934_v49 = vsel %vm3673_vm15, %v878_v44, %v933_v61  ;;  %v928_v50 = vsel %vm3673_vm15, %v874_v16, %v927_v45 }
  0xbe   : > { %935 = vst [vmem:[#allocation2 + $0x18] sm:$0xf] %v934_v49  ;;  %929 = vst [vmem:[#allocation2 + $0x10] sm:$0xf] %v928_v50 }
  0xc0   : > { %v662_v56 = vpop.permute.xlu1 %661  ;;  %v882_v58 = vpop.permute.xlu0 %881 }
  0xc1   : > { %v723_v59 = vsel %vm3656_vm13, %v662_v56, %v722_v51  ;;  %v940_v1 = vsel %vm3673_vm15, %v882_v58, %v939_v5  ;;  %v3696_v60 = vld [vmem:[#allocation2 + $0x8] sm:$0xf]  ;;  %v936_v58 = vld [vmem:[#allocation2 + $0x1c] sm:$0x1] }
  0xc2   : > { %v1600_v25 = vld [vmem:[#allocation2 + $0x8] sm:$0xf]  ;;  %724 = vst [vmem:[#allocation2 + $0x2c] sm:$0x1] %v723_v59  ;;  %941 = vst [vmem:[#allocation2 + $0x20] sm:$0xf] %v940_v1 }
  0xc3   : > { %v1005_v0 = vshrl.u32 %v3696_v60, 16  ;;  %v1008_v57 = vshll.u32 %v3696_v60, 16  ;;  %v1617_v30 = vshrl.u32 %v1600_v25, 16  ;;  %v1620_v31 = vshll.u32 %v1600_v25, 16  ;;  %v3737_v52 = vld [vmem:[#allocation2 + $0x8] sm:$0xe] }
  0xc4   : > { %v670_v3 = vpop.permute.xlu1 %669  ;;  %v666_v4 = vpop.permute.xlu0 %665 }
  0xc5   : > { %v3704_v6 = vrot.slane %v1005_v0, 4  ;;  %v1010_v32 = vrot.slane %v1008_v57, 5  ;;  %v735_v19 = vsel %vm3656_vm13, %v670_v3, %v734_v62  ;;  %v729_v11 = vsel %vm3656_vm13, %v666_v4, %v728_v55  ;;  %v1602_v20 = vld [vmem:[#allocation2 + $0x10] sm:$0xf]  ;;  %v3720_v53 = vld [vmem:[#allocation2 + $0x18] sm:$0xf] }
  0xc6   : > { %v3718_v12 = vld [vmem:[#allocation2 + $0x10] sm:$0xf]  ;;  %736 = vst [vmem:[#allocation2 + $0x3c] sm:$0x1] %v735_v19  ;;  %730 = vst [vmem:[#allocation2 + $0x34] sm:$0x1] %v729_v11 }
  0xc7   : > { %v1619_v13 = vrot.slane %v1617_v30, 4  ;;  %v1622_v14 = vrot.slane %v1620_v31, 5  ;;  %v1631_v15 = vshrl.u32 %v1602_v20, 16  ;;  %v1634_v17 = vshll.u32 %v1602_v20, 16  ;;  %v1604_v23 = vld [vmem:[#allocation2 + $0x18] sm:$0xf] }
  0xc8   : > { %v1019_v34 = vshrl.u32 %v3718_v12, 16  ;;  %v1022_v18 = vshll.u32 %v3718_v12, 16  ;;  %v1033_v21 = vshrl.u32 %v3720_v53, 16  ;;  %v1036_v22 = vshll.u32 %v3720_v53, 16  ;;  %v876_v24 = vpop.permute.xlu1 %875  ;;  %v872_v26 = vpop.permute.xlu0 %871  ;;  %v3749_v30 = vld [vmem:[#allocation2 + $0x10] sm:$0xe] }
  0xc9   : > { %v1633_v40 = vrot.slane %v1631_v15, 4  ;;  %v1636_v33 = vrot.slane %v1634_v17, 5  ;;  %v931_v36 = vsel %vm3724_vm3, %v876_v24, %v930_v47  ;;  %v925_v37 = vsel %vm3724_vm3, %v872_v26, %v924_v28  ;;  %v1606_v41 = vld [vmem:[#allocation2 + $0x20] sm:$0xf]  ;;  %v951_v31 = vld [vmem:[#allocation2 + $0x30] sm:$0xf] }
  0xca   : > { %v1021_v38 = vrot.slane %v1019_v34, 4  ;;  %v1024_v39 = vrot.slane %v1022_v18, 5  ;;  %932 = vst [vmem:[#allocation2 + $0x14] sm:$0x1] %v931_v36  ;;  %926 = vst [vmem:[#allocation2 + $0xc] sm:$0x1] %v925_v37  ;;  %v1011_v43 = vor.u32 %v1010_v32, %v3704_v6  ;;  %v1623_v45 = vor.u32 %v1622_v14, %v1619_v13 }
  0xcb   : > { %v1035_v44 = vrot.slane %v1033_v21, 4  ;;  %v1038_v61 = vrot.slane %v1036_v22, 5  ;;  %v1645_v16 = vshrl.u32 %v1604_v23, 16  ;;  %v1648_v49 = vshll.u32 %v1604_v23, 16  ;;  %v3739_v55 = vld [vmem:[#allocation2 + $0x20] sm:$0xf] }
  0xcc   : > { %v1659_v50 = vshrl.u32 %v1606_v41, 16  ;;  %v1662_v51 = vshll.u32 %v1606_v41, 16  ;;  %v884_v54 = vpop.permute.xlu1 %883  ;;  %v880_v56 = vpop.permute.xlu0 %879  ;;  %v1637_v5 = vor.u32 %v1636_v33, %v1633_v40  ;;  %v1025_v59 = vor.u32 %v1024_v39, %v1021_v38  ;;  %v945_v3 = vld [vmem:[#allocation2 + $0x28] sm:$0xf]  ;;  %v3764_v21 = vld [vmem:[#allocation2 + $0x18] sm:$0xe] }
  0xcd   : > { %v1039_v1 = vor.u32 %v1038_v61, %v1035_v44  ;;  %v943_v25 = vsel %vm3724_vm3, %v884_v54, %v942_v42  ;;  %v937_v62 = vsel %vm3724_vm3, %v880_v56, %v936_v58  ;;  %v3745_v0 = vrot.slane %v1645_v16, 4  ;;  %v948_v16 = vld [vmem:[#allocation2 + $0x2c] sm:$0x1] }
  0xce   : > { %v3747_v57 = vrot.slane %v1648_v49, 5  ;;  %944 = vst [vmem:[#allocation2 + $0x24] sm:$0x1] %v943_v25  ;;  %938 = vst [vmem:[#allocation2 + $0x1c] sm:$0x1] %v937_v62  ;;  %v1012_v6 = vrot.slane %v1011_v43, 4  ;;  %v1003_v26 = vsel %vm3753_vm6, %v3700_v63, %v3702_v2 }
  0xcf   : > { %v2859_v32 = vrot.slane %v3737_v52, 9  ;;  %v1624_v19 = vrot.slane %v1623_v45, 4  ;;  %v1661_v11 = vrot.slane %v1659_v50, 4  ;;  %v1664_v20 = vrot.slane %v1662_v51, 5  ;;  %v957_v63 = vld [vmem:[#allocation2 + $0x38] sm:$0xf] }
  0xd0   : > { %v1047_v47 = vshrl.u32 %v3739_v55, 16  ;;  %v890_v13 = vpop.permute.xlu1 %889  ;;  %v886_v14 = vpop.permute.xlu0 %885  ;;  %v1638_v15 = vrot.slane %v1637_v5, 4  ;;  %v3759_v17 = vrot.slane %v1025_v59, 4  ;;  %v3761_v34 = vrot.slane %v1039_v1, 4 }
  0xd1   : > { %v2860_v18 = vrot.slane %v3749_v30, 9  ;;  %v952_v22 = vsel %vm3673_vm15, %v890_v13, %v951_v31  ;;  %v946_v23 = vsel %vm3673_vm15, %v886_v14, %v945_v3  ;;  %v3770_v24 = vld [vmem:[#allocation2 + $0xc] sm:$0x1]  ;;  %v3778_v40 = vld [vmem:[#allocation2 + $0x14] sm:$0x1]  ;;  %v1651_v33 = vor.u32 %v3747_v57, %v3745_v0 }
  0xd2   : > { %v3776_v28 = vld [vmem:[#allocation2 + $0xc] sm:$0x1]  ;;  %953 = vst [vmem:[#allocation2 + $0x30] sm:$0xf] %v952_v22  ;;  %947 = vst [vmem:[#allocation2 + $0x28] sm:$0xf] %v946_v23  ;;  %v1665_v42 = vor.u32 %v1664_v20, %v1661_v11 }
  0xd3   : > { %v1014_v36 = vshll.u32 %v3770_v24, 16  ;;  %v1626_v37 = vshll.u32 %v3776_v28, 16  ;;  %v1640_v38 = vshll.u32 %v3778_v40, 16  ;;  %v3785_v39 = vld [vmem:[#allocation2 + $0x14] sm:$0x1]  ;;  %v1050_v41 = vshll.u32 %v3739_v55, 16 }
  0xd4   : > { %v1028_v2 = vshll.u32 %v3785_v39, 16  ;;  %v3789_v43 = vrot.slane %v1047_v47, 4  ;;  %v2861_v44 = vrot.slane %v3764_v21, 9  ;;  %v888_v61 = vpop.permute.xlu1 %887  ;;  %v894_v45 = vpop.permute.xlu0 %893  ;;  %v1862_v54 = vrot.slane %v3776_v28, 5  ;;  %v960_v11 = vld [vmem:[#allocation2 + $0x3c] sm:$0x1] }
  0xd5   : > { %v1016_v49 = vrot.slane %v1014_v36, 5  ;;  %v1628_v50 = vrot.slane %v1626_v37, 5  ;;  %v1642_v51 = vrot.slane %v1640_v38, 5  ;;  %v949_v56 = vsel %vm3724_vm3, %v888_v61, %v948_v16  ;;  %v3798_v59 = vld [vmem:[#allocation2 + $0x1c] sm:$0x1] }
  0xd6   : > { %v958_v58 = vsel %vm3673_vm15, %v894_v45, %v957_v63  ;;  %v1866_v5 = vrot.slane %v3778_v40, 5  ;;  %v1030_v1 = vrot.slane %v1028_v2, 5  ;;  %v3800_v25 = vld [vmem:[#allocation2 + $0x1c] sm:$0x1]  ;;  %950 = vst [vmem:[#allocation2 + $0x2c] sm:$0x1] %v949_v56 }
  0xd7   : > { %959 = vst [vmem:[#allocation2 + $0x38] sm:$0xf] %v958_v58  ;;  %v1017_v62 = vsel %vm3753_vm6, %v1012_v6, %v1016_v49  ;;  %v1629_v0 = vsel %vm3753_vm6, %v1624_v19, %v1628_v50  ;;  %v1643_v57 = vsel %vm3753_vm6, %v1638_v15, %v1642_v51  ;;  %v1042_v31 = vshll.u32 %v3798_v59, 16  ;;  %v3809_v3 = vld [vmem:[#allocation2 + $0x24] sm:$0x1] }
  0xd8   : > { %v954_v20 = vld [vmem:[#allocation2 + $0x34] sm:$0x1]  ;;  %v2800_v47 = vcombine.low %v1003_v26, %v1017_v62  ;;  %v2850_v13 = vcombine.low %v1629_v0, %v1643_v57  ;;  %v1652_v14 = vrot.slane %v1651_v33, 4  ;;  %v1666_v22 = vrot.slane %v1665_v42, 4  ;;  %v896_v19 = vpop.permute.xlu1 %895  ;;  %v892_v23 = vpop.permute.xlu0 %891  ;;  %v3822_v36 = vld [vmem:[#allocation2 + $0x24] sm:$0x1] }
  0xd9   : > { %v1031_v15 = vsel %vm3753_vm6, %v3759_v17, %v1030_v1  ;;  %v1044_v28 = vrot.slane %v1042_v31, 5  ;;  %v1654_v40 = vshll.u32 %v3800_v25, 16  ;;  %v1668_v26 = vshll.u32 %v3809_v3, 16  ;;  %v3832_v63 = vld [vmem:[#allocation2 + $0x28] sm:$0xf] }
  0xda   : > { %v961_v33 = vsel %vm3724_vm3, %v896_v19, %v960_v11  ;;  %v955_v37 = vsel %vm3724_vm3, %v892_v23, %v954_v20  ;;  %2999 = vmatprep.mubr.msk.bf16.mxu1 %vm1122_vm7, %v2800_v47  ;;  %3039 = vmatprep.mubr.msk.bf16.mxu0 %vm1122_vm7, %v2850_v13  ;;  %v1870_v38 = vrot.slane %v3800_v25, 5  ;;  %v1874_v17 = vrot.slane %v3809_v3, 5  ;;  %v740_v2 = vld [vmem:[#allocation2 + $0x44] sm:$0x1]  ;;  %v737_v42 = vld [vmem:[#allocation2 + $0x40] sm:$0xf] }
  0xdb   : > { %962 = vst [vmem:[#allocation2 + $0x3c] sm:$0x1] %v961_v33  ;;  %956 = vst [vmem:[#allocation2 + $0x34] sm:$0x1] %v955_v37  ;;  %v1045_v61 = vsel %vm3753_vm6, %v3761_v34, %v1044_v28  ;;  %v1656_v16 = vrot.slane %v1654_v40, 5  ;;  %v1670_v45 = vrot.slane %v1668_v26, 5  ;;  %v1863_v49 = vsel %vm3813_vm8, %v2859_v32, %v1862_v54 }
  0xdc   : > { %v2801_v50 = vcombine.low %v1031_v15, %v1045_v61  ;;  %v1867_v51 = vsel %vm3813_vm8, %v2860_v18, %v1866_v5  ;;  %v1052_v56 = vrot.slane %v1050_v41, 5  ;;  %v1056_v58 = vshll.u32 %v3822_v36, 16  ;;  %v3849_v34 = vld [vmem:[%s4181_s3 + $0x10] sm:$0x3f]   ;;  %v674_v1 = vpop.permute.xlu1 %673  ;;  %v672_v62 = vpop.permute.xlu0 %671  ;;  %v3219_v21 = vld [vmem:[%s4181_s3 + $0x38] sm:$0x3f]  }
  0xdd   : > { %v1657_v52 = vsel %vm3753_vm6, %v1652_v14, %v1656_v16  ;;  %v1671_v32 = vsel %vm3753_vm6, %v1666_v22, %v1670_v45  ;;  %v1061_v30 = vshrl.u32 %v3832_v63, 16  ;;  %v1064_v18 = vshll.u32 %v3832_v63, 16  ;;  %v3857_v41 = vld [vmem:[#allocation2 + $0x30] sm:$0xf]  ;;  %v3864_v57 = vld [vmem:[#allocation2 + $0x2c] sm:$0x1] }
  0xde   : > { %v741_v54 = vsel %vm3656_vm13, %v674_v1, %v740_v2  ;;  %v738_v5 = vsel %vm3643_vm11, %v672_v62, %v737_v42  ;;  %3000 = vmatmul.mubr.msk.bf16.vlgmr.msra.gmra.mrb[0].mxu1 %vm1122_vm7, %v2801_v50  ;;  %v2851_v0 = vcombine.low %v1657_v52, %v1671_v32  ;;  %v1053_v31 = vor.u32 %v1052_v56, %v3789_v43  ;;  %v3867_v11 = vld [vmem:[#allocation2 + $0x38] sm:$0xf]  ;;  %v3872_v20 = vld [vmem:[%s4181_s3 + $0x30] sm:$0x3f]   ;;  %v1839_v14 = vld [vmem:[#allocation2 + $0x20] sm:$0xe] }
  0xdf   : > { %742 = vst [vmem:[#allocation2 + $0x44] sm:$0x1] %v741_v54  ;;  %739 = vst [vmem:[#allocation2 + $0x40] sm:$0xf] %v738_v5  ;;  %v2869_v7 = vcombine.low %v1863_v49, %v1867_v51  ;;  %3008 = vmatpush3.bf16.msra.mxu1 %v3708_v9  ;;  %v1063_v8 = vrot.slane %v1061_v30, 4  ;;  %v1066_v47 = vrot.slane %v1064_v18, 5 }
  0xe0   : > { %v1070_v13 = vshll.u32 %v3864_v57, 16  ;;  %3040 = vmatmul.mubr.msk.bf16.vlgmr.msra.gmra.mrb[0].mxu0 %vm1122_vm7, %v2851_v0  ;;  %v1058_v43 = vrot.slane %v1056_v58, 5  ;;  %v1075_v22 = vshrl.u32 %v3857_v41, 16  ;;  %v1078_v19 = vshll.u32 %v3857_v41, 16  ;;  %3155 = vmatprep.subr.msk.bf16.mxu1 %vm1135_vm9, %v3849_v34  ;;  %v3885_v26 = vld [vmem:[#allocation2 + $0x2c] sm:$0x1]  ;;  %v900_v49 = vpop.permute.xlu1 %899  ;;  %v898_v50 = vpop.permute.xlu0 %897 }
  0xe1   : > { %v1089_v23 = vshrl.u32 %v3867_v11, 16  ;;  %3049 = vmatprep.mubr.msk.bf16.mxu0 %vm1122_vm7, %v2869_v7  ;;  %3048 = vmatpush3.bf16.msra.mxu0 %v3712_v10  ;;  %v1054_v9 = vrot.slane %v1053_v31, 4  ;;  %v1067_v15 = vor.u32 %v1066_v47, %v1063_v8  ;;  %v1092_v40 = vshll.u32 %v3867_v11, 16  ;;  %v1840_v62 = vld [vmem:[#allocation2 + $0x28] sm:$0xe] }
  0xe2   : > { %v1072_v28 = vrot.slane %v1070_v13, 5  ;;  %v3887_v33 = vld [vmem:[#allocation2 + $0x34] sm:$0x1]  ;;  %v3889_v37 = vld [vmem:[#allocation2 + $0x3c] sm:$0x1]  ;;  %v1077_v2 = vrot.slane %v1075_v22, 4  ;;  %3160 = vmatprep.subr.msk.bf16.mxu0 %vm1135_vm9, %v3872_v20 }
  0xe3   : > { %v1080_v42 = vrot.slane %v1078_v19, 5  ;;  %v1068_v61 = vrot.slane %v1067_v15, 4  ;;  %v1084_v16 = vshll.u32 %v3887_v33, 16  ;;  %v1091_v10 = vrot.slane %v1089_v23, 4  ;;  %v1841_v52 = vld [vmem:[#allocation2 + $0x30] sm:$0xe] }
  0xe4   : > { %v1094_v45 = vrot.slane %v1092_v40, 5  ;;  %v1059_v51 = vsel %vm3753_vm6, %v1054_v9, %v1058_v43  ;;  %v1098_v58 = vshll.u32 %v3889_v37, 16  ;;  %v2862_v1 = vrot.slane %v1839_v14, 9  ;;  %v2139_v32 = vld [vmem:[#allocation2 + $0x48] sm:$0xf] }
  0xe5   : > { %v1081_v56 = vor.u32 %v1080_v42, %v1077_v2  ;;  %v1073_v30 = vsel %vm3753_vm6, %v1068_v61, %v1072_v28  ;;  %v1086_v18 = vrot.slane %v1084_v16, 5  ;;  %v3899_v5 = vld [vmem:[#allocation2 + $0x34] sm:$0x1]  ;;  %v1878_v0 = vrot.slane %v3885_v26, 5  ;;  %v3916_v9 = vld [vmem:[#allocation2] sm:$0xe] }
  0xe6   : > { %v1095_v54 = vor.u32 %v1094_v45, %v1091_v10  ;;  %v966_v31 = vld [vmem:[#allocation2 + $0x44] sm:$0x1]  ;;  %v963_v7 = vld [vmem:[#allocation2 + $0x40] sm:$0xf]  ;;  %v2802_v8 = vcombine.low %v1059_v51, %v1073_v30  ;;  %v1100_v13 = vrot.slane %v1098_v58, 5  ;;  %v1871_v14 = vsel %vm3813_vm8, %v2861_v44, %v1870_v38 }
  0xe7   : > { %v1082_v47 = vrot.slane %v1081_v56, 4  ;;  %v967_v43 = vsel %vm3724_vm3, %v900_v49, %v966_v31  ;;  %v964_v22 = vsel %vm3673_vm15, %v898_v50, %v963_v7  ;;  %v1875_v23 = vsel %vm3813_vm8, %v2862_v1, %v1874_v17  ;;  %v3928_v3 = vld [vmem:[%s4181_s3 + $0x18] sm:$0x3f]   ;;  %v1310_v51 = vld [vmem:[#allocation2 + $0x8] sm:$0xe] }
  0xe8   : > { %v1096_v19 = vrot.slane %v1095_v54, 4  ;;  %968 = vst [vmem:[#allocation2 + $0x44] sm:$0x1] %v967_v43  ;;  %965 = vst [vmem:[#allocation2 + $0x40] sm:$0xf] %v964_v22  ;;  %3003 = vmatprep.mubr.msk.bf16.mxu1 %vm1122_vm7, %v2802_v8  ;;  %v2863_v46 = vrot.slane %v1840_v62, 9  ;;  %v2870_v40 = vcombine.low %v1871_v14, %v1875_v23  ;;  %v2809_v61 = vcombine.low %v3677_v29, %v3696_v60 }
  0xe9   : > { %v1087_v27 = vsel %vm3753_vm6, %v1082_v47, %v1086_v18  ;;  %v2864_v44 = vrot.slane %v1841_v52, 9  ;;  %v1882_v25 = vrot.slane %v3899_v5, 5  ;;  %v1338_v38 = vrot.slane %v3685_v48, 5  ;;  %v3941_v48 = vld [vmem:[#allocation2 + $0x3c] sm:$0x1] }
  0xea   : > { %v1101_v17 = vsel %vm3753_vm6, %v1096_v19, %v1100_v13  ;;  %v2240_v15 = vshrl.u32 %v2139_v32, 16  ;;  %v1879_v2 = vsel %vm3813_vm8, %v2863_v46, %v1878_v0  ;;  %v2050_v10 = vsel %vm1135_vm9, %v3872_v20, 0  ;;  %v1842_v20 = vld [vmem:[#allocation2 + $0x38] sm:$0xe]  ;;  %v2125_v18 = vld [vmem:[#allocation2 + $0x10] sm:$0xf] }
  0xeb   : > { %v2803_v28 = vcombine.low %v1087_v27, %v1101_v17  ;;  %v1883_v42 = vsel %vm3813_vm8, %v2864_v44, %v1882_v25  ;;  %v2818_v45 = vrot.slane %v3916_v9, 9  ;;  %v1401_v49 = vsel %vm1135_vm9, %v3849_v34, 0  ;;  %v2127_v56 = vld [vmem:[#allocation2 + $0x18] sm:$0xf]  ;;  %v1311_v9 = vld [vmem:[#allocation2 + $0x10] sm:$0xe] }
  0xec   : > { %v2871_v16 = vcombine.low %v1879_v2, %v1883_v42  ;;  %3050 = vmatmul.mubr.msk.bf16.vlgmr.msra.gmra.mrb[0].mxu0 %vm1122_vm7, %v2870_v40  ;;  %v3949_v50 = vsel %vm1135_vm9, %v3219_v21, 0  ;;  %v3953_v29 = vsel %vm1135_vm9, %v3928_v3, 0  ;;  %v2243_v60 = vshll.u32 %v2139_v32, 16  ;;  %v1312_v14 = vld [vmem:[#allocation2 + $0x18] sm:$0xe] }
  0xed   : > { %3004 = vmatmul.mubr.msk.bf16.gmra.mrb[4].mxu1 %vm1122_vm7, %v2803_v28  ;;  %3058 = vmatpush3.bf16.msra.mxu0 %v2050_v10  ;;  %v1886_v58 = vrot.slane %v3941_v48, 5  ;;  %v3958_v1 = vrot.slane %v2240_v15, 4  ;;  %v2865_v52 = vrot.slane %v1842_v20, 9  ;;  %v1342_v0 = vrot.slane %v3770_v24, 5  ;;  %v3216_v24 = vld [vmem:[#allocation2 + $0x10] ss:$8 sps:$4 sm:$0xff]  }
  0xee   : > { %3009 = vmatprep.mubr.msk.bf16.mxu1 %vm1122_vm7, %v2809_v61  ;;  %3053 = vmatprep.mubr.msk.bf16.mxu0 %vm1122_vm7, %v2871_v16  ;;  %v3964_v54 = vrot.slane %v2243_v60, 5  ;;  %v1350_v31 = vrot.slane %v3798_v59, 5  ;;  %v2810_v7 = vcombine.low %v3718_v12, %v3720_v53  ;;  %v2819_v8 = vrot.slane %v1310_v51, 9  ;;  %v1313_v59 = vld [vmem:[#allocation2 + $0x20] sm:$0xe] }
  0xef   : > { %v3960_v34 = vld [vmem:[#allocation2 + $0x44] sm:$0x1]  ;;  %v1843_v62 = vld [vmem:[#allocation2 + $0x40] sm:$0xe]  ;;  %3161 = vmatprep.subr.msk.bf16.mxu0 %vm1135_vm9, %v3219_v21  ;;  %v1887_v47 = vsel %vm3813_vm8, %v2865_v52, %v1886_v58  ;;  %v2156_v43 = vshrl.u32 %v2127_v56, 16  ;;  %v2159_v22 = vshll.u32 %v2127_v56, 16  ;;  %v2811_v19 = vcombine.low %v3739_v55, %v3832_v63 }
  0xf0   : > { %v2866_v30 = vrot.slane %v1843_v62, 9  ;;  %v1890_v32 = vrot.slane %v3960_v34, 5  ;;  %v2142_v21 = vshrl.u32 %v2125_v18, 16  ;;  %v2145_v27 = vshll.u32 %v2125_v18, 16  ;;  %v1314_v53 = vld [vmem:[#allocation2 + $0x28] sm:$0xe] }
  0xf1   : > { %v1339_v12 = vsel %vm3813_vm8, %v2818_v45, %v1338_v38  ;;  %v3979_v46 = vld [vmem:[#allocation2 + $0x14] sm:$0x1]  ;;  %v3981_v44 = vld [vmem:[#allocation2 + $0x1c] sm:$0x1]  ;;  %v1346_v25 = vrot.slane %v3785_v39, 5  ;;  %v2812_v55 = vcombine.low %v3857_v41, %v3867_v11  ;;  %v1343_v63 = vsel %vm3813_vm8, %v2819_v8, %v1342_v0 }
  0xf2   : > { %v1891_v13 = vsel %vm3813_vm8, %v2866_v30, %v1890_v32  ;;  %v2821_v17 = vrot.slane %v1312_v14, 9  ;;  %v2131_v15 = vld [vmem:[#allocation2 + $0x28] sm:$0xf]  ;;  %v2820_v38 = vrot.slane %v1311_v9, 9  ;;  %v1354_v28 = vrot.slane %v3822_v36, 5 }
  0xf3   : > { %v2872_v23 = vcombine.low %v1887_v47, %v1891_v13  ;;  %v2158_v39 = vrot.slane %v2156_v43, 4  ;;  %v2161_v40 = vrot.slane %v2159_v22, 5  ;;  %v1358_v11 = vrot.slane %v3864_v57, 5  ;;  %v2135_v61 = vld [vmem:[#allocation2 + $0x38] sm:$0xf] }
  0xf4   : > { %v3996_v41 = vsel %vm3813_vm8, %v2821_v17, %v1350_v31  ;;  %v2144_v2 = vrot.slane %v2142_v21, 4  ;;  %v2147_v42 = vrot.slane %v2145_v27, 5  ;;  %v2828_v16 = vcombine.low %v1339_v12, %v1343_v63  ;;  %v2133_v36 = vld [vmem:[#allocation2 + $0x30] sm:$0xf]  ;;  %v2129_v20 = vld [vmem:[#allocation2 + $0x20] sm:$0xf] }
  0xf5   : > { %3010 = vmatmul.mubr.msk.bf16.vlgmr.msra.gmra.mrb[0].mxu1 %vm1122_vm7, %v2810_v7  ;;  %3054 = vmatmul.mubr.msk.bf16.gmra.mrb[4].mxu0 %vm1122_vm7, %v2872_v23  ;;  %v2822_v10 = vrot.slane %v1313_v59, 9  ;;  %v2165_v45 = vshll.u32 %v3981_v44, 16  ;;  %v2823_v60 = vrot.slane %v1314_v53, 9  ;;  %v2184_v51 = vshrl.u32 %v2131_v15, 16  ;;  %v1315_v52 = vld [vmem:[#allocation2 + $0x30] sm:$0xe] }
  0xf6   : > { %3018 = vmatpush3.bf16.msra.mxu1 %v1401_v49  ;;  %3013 = vmatprep.mubr.msk.bf16.mxu1 %vm1122_vm7, %v2811_v19  ;;  %v1347_v49 = vsel %vm3813_vm8, %v2820_v38, %v1346_v25  ;;  %v2187_v56 = vshll.u32 %v2131_v15, 16  ;;  %v2162_v62 = vor.u32 %v2161_v40, %v2158_v39  ;;  %v4011_v30 = vld [vmem:[%s4181_s3 + $0x40] sm:$0x3f]   ;;  %v2212_v32 = vshrl.u32 %v2135_v61, 16  ;;  %v3220_v0 = vld [vmem:[#allocation2 + $0x30] ss:$8 sps:$4 sm:$0xff]  }
  0xf7   : > { %3156 = vmatprep.subr.msk.bf16.mxu1 %vm1135_vm9, %v3928_v3  ;;  %3059 = vmatprep.mubr.msk.bf16.mxu0 %vm1122_vm7, %v3216_v24  ;;  %v2151_v3 = vshll.u32 %v3979_v46, 16  ;;  %v2829_v58 = vcombine.low %v1347_v49, %v3996_v41  ;;  %v4006_v57 = vsel %vm3813_vm8, %v2822_v10, %v1354_v28  ;;  %v3218_v18 = vld [vmem:[#allocation2 + $0x20] ss:$8 sps:$4 sm:$0xff]   ;;  %v1359_v31 = vsel %vm3813_vm8, %v2823_v60, %v1358_v11  ;;  %v4016_v43 = vld [vmem:[#allocation2 + $0x2c] sm:$0x1] }
  0xf8   : > { %v2148_v7 = vor.u32 %v2147_v42, %v2144_v2  ;;  %v2198_v8 = vshrl.u32 %v2133_v36, 16  ;;  %v2201_v47 = vshll.u32 %v2133_v36, 16  ;;  %v2167_v14 = vrot.slane %v2165_v45, 5  ;;  %v1316_v23 = vld [vmem:[#allocation2 + $0x38] sm:$0xe] }
  0xf9   : > { %v2153_v13 = vrot.slane %v2151_v3, 5  ;;  %v2170_v22 = vshrl.u32 %v2129_v20, 16  ;;  %v2173_v19 = vshll.u32 %v2129_v20, 16  ;;  %v2824_v24 = vrot.slane %v1315_v52, 9  ;;  %v4019_v21 = vld [vmem:[#allocation2 + $0x34] sm:$0x1] }
  0xfa   : > { %v2186_v9 = vrot.slane %v2184_v51, 4  ;;  %v2189_v59 = vrot.slane %v2187_v56, 5  ;;  %v2215_v27 = vshll.u32 %v2135_v61, 16  ;;  %v2163_v12 = vrot.slane %v2162_v62, 4  ;;  %v2137_v63 = vld [vmem:[#allocation2 + $0x40] sm:$0xf] }
  0xfb   : > { %v1362_v53 = vrot.slane %v3887_v33, 5  ;;  %v1366_v25 = vrot.slane %v3889_v37, 5  ;;  %v2149_v17 = vrot.slane %v2148_v7, 4  ;;  %v4026_v15 = vld [vmem:[#allocation2 + $0x3c] sm:$0x1]  ;;  %v2200_v38 = vrot.slane %v2198_v8, 4 }
  0xfc   : > { %v2203_v28 = vrot.slane %v2201_v47, 5  ;;  %v2217_v39 = vrot.slane %v2215_v27, 5  ;;  %v2168_v40 = vsel %vm3753_vm6, %v2163_v12, %v2167_v14  ;;  %v4030_v41 = vld [vmem:[#allocation2 + $0x24] sm:$0x1]  ;;  %v2172_v33 = vrot.slane %v2170_v22, 4 }
  0xfd   : > { %3014 = vmatmul.mubr.msk.bf16.gmra.mrb[4].mxu1 %vm1122_vm7, %v2812_v55  ;;  %3060 = vmatmul.mubr.msk.bf16.vlgmr.msra.gmra.mrb[0].mxu0 %vm1122_vm7, %v3218_v18  ;;  %v2214_v55 = vrot.slane %v2212_v32, 4  ;;  %v2175_v11 = vrot.slane %v2173_v19, 5  ;;  %v2193_v37 = vshll.u32 %v4016_v43, 16  ;;  %v2190_v2 = vor.u32 %v2189_v59, %v2186_v9  ;;  %v3222_v51 = vld [vmem:[#allocation2 + $0x40] ss:$8 sps:$4 sm:$0xff]  }
  0xfe   : > { %3019 = vmatprep.mubr.msk.bf16.mxu1 %vm1122_vm7, %v2828_v16  ;;  %3063 = vmatprep.mubr.msk.bf16.mxu0 %vm1122_vm7, %v3220_v0  ;;  %v2226_v42 = vshrl.u32 %v2137_v63, 16  ;;  %v2229_v61 = vshll.u32 %v2137_v63, 16  ;;  %v2830_v16 = vcombine.low %v4006_v57, %v1359_v31  ;;  %v2825_v10 = vrot.slane %v1316_v23, 9  ;;  %v1608_v47 = vld [vmem:[#allocation2 + $0x28] sm:$0xf] }
  0xff   : > { %3068 = vmatpush3.bf16.msra.mxu0 %v3949_v50  ;;  %v2207_v50 = vshll.u32 %v4019_v21, 16  ;;  %v2218_v3 = vor.u32 %v2217_v39, %v2214_v55  ;;  %v2221_v45 = vshll.u32 %v4026_v15, 16  ;;  %v2154_v36 = vsel %vm3753_vm6, %v2149_v17, %v2153_v13  ;;  %v4054_v14 = vld [vmem:[#allocation2 + $0x4c] sm:$0x1]  ;;  %v1610_v22 = vld [vmem:[#allocation2 + $0x30] sm:$0xf] }
 0x100   : > { %3162 = vmatprep.subr.msk.bf16.mxu0 %vm1135_vm9, %v4011_v30  ;;  %v1363_v49 = vsel %vm3813_vm8, %v2824_v24, %v1362_v53  ;;  %v2179_v60 = vshll.u32 %v4030_v41, 16  ;;  %v2204_v20 = vor.u32 %v2203_v28, %v2200_v38  ;;  %v2891_v56 = vcombine.low %v2154_v36, %v2168_v40  ;;  %v4056_v24 = vld [vmem:[#allocation2 + $0x44] sm:$0x1]  ;;  %v3223_v28 = vld [vmem:[#allocation2 + $0x8] ss:$8 sps:$4 sm:$0xff]  }
 0x101   : > { %v1367_v57 = vsel %vm3813_vm8, %v2825_v10, %v1366_v25  ;;  %v2176_v62 = vor.u32 %v2175_v11, %v2172_v33  ;;  %v2195_v52 = vrot.slane %v2193_v37, 5  ;;  %v2191_v32 = vrot.slane %v2190_v2, 4  ;;  %v2362_v37 = vld [vmem:[#allocation2 + $0x18] sm:$0xe] }
 0x102   : > { %v2209_v18 = vrot.slane %v2207_v50, 5  ;;  %v2228_v0 = vrot.slane %v2226_v42, 4  ;;  %v2231_v31 = vrot.slane %v2229_v61, 5  ;;  %v2219_v7 = vrot.slane %v2218_v3, 4  ;;  %v2361_v61 = vld [vmem:[#allocation2 + $0x10] sm:$0xe] }
 0x103   : > { %v2223_v8 = vrot.slane %v2221_v45, 5  ;;  %v2205_v13 = vrot.slane %v2204_v20, 4  ;;  %v2831_v19 = vcombine.low %v1363_v49, %v1367_v57  ;;  %v2177_v23 = vrot.slane %v2176_v62, 4 }
 0x104   : > { %v2246_v9 = vor.u32 %v3964_v54, %v3958_v1  ;;  %v2249_v59 = vshll.u32 %v4054_v14, 16  ;;  %v2196_v27 = vsel %vm3753_vm6, %v2191_v32, %v2195_v52  ;;  %v2232_v53 = vor.u32 %v2231_v31, %v2228_v0  ;;  %v3225_v52 = vld [vmem:[#allocation2 + $0x18] ss:$8 sps:$4 sm:$0xff]   ;;  %v3226_v0 = vld [vmem:[#allocation2 + $0x28] ss:$8 sps:$4 sm:$0xff]  }
 0x105   : > { %3020 = vmatmul.mubr.msk.bf16.vlgmr.msra.gmra.mrb[0].mxu1 %vm1122_vm7, %v2829_v58  ;;  %3064 = vmatmul.mubr.msk.bf16.gmra.mrb[4].mxu0 %vm1122_vm7, %v3222_v51  ;;  %v3228_v58 = vld [vmem:[%s4181_s3 + $0x20] sm:$0x3f]   ;;  %v2210_v12 = vsel %vm3753_vm6, %v2205_v13, %v2209_v18  ;;  %v1673_v25 = vshrl.u32 %v1608_v47, 16  ;;  %v2224_v55 = vsel %vm3753_vm6, %v2219_v7, %v2223_v8  ;;  %v1676_v63 = vshll.u32 %v1608_v47, 16  ;;  %v2365_v13 = vld [vmem:[#allocation2 + $0x30] sm:$0xe] }
 0x106   : > { %3028 = vmatpush3.bf16.msra.mxu1 %v3953_v29  ;;  %3023 = vmatprep.mubr.msk.bf16.mxu1 %vm1122_vm7, %v2830_v16  ;;  %v2181_v29 = vrot.slane %v2179_v60, 5  ;;  %v1687_v17 = vshrl.u32 %v1610_v22, 16  ;;  %v1690_v38 = vshll.u32 %v1610_v22, 16  ;;  %v2235_v54 = vshll.u32 %v4056_v24, 16 }
 0x107   : > { %3158 = vmatprep.subr.msk.bf16.mxu1 %vm1135_vm9, %v3228_v58  ;;  %3069 = vmatprep.mubr.msk.bf16.mxu0 %vm1122_vm7, %v2891_v56  ;;  %v2450_v40 = vsel %vm1135_vm9, %v4011_v30, 0  ;;  %v2247_v33 = vrot.slane %v2246_v9, 4  ;;  %v2251_v11 = vrot.slane %v2249_v59, 5  ;;  %v2893_v2 = vcombine.low %v2210_v12, %v2224_v55  ;;  %v2363_v12 = vld [vmem:[#allocation2 + $0x20] sm:$0xe] }
 0x108   : > { %v2182_v1 = vsel %vm3753_vm6, %v2177_v23, %v2181_v29  ;;  %v2233_v50 = vrot.slane %v2232_v53, 4  ;;  %v2391_v42 = vrot.slane %v3981_v44, 5  ;;  %v1675_v16 = vrot.slane %v1673_v25, 4  ;;  %v1614_v44 = vld [vmem:[#allocation2 + $0x40] sm:$0xf] }
 0x109   : > { %v2892_v39 = vcombine.low %v2182_v1, %v2196_v27  ;;  %v1678_v10 = vrot.slane %v1676_v63, 5  ;;  %v1689_v3 = vrot.slane %v1687_v17, 4  ;;  %v1692_v45 = vrot.slane %v1690_v38, 5  ;;  %v2364_v29 = vld [vmem:[#allocation2 + $0x28] sm:$0xe] }
 0x10a   : > { %v2237_v30 = vrot.slane %v2235_v54, 5  ;;  %v2387_v36 = vrot.slane %v3979_v46, 5  ;;  %v2901_v49 = vrot.slane %v2362_v37, 9  ;;  %v2252_v60 = vsel %vm3753_vm6, %v2247_v33, %v2251_v11  ;;  %v1612_v46 = vld [vmem:[#allocation2 + $0x38] sm:$0xf] }
 0x10b   : > { %v1696_v20 = vshll.u32 %v3899_v5, 16  ;;  %v2900_v56 = vrot.slane %v2361_v61, 9  ;;  %v1682_v62 = vshll.u32 %v3885_v26, 16  ;;  %v1679_v32 = vor.u32 %v1678_v10, %v1675_v16  ;;  %v2367_v37 = vld [vmem:[#allocation2 + $0x40] sm:$0xe] }
 0x10c   : > { %v2238_v51 = vsel %vm3753_vm6, %v2233_v50, %v2237_v30  ;;  %v2392_v57 = vsel %vm3813_vm8, %v2901_v49, %v2391_v42  ;;  %v1693_v18 = vor.u32 %v1692_v45, %v1689_v3  ;;  %v1715_v7 = vshrl.u32 %v1614_v44, 16 }
 0x10d   : > { %3024 = vmatmul.mubr.msk.bf16.gmra.mrb[4].mxu1 %vm1122_vm7, %v2831_v19  ;;  %3070 = vmatmul.mubr.msk.bf16.vlgmr.msra.gmra.mrb[0].mxu0 %vm1122_vm7, %v2892_v39  ;;  %v2388_v31 = vsel %vm3813_vm8, %v2900_v56, %v2387_v36  ;;  %v1718_v5 = vshll.u32 %v1614_v44, 16  ;;  %v2894_v8 = vcombine.low %v2238_v51, %v2252_v60  ;;  %v1698_v47 = vrot.slane %v1696_v20, 5  ;;  %v2366_v19 = vld [vmem:[#allocation2 + $0x38] sm:$0xe]  ;;  %v2368_v39 = vld [vmem:[#allocation2 + $0x48] sm:$0xe] }
 0x10e   : > { %3029 = vmatprep.mubr.msk.bf16.mxu1 %vm1122_vm7, %v3223_v28  ;;  %3073 = vmatprep.mubr.msk.bf16.mxu0 %vm1122_vm7, %v2893_v2  ;;  %v2910_v58 = vcombine.low %v2388_v31, %v2392_v57  ;;  %v1684_v26 = vrot.slane %v1682_v62, 5  ;;  %v2399_v22 = vrot.slane %v4016_v43, 5  ;;  %v1701_v23 = vshrl.u32 %v1612_v46, 16 }
 0x10f   : > { %3078 = vmatpush3.bf16.msra.mxu0 %v2450_v40  ;;  %v1704_v9 = vshll.u32 %v1612_v46, 16  ;;  %v1680_v59 = vrot.slane %v1679_v32, 4  ;;  %v1694_v27 = vrot.slane %v1693_v18, 4  ;;  %v2403_v53 = vrot.slane %v4019_v21, 5 }
 0x110   : > { %v2407_v25 = vrot.slane %v4026_v15, 5  ;;  %v2903_v55 = vrot.slane %v2364_v29, 9  ;;  %v1717_v63 = vrot.slane %v1715_v7, 4  ;;  %v1720_v17 = vrot.slane %v1718_v5, 5  ;;  %v3227_v15 = vld [vmem:[#allocation2 + $0x38] ss:$8 sps:$4 sm:$0xff]  }
 0x111   : > { %v1699_v43 = vsel %vm3753_vm6, %v1694_v27, %v1698_v47  ;;  %v2904_v38 = vrot.slane %v2365_v13, 9  ;;  %v2905_v28 = vrot.slane %v2366_v19, 9  ;;  %v2902_v1 = vrot.slane %v2363_v12, 9 }
 0x112   : > { %v2400_v54 = vsel %vm3813_vm8, %v2903_v55, %v2399_v22  ;;  %v1703_v21 = vrot.slane %v1701_v23, 4  ;;  %v1706_v40 = vrot.slane %v1704_v9, 5  ;;  %v1685_v33 = vsel %vm3753_vm6, %v1680_v59, %v1684_v26 }
 0x113   : > { %v2408_v11 = vsel %vm3813_vm8, %v2905_v28, %v2407_v25  ;;  %v2852_v2 = vcombine.low %v1685_v33, %v1699_v43  ;;  %v2415_v42 = vrot.slane %v4054_v14, 5  ;;  %v1721_v61 = vor.u32 %v1720_v17, %v1717_v63 }
 0x114   : > { %v1710_v16 = vshll.u32 %v3941_v48, 16  ;;  %v1724_v10 = vshll.u32 %v3960_v34, 16  ;;  %v2907_v45 = vrot.slane %v2368_v39, 9  ;;  %v2906_v36 = vrot.slane %v2367_v37, 9 }
 0x115   : > { %3030 = vmatmul.mubr.msk.bf16.vlgmr.msra.gmra.mrb[0].mxu1 %vm1122_vm7, %v3225_v52  ;;  %3074 = vmatmul.mubr.msk.bf16.gmra.mrb[4].mxu0 %vm1122_vm7, %v2894_v8  ;;  %v2411_v49 = vrot.slane %v4056_v24, 5  ;;  %v1707_v60 = vor.u32 %v1706_v40, %v1703_v21  ;;  %v1722_v14 = vrot.slane %v1721_v61, 4  ;;  %vm2533_vm9 = vcmask 60416  }
 0x116   : > { %3088 = vmatpush3.bf16.msra.mxu1 %v3608_v35  ;;  %3033 = vmatprep.mubr.msk.bf16.mxu1 %vm1122_vm7, %v3226_v0  ;;  %v2395_v35 = vrot.slane %v4030_v41, 5  ;;  %v2404_v41 = vsel %vm3813_vm8, %v2904_v38, %v2403_v53  ;;  %v2416_v48 = vsel %vm3813_vm8, %v2907_v45, %v2415_v42  ;;  %v1712_v34 = vrot.slane %v1710_v16, 5 }
 0x117   : > { %3079 = vmatprep.mubr.msk.bf16.mxu0 %vm1122_vm7, %v2910_v58  ;;  %v2912_v30 = vcombine.low %v2404_v41, %v2408_v11  ;;  %v1726_v20 = vrot.slane %v1724_v10, 5  ;;  %v2412_v44 = vsel %vm3813_vm8, %v2906_v36, %v2411_v49  ;;  %v1708_v51 = vrot.slane %v1707_v60, 4 }
 0x118   : > { %v2396_v50 = vsel %vm3813_vm8, %v2902_v1, %v2395_v35  ;;  %v2913_v57 = vcombine.low %v2412_v44, %v2416_v48  ;;  %vm2566_vm11 = vcmask 57344  }
 0x119   : > { %v2911_v3 = vcombine.low %v2396_v50, %v2400_v54  ;;  %v1727_v56 = vsel %vm3753_vm6, %v1722_v14, %v1726_v20  ;;  %v1713_v24 = vsel %vm3753_vm6, %v1708_v51, %v1712_v34 }
 0x11a   : > { %v2853_v62 = vcombine.low %v1713_v24, %v1727_v56 }
 0x11d   : > { %3034 = vmatmul.mubr.msk.bf16.gmra.mrb[4].mxu1 %vm1122_vm7, %v3227_v15  ;;  %3080 = vmatmul.mubr.msk.bf16.vlgmr.msra.gmra.mrb[0].mxu0 %vm1122_vm7, %v2911_v3 }
 0x11e   : > { %3043 = vmatprep.mubr.msk.bf16.mxu1 %vm1122_vm7, %v2852_v2  ;;  %3083 = vmatprep.mubr.msk.bf16.mxu0 %vm1122_vm7, %v2912_v30 }
 0x125   : > { %3084 = vmatmul.mubr.msk.bf16.gmra.mrb[4].mxu0 %vm1122_vm7, %v2913_v57 }
 0x129   : > { %3044 = vmatmul.mubr.msk.bf16.vlgmr.msra.gmra.mrb[4].mxu1 %vm1122_vm7, %v2853_v62 }
 0x1e8   : > { %v3031_v52 = vpop.f32.mrb[0].mxu1 }
 0x1e9   : > { %v1561_v32 = vpop.f32.mrb[1].mxu1 }
 0x1ea   : > { %v3032_v18 = vpop.f32.mrb[2].mxu1 }
 0x1eb   : > { %v1564_v46 = vpop.f32.mrb[3].mxu1 }
 0x1f0   : > { %v3081_v6 = vpop.f32.mrb[0].mxu0 }
 0x1f1   : > { %v3089_v0 = vadd.f32 %v3081_v6, %v3031_v52  ;;  %v2486_v31 = vpop.f32.mrb[1].mxu0 }
 0x1f2   : > { %v3090_v7 = vadd.f32 %v2486_v31, %v1561_v32  ;;  %v3082_v5 = vpop.f32.mrb[2].mxu0 }
 0x1f3   : > { %v2527_v4 = vpack.c.bf16 %v3089_v0, %v3089_v0  ;;  %v3091_v8 = vadd.f32 %v3082_v5, %v3032_v18  ;;  %v2489_v58 = vpop.f32.mrb[3].mxu0  ;;  %v2571_v26 = vmul.f32 %v3089_v0, %v3089_v0  ;;  %v2547_v12 = vsel %vm2543_vm10, %v3089_v0, 0.0 }
 0x1f4   : > { %v2525_v47 = vpack.c.bf16 %v3090_v7, %v3090_v7  ;;  %v2569_v29 = vmul.f32 %v3090_v7, %v3090_v7  ;;  %v3092_v13 = vadd.f32 %v2489_v58, %v1564_v46  ;;  %v2544_v19 = vsel %vm2543_vm10, %v3090_v7, 0.0 }
 0x1f5   : > { %2536 = vst.msk [vmem:[%s3362_s19 + $0x8] sm:$0xf] %vm2533_vm9, %v2527_v4  ;;  %v2528_v22 = vpack.c.bf16 %v3091_v8, %v3091_v8  ;;  %v2572_v25 = vmul.f32 %v3091_v8, %v3091_v8  ;;  %v2580_v38 = vsel %vm2543_vm10, %v2571_v26, 0.0  ;;  %v2549_v28 = vsel %vm2543_vm10, %v3091_v8, 0.0  ;;  %v2542_v26 = vld [vmem:[%s3352_s12] sm:$0x1] }
 0x1f6   : > { %2534 = vst.msk [vmem:[%s3362_s19] sm:$0xf] %vm2533_vm9, %v2525_v47  ;;  %v2526_v23 = vpack.c.bf16 %v3092_v13, %v3092_v13  ;;  %v2545_v9 = vsel %vm2543_vm10, %v3092_v13, 0.0  ;;  %v2570_v59 = vmul.f32 %v3092_v13, %v3092_v13  ;;  %v2577_v53 = vsel %vm2543_vm10, %v2569_v29, 0.0 }
 0x1f7   : > { %2537 = vst.msk [vmem:[%s3362_s19 + $0xc] sm:$0xf] %vm2533_vm9, %v2528_v22  ;;  %v2546_v27 = vadd.f32 %v2545_v9, %v2544_v19  ;;  %v2582_v41 = vsel %vm2543_vm10, %v2572_v25, 0.0 }
 0x1f8   : > { %2535 = vst.msk [vmem:[%s3362_s19 + $0x4] sm:$0xf] %vm2533_vm9, %v2526_v23  ;;  %v2578_v35 = vsel %vm2543_vm10, %v2570_v59, 0.0  ;;  %v3085_v55 = vpop.f32.mrb[4].mxu0  ;;  %v2568_v23 = vld [vmem:[%s3357_s16] sm:$0x1] }
 0x1f9   : > { %v2548_v63 = vadd.f32 %v2547_v12, %v2546_v27  ;;  %v2579_v17 = vadd.f32 %v2578_v35, %v2577_v53  ;;  %v2502_v43 = vpop.f32.mrb[5].mxu0 }
 0x1fa   : > { %v3086_v54 = vpop.f32.mrb[6].mxu0 }
 0x1fb   : > { %v2581_v39 = vadd.f32 %v2580_v38, %v2579_v17  ;;  %v2550_v15 = vadd.f32 %v2549_v28, %v2548_v63  ;;  %v2505_v33 = vpop.f32.mrb[7].mxu0 }
 0x1fc   : > { %v3045_v1 = vpop.f32.mrb[4].mxu1 }
 0x1fd   : > { %v3093_v21 = vadd.f32 %v3085_v55, %v3045_v1  ;;  %v1813_v40 = vpop.f32.mrb[5].mxu1  ;;  %v2583_v50 = vadd.f32 %v2582_v41, %v2581_v39 }
 0x1fe   : > { %v3094_v11 = vadd.f32 %v2502_v43, %v1813_v40  ;;  %v3046_v37 = vpop.f32.mrb[6].mxu1 }
 0x1ff   : > { %v2531_v2 = vpack.c.bf16 %v3093_v21, %v3093_v21  ;;  %v1816_v42 = vpop.f32.mrb[7].mxu1  ;;  %v3095_v3 = vadd.f32 %v3086_v54, %v3046_v37  ;;  %v2575_v36 = vmul.f32 %v3093_v21, %v3093_v21  ;;  %v2555_v51 = vsel %vm2543_vm10, %v3093_v21, 0.0 }
 0x200   : > { %v2529_v61 = vpack.c.bf16 %v3094_v11, %v3094_v11  ;;  %v2551_v16 = vsel %vm2543_vm10, %v3094_v11, 0.0  ;;  %v2573_v10 = vmul.f32 %v3094_v11, %v3094_v11  ;;  %v3096_v30 = vadd.f32 %v2505_v33, %v1816_v42 }
 0x201   : > { %2540 = vst.msk [vmem:[%s3362_s19 + $0x18] sm:$0xf] %vm2533_vm9, %v2531_v2  ;;  %v2552_v45 = vadd.f32 %v2551_v16, %v2550_v15  ;;  %v2532_v60 = vpack.c.bf16 %v3095_v3, %v3095_v3  ;;  %v2576_v56 = vmul.f32 %v3095_v3, %v3095_v3  ;;  %v2588_v52 = vsel %vm2543_vm10, %v2575_v36, 0.0 }
 0x202   : > { %2538 = vst.msk [vmem:[%s3362_s19 + $0x10] sm:$0xf] %vm2533_vm9, %v2529_v61  ;;  %v2584_v49 = vsel %vm2543_vm10, %v2573_v10, 0.0  ;;  %v2530_v48 = vpack.c.bf16 %v3096_v30, %v3096_v30  ;;  %v2553_v34 = vsel %vm2543_vm10, %v3096_v30, 0.0  ;;  %v2574_v20 = vmul.f32 %v3096_v30, %v3096_v30 }
 0x203   : > { %v2585_v14 = vadd.f32 %v2584_v49, %v2583_v50  ;;  %2541 = vst.msk [vmem:[%s3362_s19 + $0x1c] sm:$0xf] %vm2533_vm9, %v2532_v60  ;;  %v2554_v44 = vadd.f32 %v2553_v34, %v2552_v45  ;;  %v2557_v32 = vsel %vm2543_vm10, %v3095_v3, 0.0  ;;  %v2590_v6 = vsel %vm2543_vm10, %v2576_v56, 0.0 }
 0x204   : > { %2539 = vst.msk [vmem:[%s3362_s19 + $0x14] sm:$0xf] %vm2533_vm9, %v2530_v48  ;;  %v2586_v57 = vsel %vm2543_vm10, %v2574_v20, 0.0 }
 0x205   : > { %v2556_v24 = vadd.f32 %v2555_v51, %v2554_v44  ;;  %v2587_v62 = vadd.f32 %v2586_v57, %v2585_v14 }
 0x207   : > { %v2558_v18 = vadd.f32 %v2557_v32, %v2556_v24  ;;  %v2589_v46 = vadd.f32 %v2588_v52, %v2587_v62 }
 0x209   : > { %v2559_v0 = vrot.slane %v2558_v18, 4  ;;  %v2591_v31 = vadd.f32 %v2590_v6, %v2589_v46 }
 0x20b   : > { %v2560_v7 = vadd.f32 %v2559_v0, %v2558_v18  ;;  %v2592_v5 = vrot.slane %v2591_v31, 4 }
 0x20d   : > { %v2561_v4 = vrot.slane %v2560_v7, 2  ;;  %v2593_v8 = vadd.f32 %v2592_v5, %v2591_v31 }
 0x20f   : > { %v2562_v58 = vadd.f32 %v2561_v4, %v2560_v7  ;;  %v2594_v47 = vrot.slane %v2593_v8, 2 }
 0x211   : > { %v2563_v29 = vrot.slane %v2562_v58, 1  ;;  %v2595_v13 = vadd.f32 %v2594_v47, %v2593_v8 }
 0x213   : > { %v2564_v22 = vadd.f32 %v2563_v29, %v2562_v58  ;;  %v2596_v19 = vrot.slane %v2595_v13, 1 }
 0x215   : > { %v2565_v9 = vadd.f32 %v2564_v22, %v2542_v26  ;;  %v2597_v59 = vadd.f32 %v2596_v19, %v2595_v13 }
 0x217   : > { %2567 = vst.msk [vmem:[%s3352_s12] sm:$0x1] %vm2566_vm11, %v2565_v9  ;;  %v2598_v27 = vadd.f32 %v2597_v59, %v2568_v23 }
 0x219   : > { %2599 = vst.msk [vmem:[%s3357_s16] sm:$0x1] %vm2566_vm11, %v2598_v27 }
 0x21a PF: > { %s17_s23 = sadd.s32 1, %s3267_s23   ;;  %s4203_s21 = smov %s3259_s1 }
 0x21b   : > { %p14_p8 = scmp.ge.s32.totalorder %s17_s23, 10   ;;  %s4204_s0 = smov %s3263_s22 }
 0x21c   : > { %s4205_s1 = smov %s4208_s24  ;;  %s4206_s22 = smov %s4212_s25 }
 0x21d   :  { %16 = sbr.rel (!%p14_p8) target bundleno = 3 (0x3), region = 107 }

// kernel: down_forward.4
= control target key start
LH: loop header
LB: loop body
LE: loop exit
PB: predicated region body
PF: predicated region fallthrough
CT: control target
= control target key end

     0   :  { %s3610_s21 = smov 0   ;;  %s3612_s22 = smov 0   ;;  %s4628_s0 = inlined_call_operand.vmem [shape: f32[1,1,8], index: 0, kind: input, shape index: {}]   ;;  %s4629_s1 = inlined_call_operand.vmem [shape: f32[1,1,8], index: 1, kind: input, shape index: {}]   ;;  %s4630_s2 = inlined_call_operand.vmem [shape: bf16[2,4,8,8,8], index: 2, kind: input, shape index: {}]   ;;  %s4631_s3 = inlined_call_operand.vmem [shape: bf16[9,24,8], index: 3, kind: input, shape index: {}]   ;;  %s4632_s4 = inlined_call_operand.vmem [shape: f32[2,4,8,8,8], index: 4, kind: output, shape index: {0}]   ;;  %s4633_s5 = inlined_call_operand.vmem [shape: f32[2,1,8], index: 5, kind: output, shape index: {1}]   ;;  %s4634_s6 = inlined_call_operand.vmem [shape: f32[2,1,8], index: 6, kind: output, shape index: {2}]  }
   0x1   :  { %s3614_s23 = smov 0   ;;  %s3616_s24 = smov 0  }
   0x2   :  { %s3618_s25 = smov 0  }
   0x3 LB: > { %s26_s26 = sadd.s32 1, %s3561_s23  ;;  %s29_s27 = sadd.s32 1, %s3565_s24  ;;  %s3569_s25 = sphi %s3618_s25, %s17_s25   ;;  %s3565_s24 = sphi %s3616_s24, %s4658_s24   ;;  %s3561_s23 = sphi %s3614_s23, %s4657_s23   ;;  %s3557_s22 = sphi %s3612_s22, %s4656_s22   ;;  %s3553_s21 = sphi %s3610_s21, %s4655_s21  }
   0x4   : > { %p27_p0 = scmp.ge.s32.totalorder %s26_s26, 4  ;;  %p2923_p1 = scmp.ge.s32.totalorder %s3569_s25, 1 }
   0x5   : > { %p231_p2 = scmp.lt.s32.totalorder %s3569_s25, 9 }
   0x6   : > { %s4660_s26 = smov (%p27_p0, %s26_s26), 0  ;;  %s4662_s27 = smov (!%p27_p0, %s29_s27), %s3565_s24 }
   0x7   : > { %p232_p3 = pnand %p2923_p1, %p231_p2  ;;  %p31_p4 = scmp.ge.s32.totalorder %s4662_s27, 2 }
   0x8   : > { %p271_p5 = scmp.lt.s32.totalorder (!%p232_p3), %s3557_s22, 1  ;;  %p278_p6 = scmp.lt.s32.totalorder (!%p232_p3), %s3553_s21, 3 }
   0x9   : > { %s4664_s27 = smov (%p31_p4, %s4662_s27), 0  ;;  %235 = sbr.rel (%p232_p3) target bundleno = 547 (0x223), region = 36 }
   0xa   : > { %4635 = sst [smem:[#allocation3_spill]] %s4664_s27  ;;  %p2929_p7 = scmp.ne.s32.totalorder (!%p232_p3), %s3553_s21, 0 }
  0x10   : > { %s4666_s22 = smov (!%p271_p5, %s3557_s22), 1  ;;  %295 = sbr.rel (%p2929_p7) target bundleno = 30 (0x1e), region = 40 }
  0x11   : > { %s279_s28 = scalar_select %p278_p6, %s3553_s21, 3 }
  0x12   : > { %s3124_s29 = sshll.u32 %s4666_s22, 7  ;;  %s2927_s30 = sshll.u32 %s4666_s22, 5  ;;  %vm296_vm0 = vcmask (!%p2929_p7), 191488   ;;  %vm298_vm1 = vcmask (!%p2929_p7), 188416   ;;  %vm318_vm2 = vcmask (!%p2929_p7), 57344   ;;  %v3571_v0 = vmov (!%p2929_p7), 0  }
  0x13   : > { %s3649_s9 = scalar_lea.vmem %s4630_s2, %s3124_s29  ;;  %s2926_s10 = sshll.u32 %s279_s28, 3  ;;  %297 = vst.msk [vmem:[#allocation2] sm:$0xf] (!%p2929_p7), %vm296_vm0, %v3571_v0  ;;  %300 = vst.msk [vmem:[#allocation2 + $0x8] sm:$0xf] (!%p2929_p7), %vm296_vm0, %v3571_v0  ;;  %v3572_v1 = vmov (!%p2929_p7), 0.0  }
  0x14   : > { %s282_s11 = sadd.s32 %s2927_s30, %s2926_s10  ;;  %s3654_s14 = scalar_lea.vmem %s4633_s5, %s4666_s22  ;;  %302 = vst.msk [vmem:[#allocation2 + $0x10] sm:$0xf] (!%p2929_p7), %vm296_vm0, %v3571_v0  ;;  %304 = vst.msk [vmem:[#allocation2 + $0x18] sm:$0xf] (!%p2929_p7), %vm296_vm0, %v3571_v0 }
  0x15   : > { %s2928_s15 = sshll.u32 %s282_s11, 3  ;;  %s3659_s18 = scalar_lea.vmem %s4634_s6, %s4666_s22  ;;  %306 = vst.msk [vmem:[#allocation2 + $0x20] sm:$0xf] (!%p2929_p7), %vm296_vm0, %v3571_v0  ;;  %308 = vst.msk [vmem:[#allocation2 + $0x28] sm:$0xf] (!%p2929_p7), %vm296_vm0, %v3571_v0 }
  0x16   : > { %s3664_s27 = scalar_lea.vmem %s4632_s4, %s2928_s15  ;;  %310 = vst.msk [vmem:[#allocation2 + $0x30] sm:$0xf] (!%p2929_p7), %vm296_vm0, %v3571_v0  ;;  %312 = vst.msk [vmem:[#allocation2 + $0x38] sm:$0xf] (!%p2929_p7), %vm296_vm0, %v3571_v0 }
  0x17   : > { %314 = vst.msk [vmem:[#allocation2 + $0x40] sm:$0xf] %vm296_vm0, %v3571_v0  ;;  %316 = vst.msk [vmem:[#allocation2 + $0x48] sm:$0xf] %vm296_vm0, %v3571_v0 }
  0x18   : > { %299 = vst.msk [vmem:[#allocation2 + $0x4] sm:$0x1] %vm298_vm1, %v3571_v0  ;;  %301 = vst.msk [vmem:[#allocation2 + $0xc] sm:$0x1] %vm298_vm1, %v3571_v0 }
  0x19   : > { %303 = vst.msk [vmem:[#allocation2 + $0x14] sm:$0x1] %vm298_vm1, %v3571_v0  ;;  %305 = vst.msk [vmem:[#allocation2 + $0x1c] sm:$0x1] %vm298_vm1, %v3571_v0 }
  0x1a   : > { %307 = vst.msk [vmem:[#allocation2 + $0x24] sm:$0x1] %vm298_vm1, %v3571_v0  ;;  %309 = vst.msk [vmem:[#allocation2 + $0x2c] sm:$0x1] %vm298_vm1, %v3571_v0 }
  0x1b   : > { %311 = vst.msk [vmem:[#allocation2 + $0x34] sm:$0x1] %vm298_vm1, %v3571_v0  ;;  %313 = vst.msk [vmem:[#allocation2 + $0x3c] sm:$0x1] %vm298_vm1, %v3571_v0 }
  0x1c   : > { %315 = vst.msk [vmem:[#allocation2 + $0x44] sm:$0x1] %vm298_vm1, %v3571_v0  ;;  %317 = vst.msk [vmem:[#allocation2 + $0x4c] sm:$0x1] %vm298_vm1, %v3571_v0 }
  0x1d   : > { %319 = vst.msk [vmem:[%s3654_s14] sm:$0x1] %vm318_vm2, %v3572_v1  ;;  %320 = vst.msk [vmem:[%s3659_s18] sm:$0x1] %vm318_vm2, %v3572_v1 }
  0x1e PF: > { %p565_p8 = scmp.gt.s32.totalorder %s3553_s21, 0  ;;  %p569_p9 = scmp.ge.s32.totalorder %s3553_s21, 0  ;;  %v3693_v2 = vld [vmem:[%s4628_s0] ss:$0 sm:$0xff]  ;;  %vm511_vm3 = vcmask 60416   ;;  %vm517_vm5 = vcmask 57344  }
  0x1f   : > { %p570_p10 = scmp.lt.s32.totalorder %s3553_s21, 4  ;;  %s3686_s28 = sadd.s32 1, %s3553_s21  ;;  %v3702_v10 = vld [vmem:[%s4629_s1] ss:$0 sm:$0xff]  ;;  %vm512_vm4 = vsmask.f32 7938 }
  0x20   : > { %s566_s22 = scalar_select %p565_p8, %s3553_s21, 0  ;;  %vm518_vm6 = vsmask.f32 256  ;;  %vm3936_vm7 = vmand %vm511_vm3, %vm512_vm4  ;;  %vm1282_vm9 = vcmask 1043456   ;;  %vm785_vm10 = vcmask 126016   ;;  %vm790_vm12 = vcmask 122944  }
  0x21   : > { %p571_p11 = pnand %p570_p10, %p569_p9  ;;  %p838_p12 = scmp.gt.s32.totalorder %s3686_s28, 0  ;;  %vm3947_vm8 = vmand %vm517_vm5, %vm518_vm6  ;;  %vm1058_vm14 = vcmask 191616   ;;  %vm1063_vm0 = vcmask 188544   ;;  %vm1129_vm1 = vsmask.f32 3328 }
  0x22   : > { %s4668_s22 = smov (!%p278_p6, %s566_s22), 3  ;;  %p2966_p13 = scmp.lt.s32.totalorder %s3686_s28, 3  ;;  %vm4052_vm11 = vmand %vm785_vm10, %vm512_vm4  ;;  %vm1130_vm2 = vsmask.f32 7440 }
  0x23   : > { %s2953_s29 = scalar_select %p571_p11, 0, 1  ;;  %vm4065_vm13 = vmand %vm790_vm12, %vm518_vm6 }
  0x24   : > { %s3138_s30 = sshll.u32 %s4668_s22, 5  ;;  %p842_p0 = scmp.ge.s32.totalorder %s3686_s28, 0  ;;  %vm4090_vm15 = vmand %vm1058_vm14, %vm512_vm4  ;;  %vm1484_vm4 = vcmask 1042432  }
  0x25   : > { %s577_s10 = scalar_lea.vmem %s3649_s9, %s3138_s30  ;;  %s574_s12 = scvt.s32.f32 %s2953_s29  ;;  %vm4116_vm3 = vmand %vm1063_vm0, %vm518_vm6  ;;  %vm1485_vm6 = vcmask 1046532  }
  0x26   : > { %v3209_v3 = vld [vmem:[%s577_s10 + $0x8] sm:$0xff]   ;;  %v3175_v4 = vld [vmem:[%s577_s10] sm:$0xff]   ;;  %v3210_v5 = vld [vmem:[%s577_s10 + $0x10] sm:$0xff]   ;;  %s839_s11 = scalar_select %p838_p12, %s3686_s28, 0 }
  0x27   : > { %v3180_v6 = vunpack.c.l.bf16 %v3209_v3  ;;  %v3181_v7 = vunpack.c.h.bf16 %v3209_v3  ;;  %v3176_v8 = vunpack.c.l.bf16 %v3175_v4  ;;  %v3211_v9 = vld [vmem:[%s577_s10 + $0x18] sm:$0xff]   ;;  %v3177_v11 = vunpack.c.h.bf16 %v3175_v4  ;;  %p843_p1 = scmp.lt.s32.totalorder %s3686_s28, 4  ;;  %s3749_s22 = sadd.s32 4294967295, %s3553_s21  ;;  %vm4226_vm10 = vmor %vm1484_vm4, %vm1485_vm6 }
  0x28   : > { %v3185_v12 = vunpack.c.h.bf16 %v3210_v5  ;;  %v3184_v13 = vunpack.c.l.bf16 %v3210_v5  ;;  %v3188_v14 = vunpack.c.l.bf16 %v3211_v9  ;;  %s4670_s11 = smov (!%p2966_p13, %s839_s11), 3  ;;  %v3713_v23 = vstv %s574_s12  ;;  %p322_p3 = scmp.gt.s32.totalorder %s3749_s22, 0 }
  0x29   : > { %v603_v15 = vmul.f32 %v3180_v6, %v3693_v2  ;;  %v601_v16 = vmul.f32 %v3176_v8, %v3693_v2  ;;  %v604_v17 = vmul.f32 %v3181_v7, %v3693_v2  ;;  %v602_v18 = vmul.f32 %v3177_v11, %v3693_v2  ;;  %s3149_s16 = sshll.u32 %s4670_s11, 5  ;;  %p3732_p2 = pnand %p843_p1, %p842_p0 }
  0x2a   : > { %v606_v19 = vmul.f32 %v3185_v12, %v3693_v2  ;;  %v605_v20 = vmul.f32 %v3184_v13, %v3693_v2  ;;  %v607_v21 = vmul.f32 %v3188_v14, %v3693_v2  ;;  %s3723_s17 = scalar_lea.vmem %s3649_s9, %s3149_s16  ;;  %v3189_v33 = vunpack.c.h.bf16 %v3211_v9  ;;  %s3573_s21 = smov 8  }
  0x2b   : > { %v618_v22 = vadd.f32 %v3702_v10, %v603_v15  ;;  %v616_v24 = vadd.f32 %v3702_v10, %v601_v16  ;;  %v619_v25 = vadd.f32 %v3702_v10, %v604_v17  ;;  %v617_v26 = vadd.f32 %v3702_v10, %v602_v18  ;;  %v3191_v41 = vld [vmem:[%s3723_s17] sm:$0xff]   ;;  %s2971_s20 = scalar_select %p3732_p2, 0, 1  ;;  %v3212_v6 = vld [vmem:[%s3723_s17 + $0x8] sm:$0xff]  }
  0x2c   : > { %v621_v27 = vadd.f32 %v3702_v10, %v606_v19  ;;  %v620_v28 = vadd.f32 %v3702_v10, %v605_v20  ;;  %v622_v29 = vadd.f32 %v3702_v10, %v607_v21  ;;  %v3192_v50 = vunpack.c.l.bf16 %v3191_v41  ;;  %p2930_p4 = scmp.lt.s32.totalorder %s3749_s22, 3  ;;  %v3213_v19 = vld [vmem:[%s3723_s17 + $0x10] sm:$0xff]   ;;  %p326_p5 = scmp.ge.s32.totalorder %s3749_s22, 0 }
  0x2d   : > { %v626_v30 = vmax.f32 %v618_v22, 0.0  ;;  %v624_v31 = vmax.f32 %v616_v24, 0.0  ;;  %v627_v32 = vmax.f32 %v619_v25, 0.0  ;;  %v625_v34 = vmax.f32 %v617_v26, 0.0  ;;  %s847_s28 = scvt.s32.f32 %s2971_s20  ;;  %p327_p6 = scmp.lt.s32.totalorder %s3749_s22, 4 }
  0x2e   : > { %v629_v35 = vmax.f32 %v621_v27, 0.0  ;;  %v628_v36 = vmax.f32 %v620_v28, 0.0  ;;  %v630_v37 = vmax.f32 %v622_v29, 0.0  ;;  %v608_v51 = vmul.f32 %v3189_v33, %v3693_v2  ;;  %s323_s29 = scalar_select %p322_p3, %s3749_s22, 0  ;;  %v3783_v29 = vld [vmem:[%s3723_s17 + $0x18] sm:$0xff]  }
  0x2f   : > { %v635_v38 = vmul.f32 %v3713_v23, %v626_v30  ;;  %v633_v39 = vmul.f32 %v3713_v23, %v624_v31  ;;  %v636_v40 = vmul.f32 %v3713_v23, %v627_v32  ;;  %v634_v42 = vmul.f32 %v3713_v23, %v625_v34  ;;  %p3831_p7 = pnand %p327_p6, %p326_p5  ;;  %s3574_s11 = smov 16  }
  0x30   : > { %v638_v43 = vmul.f32 %v3713_v23, %v629_v35  ;;  %v637_v44 = vmul.f32 %v3713_v23, %v628_v36  ;;  %v639_v49 = vmul.f32 %v3713_v23, %v630_v37  ;;  %v874_v3 = vmul.f32 %v3192_v50, %v3693_v2  ;;  %s4672_s29 = smov (!%p2930_p4, %s323_s29), 3 }
  0x31   : > { %v3141_v45 = vpack.c.bf16 %v635_v38, %v635_v38  ;;  %v3139_v46 = vpack.c.bf16 %v633_v39, %v633_v39  ;;  %v3142_v47 = vpack.c.bf16 %v636_v40, %v636_v40  ;;  %v3140_v48 = vpack.c.bf16 %v634_v42, %v634_v42  ;;  %s3127_s30 = sshll.u32 %s4672_s29, 5 }
  0x32   : > { %v3744_v58 = vpack.c.bf16 %v638_v43, %v638_v43  ;;  %v3746_v59 = vpack.c.bf16 %v637_v44, %v637_v44  ;;  %v3760_v8 = vpack.c.bf16 %v639_v49, %v639_v49  ;;  %v3763_v9 = vadd.f32 %v3702_v10, %v608_v51  ;;  %s3836_s8 = scalar_lea.vmem %s3649_s9, %s3127_s30 }
  0x33   : > { %v690_v52 = vshrl.u32 %v3141_v45, 16  ;;  %v693_v53 = vshll.u32 %v3141_v45, 16  ;;  %v674_v54 = vshrl.u32 %v3139_v46, 16  ;;  %v677_v55 = vshll.u32 %v3139_v46, 16  ;;  %s2935_s9 = scalar_select %p3831_p7, 0, 1 }
  0x34   : > { %v698_v56 = vshrl.u32 %v3142_v47, 16  ;;  %v682_v57 = vshrl.u32 %v3140_v48, 16  ;;  %v701_v62 = vshll.u32 %v3142_v47, 16  ;;  %v685_v63 = vshll.u32 %v3140_v48, 16 }
  0x35   : > { %v3751_v60 = vrot.slane %v690_v52, 7  ;;  %v676_v61 = vrot.slane %v674_v54, 7  ;;  %v714_v7 = vshrl.u32 %v3744_v58, 16  ;;  %v717_v13 = vshll.u32 %v3744_v58, 16  ;;  %s331_s10 = scvt.s32.f32 %s2935_s9 }
  0x36   : > { %v3753_v0 = vrot.slane %v698_v56, 7  ;;  %v684_v1 = vrot.slane %v682_v57, 7  ;;  %v706_v14 = vshrl.u32 %v3746_v59, 16  ;;  %v709_v15 = vshll.u32 %v3746_v59, 16 }
  0x37   : > { %v695_v4 = vor.u32 %v693_v53, %v3751_v60  ;;  %v679_v5 = vor.u32 %v677_v55, %v676_v61  ;;  %v889_v16 = vadd.f32 %v3702_v10, %v874_v3  ;;  %v3193_v17 = vunpack.c.h.bf16 %v3191_v41 }
  0x38   : > { %v703_v11 = vor.u32 %v701_v62, %v3753_v0  ;;  %v687_v12 = vor.u32 %v685_v63, %v684_v1  ;;  %v3196_v18 = vunpack.c.l.bf16 %v3212_v6  ;;  %v688_v20 = vrot.slane %v684_v1, 4 }
  0x39   : > { %745 = vrot.lane.b32.xlu1 %v695_v4, %s3573_s21  ;;  %737 = vrot.lane.b32.xlu0 %v679_v5, %s3573_s21  ;;  %v680_v21 = vrot.slane %v676_v61, 4  ;;  %v696_v22 = vrot.slane %v3751_v60, 4  ;;  %v3775_v24 = vstv %s847_s28  ;;  %v897_v25 = vmax.f32 %v889_v16, 0.0 }
  0x3a   : > { %v875_v26 = vmul.f32 %v3193_v17, %v3693_v2  ;;  %v876_v27 = vmul.f32 %v3196_v18, %v3693_v2  ;;  %v3197_v28 = vunpack.c.h.bf16 %v3212_v6  ;;  %v704_v30 = vrot.slane %v3753_v0, 4 }
  0x3b   : > { %v3788_v31 = vrot.slane %v714_v7, 7  ;;  %v722_v32 = vshrl.u32 %v3760_v8, 16  ;;  %v3201_v33 = vunpack.c.h.bf16 %v3213_v19  ;;  %v906_v34 = vmul.f32 %v3775_v24, %v897_v25 }
  0x3c   : > { %v890_v35 = vadd.f32 %v3702_v10, %v875_v26  ;;  %v891_v36 = vadd.f32 %v3702_v10, %v876_v27  ;;  %v877_v37 = vmul.f32 %v3197_v28, %v3693_v2  ;;  %v3795_v38 = vrot.slane %v706_v14, 7 }
  0x3d   : > { %749 = vrot.lane.b32.xlu1 %v703_v11, %s3573_s21  ;;  %741 = vrot.lane.b32.xlu0 %v687_v12, %s3573_s21  ;;  %v879_v39 = vmul.f32 %v3201_v33, %v3693_v2  ;;  %v3200_v40 = vunpack.c.l.bf16 %v3213_v19  ;;  %v3204_v41 = vunpack.c.l.bf16 %v3783_v29  ;;  %v3150_v42 = vpack.c.bf16 %v906_v34, %v906_v34 }
  0x3e   : > { %v898_v43 = vmax.f32 %v890_v35, 0.0  ;;  %v899_v44 = vmax.f32 %v891_v36, 0.0  ;;  %v892_v45 = vadd.f32 %v3702_v10, %v877_v37  ;;  %v725_v46 = vshll.u32 %v3760_v8, 16  ;;  %v3159_v35 = vld [vmem:[%s3836_s8] sm:$0xff]  }
  0x3f   : > { %v894_v47 = vadd.f32 %v3702_v10, %v879_v39  ;;  %v878_v48 = vmul.f32 %v3200_v40, %v3693_v2  ;;  %v880_v49 = vmul.f32 %v3204_v41, %v3693_v2  ;;  %v719_v50 = vor.u32 %v717_v13, %v3788_v31 }
  0x40   : > { %v3811_v51 = vrot.slane %v722_v32, 7  ;;  %v907_v52 = vmul.f32 %v3775_v24, %v898_v43  ;;  %v908_v53 = vmul.f32 %v3775_v24, %v899_v44  ;;  %v900_v54 = vmax.f32 %v892_v45, 0.0 }
  0x41   : > { %743 = vrot.lane.b32.xlu1 %v688_v20, %s3573_s21  ;;  %739 = vrot.lane.b32.xlu0 %v680_v21, %s3573_s21  ;;  %v902_v55 = vmax.f32 %v894_v47, 0.0  ;;  %v893_v56 = vadd.f32 %v3702_v10, %v878_v48  ;;  %v895_v57 = vadd.f32 %v3702_v10, %v880_v49  ;;  %v711_v58 = vor.u32 %v709_v15, %v3795_v38  ;;  %v3206_v20 = vld [vmem:[%s3836_s8 + $0x8] sm:$0xff]  }
  0x42   : > { %v947_v59 = vshrl.u32 %v3150_v42, 16  ;;  %v3151_v60 = vpack.c.bf16 %v907_v52, %v907_v52  ;;  %v3152_v61 = vpack.c.bf16 %v908_v53, %v908_v53  ;;  %v909_v62 = vmul.f32 %v3775_v24, %v900_v54 }
  0x43   : > { %v911_v63 = vmul.f32 %v3775_v24, %v902_v55  ;;  %v901_v0 = vmax.f32 %v893_v56, 0.0  ;;  %v903_v1 = vmax.f32 %v895_v57, 0.0  ;;  %v712_v3 = vrot.slane %v3795_v38, 4 }
  0x44   : > { %v727_v4 = vor.u32 %v725_v46, %v3811_v51  ;;  %v955_v5 = vshrl.u32 %v3151_v60, 16  ;;  %v963_v6 = vshrl.u32 %v3152_v61, 16  ;;  %v3153_v7 = vpack.c.bf16 %v909_v62, %v909_v62 }
  0x45   : > { %751 = vrot.lane.b32.xlu1 %v704_v30, %s3573_s21  ;;  %747 = vrot.lane.b32.xlu0 %v696_v22, %s3573_s21  ;;  %v3155_v8 = vpack.c.bf16 %v911_v63, %v911_v63  ;;  %v631_v11 = vmax.f32 %v3763_v9, 0.0  ;;  %v3839_v12 = vrot.slane %v947_v59, 7  ;;  %v950_v13 = vshll.u32 %v3150_v42, 16 }
  0x46   : > { %v910_v14 = vmul.f32 %v3775_v24, %v901_v0  ;;  %v3205_v15 = vunpack.c.h.bf16 %v3783_v29  ;;  %v3845_v16 = vrot.slane %v955_v5, 7  ;;  %v958_v17 = vshll.u32 %v3151_v60, 16 }
  0x47   : > { %v971_v18 = vshrl.u32 %v3153_v7, 16  ;;  %v912_v19 = vmul.f32 %v3775_v24, %v903_v1  ;;  %v3851_v9 = vrot.slane %v963_v6, 7  ;;  %v966_v21 = vshll.u32 %v3152_v61, 16 }
  0x48   : > { %v987_v22 = vshrl.u32 %v3155_v8, 16  ;;  %v3154_v25 = vpack.c.bf16 %v910_v14, %v910_v14  ;;  %v952_v26 = vor.u32 %v950_v13, %v3839_v12  ;;  %v974_v27 = vshll.u32 %v3153_v7, 16 }
  0x49   : > { %757 = vrot.lane.b32.xlu1 %v719_v50, %s3573_s21  ;;  %753 = vrot.lane.b32.xlu0 %v711_v58, %s3573_s21  ;;  %v640_v28 = vmul.f32 %v3713_v23, %v631_v11  ;;  %v3164_v29 = vunpack.c.l.bf16 %v3206_v20  ;;  %v960_v30 = vor.u32 %v958_v17, %v3845_v16  ;;  %v3858_v32 = vrot.slane %v971_v18, 7  ;;  %v3207_v58 = vld [vmem:[%s3836_s8 + $0x10] sm:$0xff]  }
  0x4a   : > { %v3860_v33 = vpack.c.bf16 %v912_v19, %v912_v19  ;;  %v881_v34 = vmul.f32 %v3205_v15, %v3693_v2  ;;  %v728_v36 = vrot.slane %v3811_v51, 4  ;;  %v720_v37 = vrot.slane %v3788_v31, 4 }
  0x4b   : > { %v953_v23 = vrot.slane %v3839_v12, 4  ;;  %v990_v38 = vshll.u32 %v3155_v8, 16  ;;  %v968_v39 = vor.u32 %v966_v21, %v3851_v9  ;;  %v961_v40 = vrot.slane %v3845_v16, 4  ;;  %v514_v12 = vld [vmem:[#allocation2 + $0x8] sm:$0xf] }
  0x4c   : > { %v3869_v41 = vrot.slane %v987_v22, 7  ;;  %v979_v42 = vshrl.u32 %v3154_v25, 16  ;;  %v969_v43 = vrot.slane %v3851_v9, 4  ;;  %v360_v44 = vmul.f32 %v3164_v29, %v3693_v2 }
  0x4d   : > { %755 = vrot.lane.b32.xlu1 %v712_v3, %s3573_s21  ;;  %761 = vrot.lane.b32.xlu0 %v727_v4, %s3573_s21  ;;  %v3160_v45 = vunpack.c.l.bf16 %v3159_v35  ;;  %v3165_v46 = vunpack.c.h.bf16 %v3206_v20  ;;  %v976_v31 = vor.u32 %v974_v27, %v3858_v32  ;;  %v995_v47 = vshrl.u32 %v3860_v33, 16  ;;  %v3910_v20 = vld [vmem:[%s3836_s8 + $0x18] sm:$0xff]  }
  0x4e   : > { %v3877_v48 = vpack.c.bf16 %v640_v28, %v640_v28  ;;  %v896_v49 = vadd.f32 %v3702_v10, %v881_v34  ;;  %v977_v50 = vrot.slane %v3858_v32, 4  ;;  %v375_v51 = vadd.f32 %v3702_v10, %v360_v44  ;;  %v3500_v34 = vld [vmem:[%s4631_s3 + $0x30] sm:$0xff]  }
  0x4f   : > { %v3882_v52 = vstv %s331_s10  ;;  %v358_v53 = vmul.f32 %v3160_v45, %v3693_v2  ;;  %v3886_v54 = vor.u32 %v990_v38, %v3869_v41  ;;  %v3888_v55 = vrot.slane %v979_v42, 7  ;;  %3317 = vmatprep.subr.bf16.mxu0 %v3500_v34  ;;  %v529_v45 = vld [vmem:[#allocation2 + $0x18] sm:$0xf] }
  0x50   : > { %v982_v56 = vshll.u32 %v3154_v25, 16  ;;  %v361_v57 = vmul.f32 %v3165_v46, %v3693_v2  ;;  %v998_v59 = vshll.u32 %v3860_v33, 16  ;;  %v383_v60 = vmax.f32 %v375_v51, 0.0  ;;  %3318 = vmatpush3.bf16.msra.mxu0 %v3500_v34 }
  0x51   : > { %1010 = vrot.lane.b32.xlu1 %v952_v26, %s3574_s11  ;;  %1014 = vrot.lane.b32.xlu0 %v960_v30, %s3574_s11  ;;  %v373_v61 = vadd.f32 %v3702_v10, %v358_v53  ;;  %v3161_v62 = vunpack.c.h.bf16 %v3159_v35  ;;  %v3896_v63 = vrot.slane %v995_v47, 7  ;;  %v730_v0 = vshrl.u32 %v3877_v48, 16  ;;  %v3499_v30 = vld [vmem:[%s4631_s3 + $0xc] sm:$0xff]  }
  0x52   : > { %v904_v1 = vmax.f32 %v896_v49, 0.0  ;;  %v376_v3 = vadd.f32 %v3702_v10, %v361_v57  ;;  %v392_v4 = vmul.f32 %v3882_v52, %v383_v60  ;;  %v3169_v7 = vunpack.c.h.bf16 %v3207_v58  ;;  %3269 = vmatprep.subr.bf16.mxu1 %v3499_v30  ;;  %v535_v57 = vld [vmem:[#allocation2 + $0x20] sm:$0xf] }
  0x53   : > { %v381_v5 = vmax.f32 %v373_v61, 0.0  ;;  %v359_v6 = vmul.f32 %v3161_v62, %v3693_v2  ;;  %v3903_v8 = vor.u32 %v982_v56, %v3888_v55  ;;  %v985_v11 = vrot.slane %v3888_v55, 4  ;;  %v532_v56 = vld [vmem:[#allocation2 + $0x1c] sm:$0x1]  ;;  %3270 = vmatpush3.bf16.msra.mxu1 %v3499_v30  ;;  %v544_v55 = vld [vmem:[#allocation2 + $0x2c] sm:$0x1] }
  0x54   : > { %v384_v13 = vmax.f32 %v376_v3, 0.0  ;;  %v3168_v14 = vunpack.c.l.bf16 %v3207_v58  ;;  %v3130_v15 = vpack.c.bf16 %v392_v4, %v392_v4  ;;  %v363_v19 = vmul.f32 %v3169_v7, %v3693_v2  ;;  %v538_v7 = vld [vmem:[#allocation2 + $0x24] sm:$0x1] }
  0x55   : > { %1018 = vrot.lane.b32.xlu1 %v968_v39, %s3574_s11  ;;  %1022 = vrot.lane.b32.xlu0 %v976_v31, %s3574_s11  ;;  %v390_v17 = vmul.f32 %v3882_v52, %v381_v5  ;;  %v374_v18 = vadd.f32 %v3702_v10, %v359_v6  ;;  %v3915_v21 = vmul.f32 %v3775_v24, %v904_v1  ;;  %v520_v6 = vld [vmem:[#allocation2 + $0xc] sm:$0x1] }
  0x56   : > { %v393_v22 = vmul.f32 %v3882_v52, %v384_v13  ;;  %v362_v25 = vmul.f32 %v3168_v14, %v3693_v2  ;;  %v447_v26 = vshrl.u32 %v3130_v15, 16  ;;  %v450_v27 = vshll.u32 %v3130_v15, 16 }
  0x57   : > { %v3128_v28 = vpack.c.bf16 %v390_v17, %v390_v17  ;;  %v382_v29 = vmax.f32 %v374_v18, 0.0  ;;  %v378_v24 = vadd.f32 %v3702_v10, %v363_v19 }
  0x58   : > { %v3131_v35 = vpack.c.bf16 %v393_v22, %v393_v22  ;;  %v377_v49 = vadd.f32 %v3702_v10, %v362_v25  ;;  %v523_v22 = vld [vmem:[#allocation2 + $0x10] sm:$0xf] }
  0x59   : > { %763 = vrot.lane.b32.xlu1 %v728_v36, %s3573_s21  ;;  %759 = vrot.lane.b32.xlu0 %v720_v37, %s3573_s21  ;;  %v3172_v36 = vunpack.c.l.bf16 %v3910_v20  ;;  %v449_v37 = vrot.slane %v447_v26, 7  ;;  %v431_v38 = vshrl.u32 %v3128_v28, 16  ;;  %v434_v39 = vshll.u32 %v3128_v28, 16  ;;  %v3501_v28 = vld [vmem:[%s4631_s3 + $0x14] ss:$0 sps:$4 sm:$0xff]  }
  0x5a   : > { %v391_v42 = vmul.f32 %v3882_v52, %v382_v29  ;;  %v455_v46 = vshrl.u32 %v3131_v35, 16  ;;  %v458_v31 = vshll.u32 %v3131_v35, 16  ;;  %v386_v47 = vmax.f32 %v378_v24, 0.0  ;;  %v3975_v29 = vld [vmem:[%s4631_s3 + $0x38] ss:$0 sps:$4 sm:$0xff]   ;;  %3445 = vmatprep.subr.msk.bf16.mxu1 %vm1282_vm9, %v3501_v28 }
  0x5b   : > { %v452_v51 = vor.u32 %v450_v27, %v449_v37  ;;  %v433_v53 = vrot.slane %v431_v38, 7  ;;  %v385_v60 = vmax.f32 %v377_v49, 0.0  ;;  %v364_v61 = vmul.f32 %v3172_v36, %v3693_v2  ;;  %3449 = vmatprep.subr.msk.bf16.mxu0 %vm1282_vm9, %v3975_v29 }
  0x5c   : > { %v3129_v16 = vpack.c.bf16 %v391_v42, %v391_v42  ;;  %v395_v58 = vmul.f32 %v3882_v52, %v386_v47  ;;  %v1000_v36 = vor.u32 %v998_v59, %v3896_v63  ;;  %v993_v47 = vrot.slane %v3869_v41, 4  ;;  %v541_v41 = vld [vmem:[#allocation2 + $0x28] sm:$0xf] }
  0x5d   : > { %1016 = vrot.lane.b32.xlu1 %v961_v40, %s3574_s11  ;;  %1012 = vrot.lane.b32.xlu0 %v953_v23, %s3574_s11  ;;  %v453_v40 = vrot.slane %v449_v37, 4  ;;  %v457_v23 = vrot.slane %v455_v46, 7  ;;  %v530_v62 = vsel %vm3936_vm7, %v452_v51, %v529_v45  ;;  %v436_v1 = vor.u32 %v434_v39, %v433_v53  ;;  %v547_v46 = vld [vmem:[#allocation2 + $0x30] sm:$0xf] }
  0x5e   : > { %v439_v3 = vshrl.u32 %v3129_v16, 16  ;;  %v442_v4 = vshll.u32 %v3129_v16, 16  ;;  %531 = vst [vmem:[#allocation2 + $0x18] sm:$0xf] %v530_v62  ;;  %v437_v14 = vrot.slane %v433_v53, 4  ;;  %v3133_v25 = vpack.c.bf16 %v395_v58, %v395_v58 }
  0x5f   : > { %v460_v13 = vor.u32 %v458_v31, %v457_v23  ;;  %v461_v15 = vrot.slane %v457_v23, 4  ;;  %v533_v17 = vsel %vm3947_vm8, %v453_v40, %v532_v56  ;;  %v515_v18 = vsel %vm3936_vm7, %v436_v1, %v514_v12  ;;  %v550_v31 = vld [vmem:[#allocation2 + $0x34] sm:$0x1]  ;;  %v4019_v1 = vld [vmem:[%s4631_s3 + $0x3c] sm:$0xff]  }
  0x60   : > { %v441_v19 = vrot.slane %v439_v3, 7  ;;  %534 = vst [vmem:[#allocation2 + $0x1c] sm:$0x1] %v533_v17  ;;  %v394_v32 = vmul.f32 %v3882_v52, %v385_v60  ;;  %516 = vst [vmem:[#allocation2 + $0x8] sm:$0xf] %v515_v18  ;;  %v379_v27 = vadd.f32 %v3702_v10, %v364_v61  ;;  %v471_v35 = vshrl.u32 %v3133_v25, 16 }
  0x61   : > { %1024 = vrot.lane.b32.xlu1 %v977_v50, %s3574_s11  ;;  %1020 = vrot.lane.b32.xlu0 %v969_v43, %s3574_s11  ;;  %v536_v9 = vsel %vm3936_vm7, %v460_v13, %v535_v57  ;;  %v526_v43 = vld [vmem:[#allocation2 + $0x14] sm:$0x1]  ;;  %v521_v50 = vsel %vm3947_vm8, %v437_v14, %v520_v6  ;;  %v539_v26 = vsel %vm3947_vm8, %v461_v15, %v538_v7  ;;  %v474_v24 = vshll.u32 %v3133_v25, 16  ;;  %v553_v15 = vld [vmem:[#allocation2 + $0x38] sm:$0xf] }
  0x62   : > { %537 = vst [vmem:[#allocation2 + $0x20] sm:$0xf] %v536_v9  ;;  %v444_v30 = vor.u32 %v442_v4, %v441_v19  ;;  %v445_v34 = vrot.slane %v441_v19, 4  ;;  %522 = vst [vmem:[#allocation2 + $0xc] sm:$0x1] %v521_v50  ;;  %v3986_v37 = vpack.c.bf16 %v3915_v21, %v3915_v21  ;;  %v3132_v38 = vpack.c.bf16 %v394_v32, %v394_v32 }
  0x63   : > { %540 = vst [vmem:[#allocation2 + $0x24] sm:$0x1] %v539_v26  ;;  %v387_v39 = vmax.f32 %v379_v27, 0.0  ;;  %v733_v49 = vshll.u32 %v3877_v48, 16  ;;  %v1284_v6 = vsel %vm1282_vm9, %v3501_v28, 0  ;;  %v4031_v14 = vsel %vm1282_vm9, %v3975_v29, 0 }
  0x64   : > { %v524_v42 = vsel %vm3936_vm7, %v444_v30, %v523_v22  ;;  %v527_v45 = vsel %vm3947_vm8, %v445_v34, %v526_v43  ;;  %v463_v33 = vshrl.u32 %v3132_v38, 16  ;;  %v466_v59 = vshll.u32 %v3132_v38, 16  ;;  %3272 = vmatpush3.bf16.msra.mxu1 %v1284_v6  ;;  %v556_v17 = vld [vmem:[#allocation2 + $0x3c] sm:$0x1]  ;;  %3320 = vmatpush3.bf16.msra.mxu0 %v4031_v14  ;;  %v559_v34 = vld [vmem:[#allocation2 + $0x40] sm:$0xf] }
  0x65   : > { %1030 = vrot.lane.b32.xlu1 %v3886_v54, %s3574_s11  ;;  %1026 = vrot.lane.b32.xlu0 %v3903_v8, %s3574_s11  ;;  %v473_v54 = vrot.slane %v471_v35, 7  ;;  %v732_v8 = vrot.slane %v730_v0, 7  ;;  %525 = vst [vmem:[#allocation2 + $0x10] sm:$0xf] %v524_v42  ;;  %528 = vst [vmem:[#allocation2 + $0x14] sm:$0x1] %v527_v45  ;;  %v396_v21 = vmul.f32 %v3882_v52, %v387_v39 }
  0x66   : > { %v1001_v0 = vrot.slane %v3896_v63, 4  ;;  %v1003_v16 = vshrl.u32 %v3986_v37, 16  ;;  %v465_v40 = vrot.slane %v463_v33, 7  ;;  %v4014_v63 = vld [vmem:[%s4631_s3] sm:$0xff]   ;;  %3329 = vmatprep.subr.bf16.mxu0 %v4019_v1  ;;  %v801_v38 = vld [vmem:[#allocation2 + $0x18] sm:$0xf] }
  0x67   : > { %v476_v51 = vor.u32 %v474_v24, %v473_v54  ;;  %v477_v53 = vrot.slane %v473_v54, 4  ;;  %v3134_v56 = vpack.c.bf16 %v396_v21, %v396_v21  ;;  %v736_v23 = vrot.slane %v732_v8, 4  ;;  %3281 = vmatprep.subr.bf16.mxu1 %v4014_v63  ;;  %v787_v39 = vld [vmem:[#allocation2 + $0x8] sm:$0xf] }
  0x68   : > { %v468_v57 = vor.u32 %v466_v59, %v465_v40  ;;  %v735_v58 = vor.u32 %v733_v49, %v732_v8  ;;  %v469_v60 = vrot.slane %v465_v40, 4  ;;  %v1005_v3 = vrot.slane %v1003_v16, 7 }
  0x69   : > { %1028 = vrot.lane.b32.xlu1 %v985_v11, %s3574_s11  ;;  %1034 = vrot.lane.b32.xlu0 %v1000_v36, %s3574_s11  ;;  %v548_v12 = vsel %vm3936_vm7, %v476_v51, %v547_v46  ;;  %v551_v48 = vsel %vm3947_vm8, %v477_v53, %v550_v31  ;;  %v3173_v11 = vunpack.c.h.bf16 %v3910_v20  ;;  %v479_v61 = vshrl.u32 %v3134_v56, 16  ;;  %v807_v44 = vld [vmem:[#allocation2 + $0x20] sm:$0xf]  ;;  %v792_v49 = vld [vmem:[#allocation2 + $0xc] sm:$0x1] }
  0x6a   : > { %549 = vst [vmem:[#allocation2 + $0x30] sm:$0xf] %v548_v12  ;;  %552 = vst [vmem:[#allocation2 + $0x34] sm:$0x1] %v551_v48  ;;  %v482_v62 = vshll.u32 %v3134_v56, 16  ;;  %v1006_v20 = vshll.u32 %v3986_v37, 16  ;;  %v542_v4 = vsel %vm3936_vm7, %v468_v57, %v541_v41  ;;  %v545_v7 = vsel %vm3947_vm8, %v469_v60, %v544_v55 }
  0x6b   : > { %543 = vst [vmem:[#allocation2 + $0x28] sm:$0xf] %v542_v4  ;;  %v481_v13 = vrot.slane %v479_v61, 7  ;;  %546 = vst [vmem:[#allocation2 + $0x2c] sm:$0x1] %v545_v7  ;;  %v365_v18 = vmul.f32 %v3173_v11, %v3693_v2  ;;  %v1009_v25 = vrot.slane %v1005_v3, 4 }
  0x6c   : > { %v1008_v32 = vor.u32 %v1006_v20, %v1005_v3  ;;  %v795_v46 = vld [vmem:[#allocation2 + $0x10] sm:$0xf]  ;;  %v810_v40 = vld [vmem:[#allocation2 + $0x24] sm:$0x1]  ;;  %v804_v56 = vld [vmem:[#allocation2 + $0x1c] sm:$0x1] }
  0x6d   : > { %1036 = vrot.lane.b32.xlu1 %v1001_v0, %s3574_s11  ;;  %1032 = vrot.lane.b32.xlu0 %v993_v47, %s3574_s11  ;;  %v484_v19 = vor.u32 %v482_v62, %v481_v13  ;;  %v485_v22 = vrot.slane %v481_v13, 4  ;;  %v380_v9 = vadd.f32 %v3702_v10, %v365_v18  ;;  %v562_v10 = vld [vmem:[#allocation2 + $0x44] sm:$0x1]  ;;  %v798_v47 = vld [vmem:[#allocation2 + $0x14] sm:$0x1] }
  0x6e   : > { %v4081_v20 = vld [vmem:[#allocation2] sm:$0xf] }
  0x6f   : > { %v554_v43 = vsel %vm3936_vm7, %v484_v19, %v553_v15  ;;  %v557_v2 = vsel %vm3947_vm8, %v485_v22, %v556_v17  ;;  %v388_v50 = vmax.f32 %v380_v9, 0.0  ;;  %v1133_v7 = vshrl.u32 %v4081_v20, 16 }
  0x70   : > { %555 = vst [vmem:[#allocation2 + $0x38] sm:$0xf] %v554_v43  ;;  %558 = vst [vmem:[#allocation2 + $0x3c] sm:$0x1] %v557_v2  ;;  %v1136_v13 = vshll.u32 %v4081_v20, 16 }
  0x71   : > { %767 = vrot.lane.b32.xlu1 %v736_v23, %s3573_s21  ;;  %765 = vrot.lane.b32.xlu0 %v735_v58, %s3573_s21  ;;  %v397_v26 = vmul.f32 %v3882_v52, %v388_v50  ;;  %v819_v57 = vld [vmem:[#allocation2 + $0x30] sm:$0xf]  ;;  %v1135_v9 = vrot.slane %v1133_v7, 4 }
  0x72   : > { %v813_v55 = vld [vmem:[#allocation2 + $0x28] sm:$0xf]  ;;  %v816_v62 = vld [vmem:[#allocation2 + $0x2c] sm:$0x1]  ;;  %v1138_v43 = vrot.slane %v1136_v13, 5 }
  0x73   : > { %v3135_v27 = vpack.c.bf16 %v397_v26, %v397_v26  ;;  %v4098_v26 = vld [vmem:[#allocation2 + $0x4] sm:$0x1] }
  0x75   : > { %1040 = vrot.lane.b32.xlu1 %v1009_v25, %s3574_s11  ;;  %1038 = vrot.lane.b32.xlu0 %v1008_v32, %s3574_s11  ;;  %v487_v28 = vshrl.u32 %v3135_v27, 16  ;;  %v490_v29 = vshll.u32 %v3135_v27, 16 }
  0x77   : > { %v489_v30 = vrot.slane %v487_v28, 7  ;;  %v825_v3 = vld [vmem:[#allocation2 + $0x38] sm:$0xf] }
  0x79   : > { %v493_v35 = vrot.slane %v489_v30, 4  ;;  %v492_v24 = vor.u32 %v490_v29, %v489_v30 }
  0x7b   : > { %v563_v36 = vsel %vm3947_vm8, %v493_v35, %v562_v10  ;;  %v560_v37 = vsel %vm3936_vm7, %v492_v24, %v559_v34  ;;  %v1139_v10 = vor.u32 %v1138_v43, %v1135_v9  ;;  %v1142_v34 = vshll.u32 %v4098_v26, 16  ;;  %vm4160_vm7 = vmor %vm1129_vm1, %vm1130_vm2 }
  0x7c   : > { %564 = vst [vmem:[#allocation2 + $0x44] sm:$0x1] %v563_v36  ;;  %561 = vst [vmem:[#allocation2 + $0x40] sm:$0xf] %v560_v37  ;;  %v828_v36 = vld [vmem:[#allocation2 + $0x3c] sm:$0x1] }
  0x7d   : > { %v822_v37 = vld [vmem:[#allocation2 + $0x34] sm:$0x1]  ;;  %vm1269_vm8 = vcmask 195584  }
  0xab   : > { %v746_v42 = vpop.permute.xlu1 %745  ;;  %v738_v45 = vpop.permute.xlu0 %737 }
  0xac   : > { %v802_v54 = vsel %vm4052_vm11, %v746_v42, %v801_v38  ;;  %v788_v5 = vsel %vm4052_vm11, %v738_v45, %v787_v39  ;;  %v4105_v42 = vrot.slane %v1139_v10, 4  ;;  %v4107_v45 = vrot.slane %v1142_v34, 5 }
  0xad   : > { %803 = vst [vmem:[#allocation2 + $0x18] sm:$0xf] %v802_v54  ;;  %789 = vst [vmem:[#allocation2 + $0x8] sm:$0xf] %v788_v5 }
  0xaf   : > { %v750_v8 = vpop.permute.xlu1 %749  ;;  %v742_v33 = vpop.permute.xlu0 %741 }
  0xb0   : > { %v808_v59 = vsel %vm4052_vm11, %v750_v8, %v807_v44  ;;  %v796_v21 = vsel %vm4052_vm11, %v742_v33, %v795_v46 }
  0xb1   : > { %809 = vst [vmem:[#allocation2 + $0x20] sm:$0xf] %v808_v59  ;;  %797 = vst [vmem:[#allocation2 + $0x10] sm:$0xf] %v796_v21 }
  0xb3   : > { %v744_v51 = vpop.permute.xlu1 %743  ;;  %v740_v53 = vpop.permute.xlu0 %739 }
  0xb4   : > { %v799_v0 = vsel %vm4065_vm13, %v744_v51, %v798_v47  ;;  %v793_v16 = vsel %vm4065_vm13, %v740_v53, %v792_v49  ;;  %v1060_v22 = vld [vmem:[#allocation2 + $0x8] sm:$0xf]  ;;  %v1074_v28 = vld [vmem:[#allocation2 + $0x18] sm:$0xf]  ;;  %v4127_v53 = vld [vmem:[%s4631_s3 + $0x44] ss:$0 sps:$4 sm:$0xff]  }
  0xb5   : > { %800 = vst [vmem:[#allocation2 + $0x14] sm:$0x1] %v799_v0  ;;  %794 = vst [vmem:[#allocation2 + $0xc] sm:$0x1] %v793_v16 }
  0xb7   : > { %v752_v12 = vpop.permute.xlu1 %751  ;;  %v748_v41 = vpop.permute.xlu0 %747 }
  0xb8   : > { %v811_v48 = vsel %vm4065_vm13, %v752_v12, %v810_v40  ;;  %v805_v23 = vsel %vm4065_vm13, %v748_v41, %v804_v56  ;;  %v1068_v32 = vld [vmem:[#allocation2 + $0x10] sm:$0xf]  ;;  %v1080_v30 = vld [vmem:[#allocation2 + $0x20] sm:$0xf] }
  0xb9   : > { %812 = vst [vmem:[#allocation2 + $0x24] sm:$0x1] %v811_v48  ;;  %806 = vst [vmem:[#allocation2 + $0x1c] sm:$0x1] %v805_v23 }
  0xbb   : > { %v758_v11 = vpop.permute.xlu1 %757  ;;  %v754_v58 = vpop.permute.xlu0 %753 }
  0xbc   : > { %v820_v60 = vsel %vm4052_vm11, %v758_v11, %v819_v57  ;;  %v814_v61 = vsel %vm4052_vm11, %v754_v58, %v813_v55  ;;  %v1071_v0 = vld [vmem:[#allocation2 + $0x14] sm:$0x1]  ;;  %v1065_v23 = vld [vmem:[#allocation2 + $0xc] sm:$0x1] }
  0xbd   : > { %821 = vst [vmem:[#allocation2 + $0x30] sm:$0xf] %v820_v60  ;;  %815 = vst [vmem:[#allocation2 + $0x28] sm:$0xf] %v814_v61 }
  0xbf   : > { %v756_v4 = vpop.permute.xlu1 %755  ;;  %v762_v6 = vpop.permute.xlu0 %761 }
  0xc0   : > { %v817_v15 = vsel %vm4065_vm13, %v756_v4, %v816_v62  ;;  %v826_v17 = vsel %vm4052_vm11, %v762_v6, %v825_v3 }
  0xc1   : > { %818 = vst [vmem:[#allocation2 + $0x2c] sm:$0x1] %v817_v15  ;;  %827 = vst [vmem:[#allocation2 + $0x38] sm:$0xf] %v826_v17 }
  0xc3   : > { %v1011_v19 = vpop.permute.xlu1 %1010  ;;  %v1015_v25 = vpop.permute.xlu0 %1014 }
  0xc4   : > { %v1061_v2 = vsel %vm4090_vm15, %v1011_v19, %v1060_v22  ;;  %v1069_v50 = vsel %vm4090_vm15, %v1015_v25, %v1068_v32  ;;  %v4140_v19 = vld [vmem:[%s4631_s3 + $0x8] ss:$0 sps:$4 sm:$0xff]  }
  0xc5   : > { %1062 = vst [vmem:[#allocation2 + $0x8] sm:$0xf] %v1061_v2  ;;  %1070 = vst [vmem:[#allocation2 + $0x10] sm:$0xf] %v1069_v50  ;;  %v1083_v2 = vld [vmem:[#allocation2 + $0x24] sm:$0x1] }
  0xc7   : > { %v1019_v27 = vpop.permute.xlu1 %1018  ;;  %v1023_v29 = vpop.permute.xlu0 %1022 }
  0xc8   : > { %v1075_v35 = vsel %vm4090_vm15, %v1019_v27, %v1074_v28  ;;  %v1081_v24 = vsel %vm4090_vm15, %v1023_v29, %v1080_v30  ;;  %v1077_v27 = vld [vmem:[#allocation2 + $0x1c] sm:$0x1]  ;;  %v4146_v30 = vsel %vm1282_vm9, %v4127_v53, 0 }
  0xc9   : > { %1076 = vst [vmem:[#allocation2 + $0x18] sm:$0xf] %v1075_v35  ;;  %1082 = vst [vmem:[#allocation2 + $0x20] sm:$0xf] %v1081_v24 }
  0xcb   : > { %v764_v38 = vpop.permute.xlu1 %763  ;;  %v760_v39 = vpop.permute.xlu0 %759 }
  0xcc   : > { %v829_v54 = vsel %vm4065_vm13, %v764_v38, %v828_v36  ;;  %v823_v5 = vsel %vm4065_vm13, %v760_v39, %v822_v37  ;;  %v4113_v44 = vld [vmem:[#allocation2 + $0x8] sm:$0xf]  ;;  %v1763_v8 = vld [vmem:[#allocation2 + $0x10] sm:$0xf] }
  0xcd   : > { %v1761_v46 = vld [vmem:[#allocation2 + $0x8] sm:$0xf]  ;;  %830 = vst [vmem:[#allocation2 + $0x3c] sm:$0x1] %v829_v54  ;;  %824 = vst [vmem:[#allocation2 + $0x34] sm:$0x1] %v823_v5 }
  0xce   : > { %v1147_v59 = vshrl.u32 %v4113_v44, 16  ;;  %v1150_v21 = vshll.u32 %v4113_v44, 16  ;;  %v1778_v47 = vshrl.u32 %v1761_v46, 16  ;;  %v1781_v49 = vshll.u32 %v1761_v46, 16  ;;  %v4122_v51 = vld [vmem:[#allocation2 + $0x10] sm:$0xf] }
  0xcf   : > { %v1792_v16 = vshrl.u32 %v1763_v8, 16  ;;  %v1795_v40 = vshll.u32 %v1763_v8, 16  ;;  %v1161_v56 = vshrl.u32 %v4122_v51, 16  ;;  %v1164_v12 = vshll.u32 %v4122_v51, 16  ;;  %v1017_v41 = vpop.permute.xlu1 %1016  ;;  %v1013_v48 = vpop.permute.xlu0 %1012  ;;  %v4154_v24 = vld [vmem:[#allocation2 + $0x8] sm:$0xe] }
  0xd0   : > { %v1149_v57 = vrot.slane %v1147_v59, 4  ;;  %v1152_v55 = vrot.slane %v1150_v21, 5  ;;  %v1780_v11 = vrot.slane %v1778_v47, 4  ;;  %v1783_v58 = vrot.slane %v1781_v49, 5  ;;  %v4135_v4 = vld [vmem:[#allocation2 + $0x18] sm:$0xf] }
  0xd1   : > { %v1072_v60 = vsel %vm4116_vm3, %v1017_v41, %v1071_v0  ;;  %v1066_v61 = vsel %vm4116_vm3, %v1013_v48, %v1065_v23  ;;  %v1794_v62 = vrot.slane %v1792_v16, 4  ;;  %v1797_v3 = vrot.slane %v1795_v40, 5  ;;  %v1765_v6 = vld [vmem:[#allocation2 + $0x18] sm:$0xf]  ;;  %v4152_v35 = vld [vmem:[#allocation2 + $0x20] sm:$0xf] }
  0xd2   : > { %1073 = vst [vmem:[#allocation2 + $0x14] sm:$0x1] %v1072_v60  ;;  %1067 = vst [vmem:[#allocation2 + $0xc] sm:$0x1] %v1066_v61  ;;  %v1153_v7 = vor.u32 %v1152_v55, %v1149_v57  ;;  %v1784_v13 = vor.u32 %v1783_v58, %v1780_v11  ;;  %v1163_v15 = vrot.slane %v1161_v56, 4  ;;  %v1166_v17 = vrot.slane %v1164_v12, 5 }
  0xd3   : > { %v1798_v22 = vor.u32 %v1797_v3, %v1794_v62  ;;  %v1175_v25 = vshrl.u32 %v4135_v4, 16  ;;  %v1178_v32 = vshll.u32 %v4135_v4, 16  ;;  %v1806_v9 = vshrl.u32 %v1765_v6, 16  ;;  %v1025_v43 = vpop.permute.xlu1 %1024  ;;  %v1021_v50 = vpop.permute.xlu0 %1020  ;;  %v4156_v36 = vld [vmem:[#allocation2 + $0x10] sm:$0xe] }
  0xd4   : > { %v1167_v28 = vor.u32 %v1166_v17, %v1163_v15  ;;  %v1809_v29 = vshll.u32 %v1765_v6, 16  ;;  %v1084_v10 = vsel %vm4116_vm3, %v1025_v43, %v1083_v2  ;;  %v1078_v34 = vsel %vm4116_vm3, %v1021_v50, %v1077_v27  ;;  %v1092_v37 = vld [vmem:[#allocation2 + $0x30] sm:$0xf]  ;;  %v1086_v38 = vld [vmem:[#allocation2 + $0x28] sm:$0xf] }
  0xd5   : > { %1085 = vst [vmem:[#allocation2 + $0x24] sm:$0x1] %v1084_v10  ;;  %1079 = vst [vmem:[#allocation2 + $0x1c] sm:$0x1] %v1078_v34  ;;  %v1154_v54 = vrot.slane %v1153_v7, 4  ;;  %v1785_v5 = vrot.slane %v1784_v13, 4  ;;  %v1145_v11 = vsel %vm4160_vm7, %v4105_v42, %v4107_v45 }
  0xd6   : > { %v1799_v46 = vrot.slane %v1798_v22, 4  ;;  %v4166_v8 = vsel %vm1282_vm9, %v4140_v19, 0  ;;  %v1177_v59 = vrot.slane %v1175_v25, 4  ;;  %v1180_v21 = vrot.slane %v1178_v32, 5  ;;  %v4177_v48 = vld [vmem:[#allocation2 + $0x20] sm:$0xf] }
  0xd7   : > { %v4168_v47 = vrot.slane %v1806_v9, 4  ;;  %v4170_v49 = vrot.slane %v1809_v29, 5  ;;  %v1031_v0 = vpop.permute.xlu1 %1030  ;;  %v1027_v16 = vpop.permute.xlu0 %1026  ;;  %v4172_v40 = vrot.slane %v1167_v28, 4  ;;  %v1820_v56 = vshrl.u32 %v4152_v35, 16  ;;  %v1089_v13 = vld [vmem:[#allocation2 + $0x2c] sm:$0x1] }
  0xd8   : > { %v1823_v12 = vshll.u32 %v4152_v35, 16  ;;  %v3054_v41 = vrot.slane %v4154_v24, 9  ;;  %v1093_v23 = vsel %vm4090_vm15, %v1031_v0, %v1092_v37  ;;  %v1087_v57 = vsel %vm4090_vm15, %v1027_v16, %v1086_v38  ;;  %v1098_v32 = vld [vmem:[#allocation2 + $0x38] sm:$0xf] }
  0xd9   : > { %v4183_v55 = vld [vmem:[#allocation2 + $0xc] sm:$0x1]  ;;  %v4191_v60 = vld [vmem:[#allocation2 + $0x14] sm:$0x1]  ;;  %1094 = vst [vmem:[#allocation2 + $0x30] sm:$0xf] %v1093_v23  ;;  %v1181_v42 = vor.u32 %v1180_v21, %v1177_v59  ;;  %v1812_v45 = vor.u32 %v4170_v49, %v4168_v47 }
  0xda   : > { %v4189_v58 = vld [vmem:[#allocation2 + $0xc] sm:$0x1]  ;;  %1088 = vst [vmem:[#allocation2 + $0x28] sm:$0xf] %v1087_v57  ;;  %v1156_v61 = vshll.u32 %v4183_v55, 16  ;;  %v1801_v3 = vshll.u32 %v4191_v60, 16 }
  0xdb   : > { %v1787_v62 = vshll.u32 %v4189_v58, 16  ;;  %v4196_v6 = vld [vmem:[#allocation2 + $0x14] sm:$0x1]  ;;  %v3055_v7 = vrot.slane %v4156_v36, 9  ;;  %v1189_v17 = vshrl.u32 %v4177_v48, 16  ;;  %v1029_v22 = vpop.permute.xlu1 %1028  ;;  %v1035_v25 = vpop.permute.xlu0 %1034  ;;  %v1192_v50 = vshll.u32 %v4177_v48, 16 }
  0xdc   : > { %v1170_v15 = vshll.u32 %v4196_v6, 16  ;;  %v1158_v9 = vrot.slane %v1156_v61, 5  ;;  %v1803_v2 = vrot.slane %v1801_v3, 5  ;;  %v1090_v27 = vsel %vm4116_vm3, %v1029_v22, %v1089_v13  ;;  %v4209_v10 = vld [vmem:[#allocation2 + $0x1c] sm:$0x1] }
  0xdd   : > { %v1789_v43 = vrot.slane %v1787_v62, 5  ;;  %v1099_v28 = vsel %vm4090_vm15, %v1035_v25, %v1098_v32  ;;  %v2028_v29 = vrot.slane %v4189_v58, 5  ;;  %v4211_v35 = vld [vmem:[#allocation2 + $0x1c] sm:$0x1]  ;;  %1091 = vst [vmem:[#allocation2 + $0x2c] sm:$0x1] %v1090_v27 }
  0xde   : > { %v1172_v34 = vrot.slane %v1170_v15, 5  ;;  %1100 = vst [vmem:[#allocation2 + $0x38] sm:$0xf] %v1099_v28  ;;  %v1159_v37 = vsel %vm4160_vm7, %v1154_v54, %v1158_v9  ;;  %v1804_v59 = vsel %vm4160_vm7, %v1799_v46, %v1803_v2  ;;  %v1184_v21 = vshll.u32 %v4209_v10, 16  ;;  %v4220_v47 = vld [vmem:[#allocation2 + $0x24] sm:$0x1] }
  0xdf   : > { %v1790_v38 = vsel %vm4160_vm7, %v1785_v5, %v1789_v43  ;;  %v1101_v49 = vld [vmem:[#allocation2 + $0x3c] sm:$0x1]  ;;  %v2987_v0 = vcombine.low %v1145_v11, %v1159_v37  ;;  %v2032_v23 = vrot.slane %v4191_v60, 5  ;;  %v1182_v57 = vrot.slane %v1181_v42, 4  ;;  %v1037_v58 = vpop.permute.xlu1 %1036  ;;  %v1033_v61 = vpop.permute.xlu0 %1032  ;;  %v1095_v62 = vld [vmem:[#allocation2 + $0x34] sm:$0x1] }
  0xe0   : > { %v3044_v16 = vcombine.low %v1790_v38, %v1804_v59  ;;  %v1186_v54 = vrot.slane %v1184_v21, 5  ;;  %v1815_v3 = vshll.u32 %v4211_v35, 16  ;;  %v1822_v5 = vrot.slane %v1820_v56, 4  ;;  %v834_v15 = vld [vmem:[#allocation2 + $0x44] sm:$0x1] }
  0xe1   : > { %v1825_v13 = vrot.slane %v1823_v12, 5  ;;  %v1102_v11 = vsel %vm4116_vm3, %v1037_v58, %v1101_v49  ;;  %v1096_v60 = vsel %vm4116_vm3, %v1033_v61, %v1095_v62  ;;  %3273 = vmatprep.mubr.msk.bf16.mxu1 %vm1269_vm8, %v2987_v0  ;;  %v1813_v42 = vrot.slane %v1812_v45, 4  ;;  %v831_v12 = vld [vmem:[#allocation2 + $0x40] sm:$0xf]  ;;  %v4242_v43 = vld [vmem:[#allocation2 + $0x24] sm:$0x1] }
  0xe2   : > { %3321 = vmatprep.mubr.msk.bf16.mxu0 %vm1269_vm8, %v3044_v16  ;;  %v1829_v56 = vshll.u32 %v4220_v47, 16  ;;  %1103 = vst [vmem:[#allocation2 + $0x3c] sm:$0x1] %v1102_v11  ;;  %1097 = vst [vmem:[#allocation2 + $0x34] sm:$0x1] %v1096_v60  ;;  %v1173_v22 = vsel %vm4160_vm7, %v4172_v40, %v1172_v34  ;;  %v1187_v25 = vsel %vm4160_vm7, %v1182_v57, %v1186_v54  ;;  %v1817_v32 = vrot.slane %v1815_v3, 5 }
  0xe3   : > { %v1826_v9 = vor.u32 %v1825_v13, %v1822_v5  ;;  %v2988_v2 = vcombine.low %v1173_v22, %v1187_v25  ;;  %v2036_v45 = vrot.slane %v4211_v35, 5  ;;  %v2029_v28 = vsel %vm4226_vm10, %v3054_v41, %v2028_v29  ;;  %v4249_v37 = vld [vmem:[#allocation2 + $0x28] sm:$0xf]  ;;  %v768_v38 = vpop.permute.xlu1 %767  ;;  %v766_v40 = vpop.permute.xlu0 %765  ;;  %v4257_v0 = vld [vmem:[#allocation2 + $0x30] sm:$0xf] }
  0xe4   : > { %v1831_v27 = vrot.slane %v1829_v56, 5  ;;  %v1818_v34 = vsel %vm4160_vm7, %v1813_v42, %v1817_v32  ;;  %v2033_v21 = vsel %vm4226_vm10, %v3055_v7, %v2032_v23  ;;  %v1191_v49 = vrot.slane %v1189_v17, 4  ;;  %v4264_v29 = vld [vmem:[#allocation2 + $0x2c] sm:$0x1]  ;;  %v2004_v13 = vld [vmem:[#allocation2 + $0x18] sm:$0xe] }
  0xe5   : > { %v1827_v59 = vrot.slane %v1826_v9, 4  ;;  %v835_v24 = vsel %vm4065_vm13, %v768_v38, %v834_v15  ;;  %v832_v41 = vsel %vm4052_vm11, %v766_v40, %v831_v12  ;;  %3274 = vmatmul.mubr.msk.bf16.vlgmr.msra.gmra.mrb[0].mxu1 %vm1269_vm8, %v2988_v2  ;;  %v1194_v16 = vrot.slane %v1192_v50, 5  ;;  %v4275_v50 = vld [vmem:[#allocation2 + $0x38] sm:$0xf]  ;;  %v2005_v25 = vld [vmem:[#allocation2 + $0x20] sm:$0xe] }
  0xe6   : > { %v1198_v57 = vshll.u32 %v4242_v43, 16  ;;  %836 = vst [vmem:[#allocation2 + $0x44] sm:$0x1] %v835_v24  ;;  %833 = vst [vmem:[#allocation2 + $0x40] sm:$0xf] %v832_v41  ;;  %3282 = vmatpush3.bf16.msra.mxu1 %v4014_v63  ;;  %v1203_v31 = vshrl.u32 %v4249_v37, 16  ;;  %v3065_v23 = vcombine.low %v2029_v28, %v2033_v21 }
  0xe7   : > { %v1832_v36 = vsel %vm4160_vm7, %v1827_v59, %v1831_v27  ;;  %v1206_v7 = vshll.u32 %v4249_v37, 16  ;;  %v1212_v52 = vshll.u32 %v4264_v29, 16  ;;  %v1195_v58 = vor.u32 %v1194_v16, %v1191_v49  ;;  %3446 = vmatprep.subr.msk.bf16.mxu1 %vm1282_vm9, %v4140_v19  ;;  %v4281_v63 = vld [vmem:[%s4631_s3 + $0x18] sm:$0xff]   ;;  %v4296_v32 = vld [vmem:[%s4631_s3 + $0x48] sm:$0xff]   ;;  %v1041_v2 = vpop.permute.xlu1 %1040  ;;  %v1039_v27 = vpop.permute.xlu0 %1038 }
  0xe8   : > { %v3045_v17 = vcombine.low %v1818_v34, %v1832_v36  ;;  %v1217_v61 = vshrl.u32 %v4257_v0, 16  ;;  %v1200_v62 = vrot.slane %v1198_v57, 5  ;;  %v1205_v54 = vrot.slane %v1203_v31, 4  ;;  %v4304_v40 = vld [vmem:[#allocation2 + $0x2c] sm:$0x1] }
  0xe9   : > { %v1208_v3 = vrot.slane %v1206_v7, 5  ;;  %v1220_v5 = vshll.u32 %v4257_v0, 16  ;;  %v1214_v11 = vrot.slane %v1212_v52, 5  ;;  %v4285_v60 = vld [vmem:[#allocation2 + $0x34] sm:$0x1]  ;;  %v1231_v22 = vshrl.u32 %v4275_v50, 16 }
  0xea   : > { %3322 = vmatmul.mubr.msk.bf16.vlgmr.msra.gmra.mrb[0].mxu0 %vm1269_vm8, %v3045_v17  ;;  %v4287_v19 = vld [vmem:[#allocation2 + $0x3c] sm:$0x1]  ;;  %v1219_v15 = vrot.slane %v1217_v61, 4  ;;  %v1226_v12 = vshll.u32 %v4285_v60, 16  ;;  %v2040_v9 = vrot.slane %v4220_v47, 5  ;;  %v1196_v28 = vrot.slane %v1195_v58, 4  ;;  %3284 = vmatpush3.bf16.msra.mxu1 %v4166_v8 }
  0xeb   : > { %3333 = vmatprep.mubr.msk.bf16.mxu0 %vm1269_vm8, %v3065_v23  ;;  %3330 = vmatpush3.bf16.msra.mxu0 %v4019_v1  ;;  %v1209_v42 = vor.u32 %v1208_v3, %v1205_v54  ;;  %v1222_v56 = vrot.slane %v1220_v5, 5  ;;  %v1234_v1 = vshll.u32 %v4275_v50, 16  ;;  %v1240_v38 = vshll.u32 %v4287_v19, 16  ;;  %v2007_v34 = vld [vmem:[#allocation2 + $0x30] sm:$0xe] }
  0xec   : > { %3451 = vmatprep.subr.msk.bf16.mxu0 %vm1282_vm9, %v4127_v53  ;;  %v1233_v49 = vrot.slane %v1231_v22, 4  ;;  %v3056_v24 = vrot.slane %v2004_v13, 9  ;;  %v4306_v47 = vld [vmem:[#allocation2 + $0x34] sm:$0x1]  ;;  %3293 = vmatprep.subr.bf16.mxu1 %v4281_v63  ;;  %v1201_v53 = vsel %vm4160_vm7, %v1196_v28, %v1200_v62  ;;  %v1228_v57 = vrot.slane %v1226_v12, 5 }
  0xed   : > { %v1210_v59 = vrot.slane %v1209_v42, 4  ;;  %v1223_v21 = vor.u32 %v1222_v56, %v1219_v15  ;;  %v1107_v41 = vld [vmem:[#allocation2 + $0x44] sm:$0x1]  ;;  %v1104_v16 = vld [vmem:[#allocation2 + $0x40] sm:$0xf]  ;;  %v1236_v36 = vrot.slane %v1234_v1, 5 }
  0xee   : > { %v1108_v8 = vsel %vm4116_vm3, %v1041_v2, %v1107_v41  ;;  %v1105_v31 = vsel %vm4090_vm15, %v1039_v27, %v1104_v16  ;;  %v1242_v52 = vrot.slane %v1240_v38, 5  ;;  %v2006_v17 = vld [vmem:[#allocation2 + $0x28] sm:$0xe]  ;;  %v3057_v62 = vrot.slane %v2005_v25, 9  ;;  %v1460_v42 = vld [vmem:[#allocation2] sm:$0xe] }
  0xef   : > { %v1215_v7 = vsel %vm4160_vm7, %v1210_v59, %v1214_v11  ;;  %3332 = vmatpush3.bf16.msra.mxu0 %v4146_v30  ;;  %1109 = vst [vmem:[#allocation2 + $0x44] sm:$0x1] %v1108_v8  ;;  %1106 = vst [vmem:[#allocation2 + $0x40] sm:$0xf] %v1105_v31  ;;  %v1224_v58 = vrot.slane %v1223_v21, 4  ;;  %v1237_v61 = vor.u32 %v1236_v36, %v1233_v49  ;;  %v2044_v33 = vrot.slane %v4304_v40, 5 }
  0xf0   : > { %v2989_v23 = vcombine.low %v1201_v53, %v1215_v7  ;;  %3341 = vmatprep.subr.bf16.mxu0 %v4296_v32  ;;  %v2037_v18 = vsel %vm4226_vm10, %v3056_v24, %v2036_v45  ;;  %v3059_v54 = vrot.slane %v2007_v34, 9  ;;  %v2048_v30 = vrot.slane %v4306_v47, 5  ;;  %v2315_v15 = vld [vmem:[#allocation2 + $0x48] sm:$0xf]  ;;  %v4332_v45 = vld [vmem:[#allocation2 + $0x3c] sm:$0x1] }
  0xf1   : > { %v1229_v3 = vsel %vm4160_vm7, %v1224_v58, %v1228_v57  ;;  %v1238_v5 = vrot.slane %v1237_v61, 4  ;;  %v2041_v13 = vsel %vm4226_vm10, %v3057_v62, %v2040_v9  ;;  %v3058_v11 = vrot.slane %v2006_v17, 9  ;;  %v3512_v25 = vld [vmem:[%s4631_s3 + $0x50] ss:$0 sps:$4 sm:$0xff]   ;;  %v4344_v9 = vld [vmem:[%s4631_s3 + $0x20] ss:$0 sps:$4 sm:$0xff]  }
  0xf2   : > { %3277 = vmatprep.mubr.msk.bf16.mxu1 %vm1269_vm8, %v2989_v23  ;;  %v2049_v35 = vsel %vm4226_vm10, %v3059_v54, %v2048_v30  ;;  %v3066_v12 = vcombine.low %v2037_v18, %v2041_v13  ;;  %v1489_v2 = vrot.slane %v4098_v26, 5  ;;  %v2008_v1 = vld [vmem:[#allocation2 + $0x38] sm:$0xe]  ;;  %v4350_v38 = vld [vmem:[%s4631_s3 + $0x5c] ss:$0 sps:$4 sm:$0xff]   ;;  %v2416_v34 = vshrl.u32 %v2315_v15, 16 }
  0xf3   : > { %v1243_v56 = vsel %vm4160_vm7, %v1238_v5, %v1242_v52  ;;  %v2045_v22 = vsel %vm4226_vm10, %v3058_v11, %v2044_v33  ;;  %v2997_v59 = vcombine.low %v4081_v20, %v4113_v44  ;;  %v2052_v21 = vrot.slane %v4332_v45, 5  ;;  %v1461_v49 = vld [vmem:[#allocation2 + $0x8] sm:$0xe]  ;;  %v2303_v53 = vld [vmem:[#allocation2 + $0x18] sm:$0xf] }
  0xf4   : > { %v2990_v27 = vcombine.low %v1229_v3, %v1243_v56  ;;  %v3067_v28 = vcombine.low %v2045_v22, %v2049_v35  ;;  %v3007_v24 = vrot.slane %v1460_v42, 9  ;;  %v2419_v41 = vshll.u32 %v2315_v15, 16  ;;  %v4371_v7 = vld [vmem:[%s4631_s3 + $0x54] sm:$0xff]   ;;  %v2301_v58 = vld [vmem:[#allocation2 + $0x10] sm:$0xf] }
  0xf5   : > { %v3060_v57 = vrot.slane %v2008_v1, 9  ;;  %v2226_v44 = vsel %vm1282_vm9, %v3512_v25, 0  ;;  %v1493_v8 = vrot.slane %v4183_v55, 5  ;;  %v1557_v31 = vsel %vm1282_vm9, %v4344_v9, 0  ;;  %v3513_v18 = vld [vmem:[#allocation2 + $0x10] ss:$8 sps:$4 sm:$0xff]  }
  0xf6   : > { %3334 = vmatmul.mubr.msk.bf16.vlgmr.msra.gmra.mrb[0].mxu0 %vm1269_vm8, %v3066_v12  ;;  %3278 = vmatmul.mubr.msk.bf16.gmra.mrb[4].mxu1 %vm1269_vm8, %v2990_v27  ;;  %v4358_v26 = vld [vmem:[#allocation2 + $0x44] sm:$0x1]  ;;  %v2009_v16 = vld [vmem:[#allocation2 + $0x40] sm:$0xe]  ;;  %v4377_v52 = vrot.slane %v2416_v34, 4  ;;  %v1497_v17 = vrot.slane %v4196_v6, 5  ;;  %v4389_v6 = vsel %vm4226_vm10, %v3007_v24, %v1489_v2  ;;  %v2998_v15 = vcombine.low %v4122_v51, %v4135_v4 }
  0xf7   : > { %3337 = vmatprep.mubr.msk.bf16.mxu0 %vm1269_vm8, %v3067_v28  ;;  %3285 = vmatprep.mubr.msk.bf16.mxu1 %vm1269_vm8, %v2997_v59  ;;  %v3061_v36 = vrot.slane %v2009_v16, 9  ;;  %v2056_v20 = vrot.slane %v4358_v26, 5  ;;  %v2053_v55 = vsel %vm4226_vm10, %v3060_v57, %v2052_v21  ;;  %v4384_v61 = vrot.slane %v2419_v41, 5  ;;  %v1462_v54 = vld [vmem:[#allocation2 + $0x10] sm:$0xe]  ;;  %v4419_v21 = vld [vmem:[%s4631_s3 + $0x24] sm:$0xff]  }
  0xf8   : > { %3342 = vmatpush3.bf16.msra.mxu0 %v4296_v32  ;;  %v4375_v32 = vsel %vm1282_vm9, %v4350_v38, 0  ;;  %v3008_v33 = vrot.slane %v1461_v49, 9  ;;  %v2332_v30 = vshrl.u32 %v2303_v53, 16  ;;  %v1501_v3 = vrot.slane %v4209_v10, 5  ;;  %v1463_v5 = vld [vmem:[#allocation2 + $0x18] sm:$0xe] }
  0xf9   : > { %3452 = vmatprep.subr.msk.bf16.mxu0 %vm1282_vm9, %v3512_v25  ;;  %v2057_v23 = vsel %vm4226_vm10, %v3061_v36, %v2056_v20  ;;  %v1464_v13 = vld [vmem:[#allocation2 + $0x20] sm:$0xe]  ;;  %v2335_v11 = vshll.u32 %v2303_v53, 16  ;;  %v1465_v42 = vld [vmem:[#allocation2 + $0x28] sm:$0xe]  ;;  %v2318_v56 = vshrl.u32 %v2301_v58, 16  ;;  %v2999_v12 = vcombine.low %v4177_v48, %v4249_v37 }
  0xfa   : > { %v3068_v62 = vcombine.low %v2053_v55, %v2057_v23  ;;  %v4395_v35 = vsel %vm4226_vm10, %v3008_v33, %v1493_v8  ;;  %v2321_v10 = vshll.u32 %v2301_v58, 16  ;;  %v3000_v22 = vcombine.low %v4257_v0, %v4275_v50  ;;  %v4403_v25 = vld [vmem:[#allocation2 + $0x14] sm:$0x1]  ;;  %v4405_v51 = vld [vmem:[#allocation2 + $0x1c] sm:$0x1] }
  0xfb   : > { %v2307_v4 = vld [vmem:[#allocation2 + $0x28] sm:$0xf]  ;;  %v3009_v2 = vrot.slane %v1462_v54, 9  ;;  %v3010_v27 = vrot.slane %v1463_v5, 9  ;;  %v2334_v28 = vrot.slane %v2332_v30, 4  ;;  %v2337_v1 = vrot.slane %v2335_v11, 5 }
  0xfc   : > { %3344 = vmatpush3.bf16.msra.mxu0 %v2226_v44  ;;  %v2305_v34 = vld [vmem:[#allocation2 + $0x20] sm:$0xf]  ;;  %v3018_v48 = vcombine.low %v4389_v6, %v4395_v35  ;;  %v3011_v37 = vrot.slane %v1464_v13, 9  ;;  %v1505_v0 = vrot.slane %v4242_v43, 5  ;;  %v3012_v50 = vrot.slane %v1465_v42, 9 }
  0xfd   : > { %3353 = vmatprep.subr.bf16.mxu0 %v4371_v7  ;;  %v2309_v59 = vld [vmem:[#allocation2 + $0x30] sm:$0xf]  ;;  %v2320_v49 = vrot.slane %v2318_v56, 4  ;;  %v2323_v24 = vrot.slane %v2321_v10, 5  ;;  %v2360_v41 = vshrl.u32 %v2307_v4, 16  ;;  %v4427_v43 = vsel %vm4226_vm10, %v3009_v2, %v1497_v17 }
  0xfe   : > { %3338 = vmatmul.mubr.msk.bf16.gmra.mrb[4].mxu0 %vm1269_vm8, %v3068_v62  ;;  %3286 = vmatmul.mubr.msk.bf16.vlgmr.msra.gmra.mrb[0].mxu1 %vm1269_vm8, %v2998_v15  ;;  %v2311_v16 = vld [vmem:[#allocation2 + $0x38] sm:$0xf]  ;;  %v3516_v53 = vld [vmem:[#allocation2 + $0x20] ss:$8 sps:$4 sm:$0xff]   ;;  %v2341_v57 = vshll.u32 %v4405_v51, 16  ;;  %v2363_v36 = vshll.u32 %v2307_v4, 16  ;;  %v2338_v44 = vor.u32 %v2337_v1, %v2334_v28 }
  0xff   : > { %3345 = vmatprep.mubr.msk.bf16.mxu0 %vm1269_vm8, %v3513_v18  ;;  %3294 = vmatpush3.bf16.msra.mxu1 %v4281_v63  ;;  %v4423_v63 = vsel %vm4226_vm10, %v3010_v27, %v1501_v3  ;;  %v2327_v20 = vshll.u32 %v4403_v25, 16  ;;  %v2346_v8 = vshrl.u32 %v2305_v34, 16  ;;  %v2349_v55 = vshll.u32 %v2305_v34, 16  ;;  %v3518_v23 = vld [vmem:[#allocation2 + $0x30] ss:$8 sps:$4 sm:$0xff]  }
 0x100   : > { %3289 = vmatprep.mubr.msk.bf16.mxu1 %vm1269_vm8, %v2999_v12  ;;  %3447 = vmatprep.subr.msk.bf16.mxu1 %vm1282_vm9, %v4344_v9  ;;  %v1509_v9 = vrot.slane %v4264_v29, 5  ;;  %v3019_v58 = vcombine.low %v4427_v43, %v4423_v63  ;;  %v2374_v62 = vshrl.u32 %v2309_v59, 16  ;;  %v2377_v18 = vshll.u32 %v2309_v59, 16  ;;  %v4439_v54 = vld [vmem:[#allocation2 + $0x2c] sm:$0x1] }
 0x101   : > { %v2388_v33 = vshrl.u32 %v2311_v16, 16  ;;  %v4437_v29 = vsel %vm4226_vm10, %v3011_v37, %v1505_v0  ;;  %v2324_v17 = vor.u32 %v2323_v24, %v2320_v49  ;;  %v2362_v30 = vrot.slane %v2360_v41, 4  ;;  %v4441_v6 = vld [vmem:[#allocation2 + $0x34] sm:$0x1]  ;;  %v2313_v15 = vld [vmem:[#allocation2 + $0x40] sm:$0xf] }
 0x102   : > { %v2365_v3 = vrot.slane %v2363_v36, 5  ;;  %v2343_v5 = vrot.slane %v2341_v57, 5  ;;  %v2391_v11 = vshll.u32 %v2311_v16, 16  ;;  %v2329_v35 = vrot.slane %v2327_v20, 5  ;;  %v4448_v12 = vld [vmem:[#allocation2 + $0x3c] sm:$0x1] }
 0x103   : > { %3296 = vmatpush3.bf16.msra.mxu1 %v1557_v31  ;;  %v1510_v31 = vsel %vm4226_vm10, %v3012_v50, %v1509_v9  ;;  %v2390_v13 = vrot.slane %v2388_v33, 4  ;;  %v2339_v42 = vrot.slane %v2338_v44, 4  ;;  %v2348_v56 = vrot.slane %v2346_v8, 4  ;;  %v4452_v4 = vld [vmem:[#allocation2 + $0x24] sm:$0x1] }
 0x104   : > { %3305 = vmatprep.subr.bf16.mxu1 %v4419_v21  ;;  %v2351_v10 = vrot.slane %v2349_v55, 5  ;;  %v2369_v2 = vshll.u32 %v4439_v54, 16  ;;  %v2376_v27 = vrot.slane %v2374_v62, 4  ;;  %v2379_v28 = vrot.slane %v2377_v18, 5  ;;  %v4460_v37 = vld [vmem:[%s4631_s3 + $0x60] sm:$0xff]  }
 0x105   : > { %v2393_v1 = vrot.slane %v2391_v11, 5  ;;  %v2366_v34 = vor.u32 %v2365_v3, %v2362_v30  ;;  %v2405_v0 = vshll.u32 %v2313_v15, 16  ;;  %v3522_v50 = vld [vmem:[%s4631_s3 + $0x2c] ss:$0 sps:$4 sm:$0xff]   ;;  %v2383_v59 = vshll.u32 %v4441_v6, 16 }
 0x106   : > { %3346 = vmatmul.mubr.msk.bf16.vlgmr.msra.gmra.mrb[0].mxu0 %vm1269_vm8, %v3516_v53  ;;  %3290 = vmatmul.mubr.msk.bf16.gmra.mrb[4].mxu1 %vm1269_vm8, %v3000_v22  ;;  %v2325_v22 = vrot.slane %v2324_v17, 4  ;;  %v3020_v24 = vcombine.low %v4437_v29, %v1510_v31  ;;  %v1466_v41 = vld [vmem:[#allocation2 + $0x30] sm:$0xe]  ;;  %v1513_v16 = vrot.slane %v4285_v60, 5  ;;  %v1517_v53 = vrot.slane %v4287_v19, 5 }
 0x107   : > { %3349 = vmatprep.mubr.msk.bf16.mxu0 %vm1269_vm8, %v3518_v23  ;;  %3297 = vmatprep.mubr.msk.bf16.mxu1 %vm1269_vm8, %v3018_v48  ;;  %v2402_v48 = vshrl.u32 %v2313_v15, 16  ;;  %v2394_v49 = vor.u32 %v2393_v1, %v2390_v13  ;;  %v2355_v9 = vshll.u32 %v4452_v4, 16  ;;  %v3520_v57 = vld [vmem:[#allocation2 + $0x40] ss:$8 sps:$4 sm:$0xff]   ;;  %v1467_v20 = vld [vmem:[#allocation2 + $0x38] sm:$0xe]  ;;  %v2352_v44 = vor.u32 %v2351_v10, %v2348_v56 }
 0x108   : > { %3354 = vmatpush3.bf16.msra.mxu0 %v4371_v7  ;;  %v2344_v7 = vsel %vm4160_vm7, %v2339_v42, %v2343_v5  ;;  %v2330_v36 = vsel %vm4160_vm7, %v2325_v22, %v2329_v35  ;;  %v2371_v8 = vrot.slane %v2369_v2, 5  ;;  %v2380_v55 = vor.u32 %v2379_v28, %v2376_v27  ;;  %v1769_v15 = vld [vmem:[#allocation2 + $0x28] sm:$0xf]  ;;  %v1771_v56 = vld [vmem:[#allocation2 + $0x30] sm:$0xf] }
 0x109   : > { %3453 = vmatprep.subr.msk.bf16.mxu0 %vm1282_vm9, %v4350_v38  ;;  %v2397_v38 = vshll.u32 %v4448_v12, 16  ;;  %v3091_v23 = vcombine.low %v2330_v36, %v2344_v7  ;;  %v2367_v62 = vrot.slane %v2366_v34, 4  ;;  %v2404_v18 = vrot.slane %v2402_v48, 4  ;;  %v3527_v1 = vld [vmem:[%s4631_s3 + $0x68] ss:$0 sps:$4 sm:$0xff]  }
 0x10a   : > { %v2407_v60 = vrot.slane %v2405_v0, 5  ;;  %v3013_v19 = vrot.slane %v1466_v41, 9  ;;  %v2385_v33 = vrot.slane %v2383_v59, 5  ;;  %v2395_v29 = vrot.slane %v2394_v49, 4  ;;  %v2543_v49 = vld [vmem:[#allocation2 + $0x18] sm:$0xe] }
 0x10b   : > { %v2399_v17 = vrot.slane %v2397_v38, 5  ;;  %v3014_v30 = vrot.slane %v1467_v20, 9  ;;  %v2357_v3 = vrot.slane %v2355_v9, 5  ;;  %v2422_v31 = vor.u32 %v4384_v61, %v4377_v52  ;;  %v3523_v41 = vld [vmem:[#allocation2 + $0x8] ss:$8 sps:$4 sm:$0xff]  }
 0x10c   : > { %3356 = vmatpush3.bf16.msra.mxu0 %v4375_v32  ;;  %v4478_v32 = vld [vmem:[#allocation2 + $0x4c] sm:$0x1]  ;;  %v1514_v13 = vsel %vm4226_vm10, %v3013_v19, %v1513_v16  ;;  %v1686_v63 = vsel %vm1282_vm9, %v3522_v50, 0  ;;  %v2381_v43 = vrot.slane %v2380_v55, 4  ;;  %v2353_v52 = vrot.slane %v2352_v44, 4 }
 0x10d   : > { %3365 = vmatprep.subr.bf16.mxu0 %v4460_v37  ;;  %v2425_v5 = vshll.u32 %v4478_v32, 16  ;;  %v1518_v11 = vsel %vm4226_vm10, %v3014_v30, %v1517_v53  ;;  %v2372_v61 = vsel %vm4160_vm7, %v2367_v62, %v2371_v8  ;;  %v2400_v42 = vsel %vm4160_vm7, %v2395_v29, %v2399_v17  ;;  %v3526_v29 = vld [vmem:[#allocation2 + $0x28] ss:$8 sps:$4 sm:$0xff]  }
 0x10e   : > { %3350 = vmatmul.mubr.msk.bf16.gmra.mrb[4].mxu0 %vm1269_vm8, %v3520_v57  ;;  %3298 = vmatmul.mubr.msk.bf16.vlgmr.msra.gmra.mrb[0].mxu1 %vm1269_vm8, %v3019_v58  ;;  %v4493_v58 = vld [vmem:[#allocation2 + $0x44] sm:$0x1]  ;;  %v2386_v35 = vsel %vm4160_vm7, %v2381_v43, %v2385_v33  ;;  %v2358_v10 = vsel %vm4160_vm7, %v2353_v52, %v2357_v3  ;;  %v2423_v27 = vrot.slane %v2422_v31, 4  ;;  %v3021_v22 = vcombine.low %v1514_v13, %v1518_v11  ;;  %v2542_v57 = vld [vmem:[#allocation2 + $0x10] sm:$0xe] }
 0x10f   : > { %3357 = vmatprep.mubr.msk.bf16.mxu0 %vm1269_vm8, %v3091_v23  ;;  %3306 = vmatpush3.bf16.msra.mxu1 %v4419_v21  ;;  %v2408_v21 = vor.u32 %v2407_v60, %v2404_v18  ;;  %v2411_v2 = vshll.u32 %v4493_v58, 16  ;;  %v2427_v28 = vrot.slane %v2425_v5, 5  ;;  %v3092_v34 = vcombine.low %v2358_v10, %v2372_v61  ;;  %v2545_v3 = vld [vmem:[#allocation2 + $0x28] sm:$0xe]  ;;  %v2546_v31 = vld [vmem:[#allocation2 + $0x30] sm:$0xe] }
 0x110   : > { %3301 = vmatprep.mubr.msk.bf16.mxu1 %vm1269_vm8, %v3020_v24  ;;  %3448 = vmatprep.subr.msk.bf16.mxu1 %vm1282_vm9, %v3522_v50  ;;  %v1834_v48 = vshrl.u32 %v1769_v15, 16  ;;  %v1837_v0 = vshll.u32 %v1769_v15, 16  ;;  %v3093_v7 = vcombine.low %v2386_v35, %v2400_v42  ;;  %v3529_v50 = vld [vmem:[%s4631_s3 + $0x30] sm:$0xff]   ;;  %v1848_v38 = vshrl.u32 %v1771_v56, 16  ;;  %v2547_v11 = vld [vmem:[#allocation2 + $0x38] sm:$0xe] }
 0x111   : > { %v2409_v59 = vrot.slane %v2408_v21, 4  ;;  %v1851_v24 = vshll.u32 %v1771_v56, 16  ;;  %v2572_v16 = vrot.slane %v4405_v51, 5  ;;  %v2413_v53 = vrot.slane %v2411_v2, 5  ;;  %v1773_v52 = vld [vmem:[#allocation2 + $0x38] sm:$0xf] }
 0x112   : > { %v2636_v9 = vsel %vm1282_vm9, %v3527_v1, 0  ;;  %v2428_v36 = vsel %vm4160_vm7, %v2423_v27, %v2427_v28  ;;  %v2568_v20 = vrot.slane %v4403_v25, 5  ;;  %v3102_v44 = vrot.slane %v2543_v49, 9  ;;  %v1775_v25 = vld [vmem:[#allocation2 + $0x40] sm:$0xf] }
 0x113   : > { %3308 = vmatpush3.bf16.msra.mxu1 %v1686_v63  ;;  %v1836_v8 = vrot.slane %v1834_v48, 4  ;;  %v2414_v51 = vsel %vm4160_vm7, %v2409_v59, %v2413_v53  ;;  %v1839_v55 = vrot.slane %v1837_v0, 5  ;;  %v1850_v23 = vrot.slane %v1848_v38, 4 }
 0x114   : > { %3377 = vmatprep.subr.bf16.mxu1 %v3529_v50  ;;  %v1853_v62 = vrot.slane %v1851_v24, 5  ;;  %v3101_v18 = vrot.slane %v2542_v57, 9  ;;  %v2573_v60 = vsel %vm4226_vm10, %v3102_v44, %v2572_v16  ;;  %v1843_v19 = vshll.u32 %v4304_v40, 16  ;;  %v2544_v40 = vld [vmem:[#allocation2 + $0x20] sm:$0xe] }
 0x115   : > { %v1857_v33 = vshll.u32 %v4306_v47, 16  ;;  %v3094_v17 = vcombine.low %v2414_v51, %v2428_v36  ;;  %v1840_v13 = vor.u32 %v1839_v55, %v1836_v8  ;;  %v2580_v43 = vrot.slane %v4439_v54, 5  ;;  %v3528_v57 = vld [vmem:[#allocation2 + $0x38] ss:$8 sps:$4 sm:$0xff]  }
 0x116   : > { %3358 = vmatmul.mubr.msk.bf16.vlgmr.msra.gmra.mrb[0].mxu0 %vm1269_vm8, %v3092_v34  ;;  %3302 = vmatmul.mubr.msk.bf16.gmra.mrb[4].mxu1 %vm1269_vm8, %v3021_v22  ;;  %v2569_v30 = vsel %vm4226_vm10, %v3101_v18, %v2568_v20  ;;  %v1854_v63 = vor.u32 %v1853_v62, %v1850_v23  ;;  %v2584_v47 = vrot.slane %v4441_v6, 5  ;;  %v2588_v61 = vrot.slane %v4448_v12, 5  ;;  %v3530_v12 = vld [vmem:[%s4631_s3 + $0x38] ss:$0 sps:$4 sm:$0xff]   ;;  %v2549_v34 = vld [vmem:[#allocation2 + $0x48] sm:$0xe] }
 0x117   : > { %3361 = vmatprep.mubr.msk.bf16.mxu0 %vm1269_vm8, %v3093_v7  ;;  %3309 = vmatprep.mubr.msk.bf16.mxu1 %vm1269_vm8, %v3523_v41  ;;  %v3112_v5 = vcombine.low %v2569_v30, %v2573_v60  ;;  %v1876_v21 = vshrl.u32 %v1775_v25, 16  ;;  %v1879_v15 = vshll.u32 %v1775_v25, 16  ;;  %v1845_v35 = vrot.slane %v1843_v19, 5  ;;  %v2548_v7 = vld [vmem:[#allocation2 + $0x40] sm:$0xe] }
 0x118   : > { %3366 = vmatpush3.bf16.msra.mxu0 %v4460_v37  ;;  %v3525_v37 = vld [vmem:[#allocation2 + $0x18] ss:$8 sps:$4 sm:$0xff]   ;;  %v1859_v42 = vrot.slane %v1857_v33, 5  ;;  %v2576_v56 = vrot.slane %v4452_v4, 5  ;;  %v3104_v54 = vrot.slane %v2545_v3, 9  ;;  %v3105_v10 = vrot.slane %v2546_v31, 9 }
 0x119   : > { %3454 = vmatprep.subr.msk.bf16.mxu0 %vm1282_vm9, %v3527_v1  ;;  %v3106_v2 = vrot.slane %v2547_v11, 9  ;;  %v1862_v27 = vshrl.u32 %v1773_v52, 16  ;;  %v1865_v6 = vshll.u32 %v1773_v52, 16  ;;  %v1841_v28 = vrot.slane %v1840_v13, 4 }
 0x11a   : > { %v1855_v1 = vrot.slane %v1854_v63, 4  ;;  %v3103_v22 = vrot.slane %v2544_v40, 9  ;;  %v2581_v4 = vsel %vm4226_vm10, %v3104_v54, %v2580_v43  ;;  %v2585_v48 = vsel %vm4226_vm10, %v3105_v10, %v2584_v47 }
 0x11b   : > { %v2589_v0 = vsel %vm4226_vm10, %v3106_v2, %v2588_v61  ;;  %v1881_v59 = vrot.slane %v1879_v15, 5  ;;  %v2596_v24 = vrot.slane %v4478_v32, 5  ;;  %v3108_v16 = vrot.slane %v2549_v34, 9 }
 0x11c   : > { %3368 = vmatpush3.bf16.msra.mxu0 %v2636_v9  ;;  %v1860_v49 = vsel %vm4160_vm7, %v1855_v1, %v1859_v42  ;;  %v2577_v38 = vsel %vm4226_vm10, %v3103_v22, %v2576_v56  ;;  %v1864_v53 = vrot.slane %v1862_v27, 4  ;;  %v1867_v9 = vrot.slane %v1865_v6, 5 }
 0x11d   : > { %v3113_v41 = vcombine.low %v2577_v38, %v2581_v4  ;;  %v1846_v36 = vsel %vm4160_vm7, %v1841_v28, %v1845_v35  ;;  %v3114_v20 = vcombine.low %v2585_v48, %v2589_v0  ;;  %v3107_v44 = vrot.slane %v2548_v7, 9 }
 0x11e   : > { %3362 = vmatmul.mubr.msk.bf16.gmra.mrb[4].mxu0 %vm1269_vm8, %v3094_v17  ;;  %3310 = vmatmul.mubr.msk.bf16.vlgmr.msra.gmra.mrb[0].mxu1 %vm1269_vm8, %v3525_v37  ;;  %v2592_v8 = vrot.slane %v4493_v58, 5  ;;  %v3046_v51 = vcombine.low %v1846_v36, %v1860_v49  ;;  %v1885_v32 = vshll.u32 %v4358_v26, 16  ;;  %v1868_v23 = vor.u32 %v1867_v9, %v1864_v53 }
 0x11f   : > { %3369 = vmatprep.mubr.msk.bf16.mxu0 %vm1269_vm8, %v3112_v5  ;;  %3379 = vmatpush3.bf16.msra.mxu1 %v3529_v50  ;;  %v1878_v50 = vrot.slane %v1876_v21, 4  ;;  %v2597_v58 = vsel %vm4226_vm10, %v3108_v16, %v2596_v24 }
 0x120   : > { %3313 = vmatprep.mubr.msk.bf16.mxu1 %vm1269_vm8, %v3526_v29  ;;  %3450 = vmatprep.subr.msk.bf16.mxu1 %vm1282_vm9, %v3530_v12  ;;  %v2593_v62 = vsel %vm4226_vm10, %v3107_v44, %v2592_v8  ;;  %v1887_v37 = vrot.slane %v1885_v32, 5  ;;  %v1869_v33 = vrot.slane %v1868_v23, 4  ;;  %vm2711_vm9 = vcmask 64512  }
 0x121   : > { %v1882_v55 = vor.u32 %v1881_v59, %v1878_v50  ;;  %v3115_v19 = vcombine.low %v2593_v62, %v2597_v58 }
 0x123   : > { %3380 = vmatpush3.bf16.msra.mxu1 %v4031_v14  ;;  %v1871_v14 = vshll.u32 %v4332_v45, 16  ;;  %v1883_v18 = vrot.slane %v1882_v55, 4 }
 0x125   : > { %v1873_v60 = vrot.slane %v1871_v14, 5  ;;  %v1888_v45 = vsel %vm4160_vm7, %v1883_v18, %v1887_v37 }
 0x126   : > { %3370 = vmatmul.mubr.msk.bf16.vlgmr.msra.gmra.mrb[0].mxu0 %vm1269_vm8, %v3113_v41  ;;  %3314 = vmatmul.mubr.msk.bf16.gmra.mrb[4].mxu1 %vm1269_vm8, %v3528_v57 }
 0x127   : > { %3373 = vmatprep.mubr.msk.bf16.mxu0 %vm1269_vm8, %v3114_v20  ;;  %3325 = vmatprep.mubr.msk.bf16.mxu1 %vm1269_vm8, %v3046_v51  ;;  %v1874_v26 = vsel %vm4160_vm7, %v1869_v33, %v1873_v60 }
 0x128   : > { %v3047_v25 = vcombine.low %v1874_v26, %v1888_v45 }
 0x12e   : > { %3374 = vmatmul.mubr.msk.bf16.gmra.mrb[4].mxu0 %vm1269_vm8, %v3115_v19 }
 0x132   : > { %3326 = vmatmul.mubr.msk.bf16.vlgmr.msra.gmra.mrb[4].mxu1 %vm1269_vm8, %v3047_v25 }
 0x1f1   : > { %v3311_v46 = vpop.f32.mrb[0].mxu1 }
 0x1f2   : > { %v1722_v29 = vpop.f32.mrb[1].mxu1 }
 0x1f3   : > { %v3312_v17 = vpop.f32.mrb[2].mxu1 }
 0x1f4   : > { %v1725_v30 = vpop.f32.mrb[3].mxu1 }
 0x1f9   : > { %v3371_v3 = vpop.f32.mrb[0].mxu0 }
 0x1fa   : > { %v3381_v31 = vadd.f32 %v3371_v3, %v3311_v46  ;;  %v2672_v5 = vpop.f32.mrb[1].mxu0 }
 0x1fb   : > { %v3382_v13 = vadd.f32 %v2672_v5, %v1722_v29  ;;  %v3372_v63 = vpop.f32.mrb[2].mxu0 }
 0x1fc   : > { %2714 = vst.msk [vmem:[%s3664_s27 + $0x10] sm:$0xff] %vm2711_vm9, %v3381_v31  ;;  %v3383_v39 = vadd.f32 %v3372_v63, %v3312_v17  ;;  %v2675_v43 = vpop.f32.mrb[3].mxu0  ;;  %v2748_v40 = vmul.f32 %v3381_v31, %v3381_v31  ;;  %v2724_v35 = vsel %vm2711_vm9, %v3381_v31, 0.0 }
 0x1fd   : > { %2712 = vst.msk [vmem:[%s3664_s27] sm:$0xff] %vm2711_vm9, %v3382_v13  ;;  %v2746_v11 = vmul.f32 %v3382_v13, %v3382_v13  ;;  %v3384_v52 = vadd.f32 %v2675_v43, %v1725_v30  ;;  %v2721_v47 = vsel %vm2711_vm9, %v3382_v13, 0.0  ;;  %v2720_v13 = vld [vmem:[%s3654_s14] sm:$0x1] }
 0x1fe   : > { %2715 = vst.msk [vmem:[%s3664_s27 + $0x18] sm:$0xff] %vm2711_vm9, %v3383_v39  ;;  %v2749_v56 = vmul.f32 %v3383_v39, %v3383_v39  ;;  %v2757_v12 = vsel %vm2711_vm9, %v2748_v40, 0.0  ;;  %v2726_v28 = vsel %vm2711_vm9, %v3383_v39, 0.0  ;;  %v2745_v43 = vld [vmem:[%s3659_s18] sm:$0x1] }
 0x1ff   : > { %2713 = vst.msk [vmem:[%s3664_s27 + $0x8] sm:$0xff] %vm2711_vm9, %v3384_v52  ;;  %v2722_v61 = vsel %vm2711_vm9, %v3384_v52, 0.0  ;;  %v2747_v21 = vmul.f32 %v3384_v52, %v3384_v52  ;;  %v2754_v42 = vsel %vm2711_vm9, %v2746_v11, 0.0 }
 0x200   : > { %v2723_v15 = vadd.f32 %v2722_v61, %v2721_v47  ;;  %v2759_v48 = vsel %vm2711_vm9, %v2749_v56, 0.0 }
 0x201   : > { %v2755_v54 = vsel %vm2711_vm9, %v2747_v21, 0.0  ;;  %v3375_v10 = vpop.f32.mrb[4].mxu0 }
 0x202   : > { %v2725_v2 = vadd.f32 %v2724_v35, %v2723_v15  ;;  %v2756_v27 = vadd.f32 %v2755_v54, %v2754_v42  ;;  %v2688_v6 = vpop.f32.mrb[5].mxu0 }
 0x203   : > { %v3376_v1 = vpop.f32.mrb[6].mxu0 }
 0x204   : > { %v2758_v22 = vadd.f32 %v2757_v12, %v2756_v27  ;;  %v2727_v4 = vadd.f32 %v2726_v28, %v2725_v2  ;;  %v2691_v34 = vpop.f32.mrb[7].mxu0 }
 0x205   : > { %v3327_v0 = vpop.f32.mrb[4].mxu1 }
 0x206   : > { %v2760_v7 = vadd.f32 %v2759_v48, %v2758_v22  ;;  %v3385_v50 = vadd.f32 %v3375_v10, %v3327_v0  ;;  %v1979_v59 = vpop.f32.mrb[5].mxu1 }
 0x207   : > { %v3386_v49 = vadd.f32 %v2688_v6, %v1979_v59  ;;  %v3328_v38 = vpop.f32.mrb[6].mxu1 }
 0x208   : > { %2718 = vst.msk [vmem:[%s3664_s27 + $0x30] sm:$0xff] %vm2711_vm9, %v3385_v50  ;;  %v3387_v24 = vadd.f32 %v3376_v1, %v3328_v38  ;;  %v1982_v41 = vpop.f32.mrb[7].mxu1  ;;  %v2752_v36 = vmul.f32 %v3385_v50, %v3385_v50  ;;  %v2732_v14 = vsel %vm2711_vm9, %v3385_v50, 0.0 }
 0x209   : > { %2716 = vst.msk [vmem:[%s3664_s27 + $0x20] sm:$0xff] %vm2711_vm9, %v3386_v49  ;;  %v2728_v16 = vsel %vm2711_vm9, %v3386_v49, 0.0  ;;  %v2750_v53 = vmul.f32 %v3386_v49, %v3386_v49  ;;  %v3388_v9 = vadd.f32 %v2691_v34, %v1982_v41 }
 0x20a   : > { %v2729_v57 = vadd.f32 %v2728_v16, %v2727_v4  ;;  %2719 = vst.msk [vmem:[%s3664_s27 + $0x38] sm:$0xff] %vm2711_vm9, %v3387_v24  ;;  %v2753_v32 = vmul.f32 %v3387_v24, %v3387_v24  ;;  %v2765_v18 = vsel %vm2711_vm9, %v2752_v36, 0.0  ;;  %v2734_v60 = vsel %vm2711_vm9, %v3387_v24, 0.0 }
 0x20b   : > { %v2761_v20 = vsel %vm2711_vm9, %v2750_v53, 0.0  ;;  %2717 = vst.msk [vmem:[%s3664_s27 + $0x28] sm:$0xff] %vm2711_vm9, %v3388_v9  ;;  %v2730_v44 = vsel %vm2711_vm9, %v3388_v9, 0.0  ;;  %v2751_v8 = vmul.f32 %v3388_v9, %v3388_v9 }
 0x20c   : > { %v2762_v51 = vadd.f32 %v2761_v20, %v2760_v7  ;;  %v2731_v55 = vadd.f32 %v2730_v44, %v2729_v57  ;;  %v2767_v33 = vsel %vm2711_vm9, %v2753_v32, 0.0 }
 0x20d   : > { %v2763_v23 = vsel %vm2711_vm9, %v2751_v8, 0.0 }
 0x20e   : > { %v2733_v62 = vadd.f32 %v2732_v14, %v2731_v55  ;;  %v2764_v58 = vadd.f32 %v2763_v23, %v2762_v51 }
 0x210   : > { %v2735_v37 = vadd.f32 %v2734_v60, %v2733_v62  ;;  %v2766_v19 = vadd.f32 %v2765_v18, %v2764_v58 }
 0x212   : > { %v2736_v45 = vrot.slane %v2735_v37, 4  ;;  %v2768_v26 = vadd.f32 %v2767_v33, %v2766_v19 }
 0x214   : > { %v2737_v25 = vadd.f32 %v2736_v45, %v2735_v37  ;;  %v2769_v46 = vrot.slane %v2768_v26, 4 }
 0x216   : > { %v2738_v29 = vrot.slane %v2737_v25, 2  ;;  %v2770_v17 = vadd.f32 %v2769_v46, %v2768_v26 }
 0x218   : > { %v2739_v30 = vadd.f32 %v2738_v29, %v2737_v25  ;;  %v2771_v3 = vrot.slane %v2770_v17, 2 }
 0x21a   : > { %v2740_v31 = vrot.slane %v2739_v30, 1  ;;  %v2772_v5 = vadd.f32 %v2771_v3, %v2770_v17 }
 0x21c   : > { %v2741_v63 = vadd.f32 %v2740_v31, %v2739_v30  ;;  %v2773_v39 = vrot.slane %v2772_v5, 1 }
 0x21e   : > { %v2742_v11 = vadd.f32 %v2741_v63, %v2720_v13  ;;  %v2774_v52 = vadd.f32 %v2773_v39, %v2772_v5 }
 0x220   : > { %2744 = vst.msk [vmem:[%s3654_s14] sm:$0x1] %vm517_vm5, %v2742_v11  ;;  %v2775_v40 = vadd.f32 %v2774_v52, %v2745_v43 }
 0x222   : > { %2776 = vst.msk [vmem:[%s3659_s18] sm:$0x1] %vm517_vm5, %v2775_v40 }
 0x223 PF: > { %s17_s25 = sadd.s32 1, %s3569_s25   ;;  %s4654_s27 = sld [smem:[#allocation3_spill]] }
 0x224   : > { %p14_p8 = scmp.ge.s32.totalorder %s17_s25, 10   ;;  %s4655_s21 = smov %s3561_s23 }
 0x225   : > { %s4656_s22 = smov %s3565_s24  ;;  %s4657_s23 = smov %s4660_s26 }
 0x226   :  { %16 = sbr.rel (!%p14_p8) target bundleno = 3 (0x3), region = 107 }
 0x229   : > { %s4658_s24 = smov %s4654_s27 }

</bundles_post_ra>
